<compile_context>
chip_gen: v7x
topology: tpu7x:2x2x1
jax: 0.10.0
libtpu: 0.0.40
codegen_flags: <defaults>
</compile_context>

<pallas_src>
import functools

import jax
import jax.numpy as jnp
import numpy as np
from jax.experimental import pallas as pl
from jax.experimental.pallas import tpu as pltpu


def _fused_forward_kernel(x_ref, w_ref, b_ref, wf_ref, bf_ref, o_ref, *,
                          num_layers, feature_dim):
    """y = concat_i(relu(x_i @ W_i + b_i)) @ Wf + bf ;  o = y / max(||y||_2, 1e-12)

    x_ref : [B, L, D]   f32
    w_ref : [L, D, F]   f32
    b_ref : [L, F]      f32
    wf_ref: [L*F, O]    f32   (single full block)
    bf_ref: [1, O]      f32
    o_ref : [B, O]      f32   (normalized output)

    The concat is never materialized: the final matmul is accumulated over
    K-slices of Wf (one F-row slice per input layer).
    """
    acc = jnp.zeros(o_ref.shape, dtype=jnp.float32)
    for i in range(num_layers):  # static unroll, L is small
        xi = x_ref[:, i, :]                                      # [B, D]
        hi = jnp.dot(xi, w_ref[i], preferred_element_type=jnp.float32)
        hi = jnp.maximum(hi + b_ref[pl.ds(i, 1), :], 0.0)        # bias + ReLU
        wf_i = wf_ref[pl.ds(i * feature_dim, feature_dim), :]    # [F, O] static slice
        acc = acc + jnp.dot(hi, wf_i, preferred_element_type=jnp.float32)
    y = acc + bf_ref[...]
    # F.normalize(p=2, dim=-1, eps=1e-12): y / max(||y||_2, eps)  (exact sqrt)
    ss = jnp.sum(y * y, axis=-1, keepdims=True)
    o_ref[...] = y / jnp.maximum(jnp.sqrt(ss), 1e-12)


def base_linear_processing_forward(x, w_stack, b_stack, w_final, b_final):
    B, L, D = x.shape
    Lw, Dw, F = w_stack.shape
    LF, O = w_final.shape
    assert Lw == L and Dw == D and LF == L * F and b_final.shape == (O,)

    b_final2d = b_final.reshape(1, O).astype(jnp.float32)

    kernel = functools.partial(_fused_forward_kernel, num_layers=L,
                               feature_dim=F)

    flops = 2 * B * (L * D * F + L * F * O) + 3 * B * O
    bytes_accessed = (x.size + w_stack.size + b_stack.size + w_final.size
                      + O + B * O) * 4

    return pl.pallas_call(
        kernel,
        out_shape=jax.ShapeDtypeStruct((B, O), jnp.float32),
        grid=(1,),
        in_specs=[
            pl.BlockSpec((B, L, D), lambda i: (0, 0, 0)),
            pl.BlockSpec((L, D, F), lambda i: (0, 0, 0)),
            pl.BlockSpec((L, F), lambda i: (0, 0)),
            pl.BlockSpec((L * F, O), lambda i: (0, 0)),   # single full weight block
            pl.BlockSpec((1, O), lambda i: (0, 0)),
        ],
        out_specs=pl.BlockSpec((B, O), lambda i: (0, 0)),
        compiler_params=pltpu.CompilerParams(
            # Fused row-wise reduction => must NOT be split across cores.
            dimension_semantics=("arbitrary",),
            # ~5 MiB actual footprint; pin well under v7x's 64 MiB physical /
            # 32 MiB default scoped VMEM so shape growth fails loudly.
            vmem_limit_bytes=32 * 1024 * 1024,
        ),
        cost_estimate=pl.CostEstimate(
            flops=flops, transcendentals=B, bytes_accessed=bytes_accessed),
    )(x, w_stack, b_stack, w_final, b_final2d)


def reference_forward(x, w_stack, b_stack, w_final, b_final):
    """Pure-JAX f32 reference matching the PyTorch module."""
    B, L, D = x.shape
    feats = []
    for i in range(L):
        h = jnp.maximum(x[:, i, :] @ w_stack[i] + b_stack[i], 0.0)
        feats.append(h)
    feat = jnp.concatenate(feats, axis=1)
    y = jnp.dot(feat, w_final, preferred_element_type=jnp.float32) + b_final
    norm = jnp.sqrt(jnp.sum(y * y, axis=-1, keepdims=True))
    return y / jnp.maximum(norm, 1e-12)


if __name__ == "__main__":
    # Small shapes consistent with the module: num_layers=4, feature_dim=256,
    # final_fc -> 1024, hidden (input) dim = 32, batch = 2.
    B, L, D, F, O = 2, 4, 32, 256, 1024

    key = jax.random.PRNGKey(0)
    k_x, k_w, k_b, k_wf, k_bf = jax.random.split(key, 5)

    x = jax.random.normal(k_x, (B, L, D), dtype=jnp.float32)
    w_stack = jax.random.normal(k_w, (L, D, F), dtype=jnp.float32) * 0.05
    b_stack = jax.random.normal(k_b, (L, F), dtype=jnp.float32) * 0.01
    w_final = jax.random.normal(k_wf, (L * F, O), dtype=jnp.float32) * 0.02
    b_final = jax.random.normal(k_bf, (O,), dtype=jnp.float32) * 0.01

    out = jax.block_until_ready(
        base_linear_processing_forward(x, w_stack, b_stack, w_final, b_final))

    ref = jax.block_until_ready(
        reference_forward(x, w_stack, b_stack, w_final, b_final))

    # Both paths are f32 with f32 accumulation; tolerance only covers MXU
    # multi-pass vs XLA-dot accumulation-order differences.
    np.testing.assert_allclose(np.asarray(out), np.asarray(ref),
                               rtol=2e-3, atol=2e-3)

    print("KERNEL_OK")
</pallas_src>

<mosaic_0001>
module attributes {stable_mosaic.version = 11 : i64} {
  func.func @_fused_forward_kernel(%arg0: i32, %arg1: memref<2x4x32xf32, #tpu.memory_space<vmem>>, %arg2: memref<4x32x256xf32, #tpu.memory_space<vmem>>, %arg3: memref<4x256xf32, #tpu.memory_space<vmem>>, %arg4: memref<1024x1024xf32, #tpu.memory_space<vmem>>, %arg5: memref<1x1024xf32, #tpu.memory_space<vmem>>, %arg6: memref<2x1024xf32, #tpu.memory_space<vmem>>) attributes {dimension_semantics = [#tpu.dimension_semantics<arbitrary>], iteration_bounds = array<i64: 1>, scalar_prefetch = 0 : i64, scratch_operands = 0 : i64, tpu.core_type = #tpu.core_type<tc>, window_params = [{pipeline_mode = #tpu.pipeline_mode<synchronous>, transform_indices = @transform_0, window_bounds = array<i64: 2, 4, 32>}, {pipeline_mode = #tpu.pipeline_mode<synchronous>, transform_indices = @transform_1, window_bounds = array<i64: 4, 32, 256>}, {pipeline_mode = #tpu.pipeline_mode<synchronous>, transform_indices = @transform_2, window_bounds = array<i64: 4, 256>}, {pipeline_mode = #tpu.pipeline_mode<synchronous>, transform_indices = @transform_3, window_bounds = array<i64: 1024, 1024>}, {pipeline_mode = #tpu.pipeline_mode<synchronous>, transform_indices = @transform_4, window_bounds = array<i64: 1, 1024>}, {pipeline_mode = #tpu.pipeline_mode<synchronous>, transform_indices = @transform_5, window_bounds = array<i64: 2, 1024>}]} {
    %cst = arith.constant 0.000000e+00 : f32
    %0 = vector.broadcast %cst : f32 to vector<2x1024xf32>
    %c0 = arith.constant 0 : index
    %c0_0 = arith.constant 0 : index
    %c0_1 = arith.constant 0 : index
    %1 = vector.load %arg1[%c0, %c0_0, %c0_1] : memref<2x4x32xf32, #tpu.memory_space<vmem>>, vector<2x1x32xf32>
    %2 = vector.shape_cast %1 : vector<2x1x32xf32> to vector<2x32xf32>
    %c0_2 = arith.constant 0 : index
    %c0_3 = arith.constant 0 : index
    %c0_4 = arith.constant 0 : index
    %3 = vector.load %arg2[%c0_2, %c0_3, %c0_4] : memref<4x32x256xf32, #tpu.memory_space<vmem>>, vector<1x32x256xf32>
    %4 = vector.shape_cast %3 : vector<1x32x256xf32> to vector<32x256xf32>
    %cst_5 = arith.constant dense<0.000000e+00> : vector<2x256xf32>
    %5 = tpu.matmul %2, %4, %cst_5 {dimension_numbers = #tpu.dot_dimension_numbers<[1], [0], [0], [1], [0, 0, 1, 1], [], []>} : vector<2x32xf32>, vector<32x256xf32>, vector<2x256xf32> -> vector<2x256xf32>
    %c0_6 = arith.constant 0 : index
    %c0_7 = arith.constant 0 : index
    %6 = vector.load %arg3[%c0_6, %c0_7] : memref<4x256xf32, #tpu.memory_space<vmem>>, vector<1x256xf32>
    %7 = vector.broadcast %6 : vector<1x256xf32> to vector<2x256xf32>
    %8 = arith.addf %5, %7 : vector<2x256xf32>
    %cst_8 = arith.constant 0.000000e+00 : f32
    %9 = vector.broadcast %cst_8 : f32 to vector<2x256xf32>
    %10 = arith.maximumf %8, %9 : vector<2x256xf32>
    %c0_9 = arith.constant 0 : index
    %c0_10 = arith.constant 0 : index
    %11 = vector.load %arg4[%c0_9, %c0_10] : memref<1024x1024xf32, #tpu.memory_space<vmem>>, vector<256x1024xf32>
    %cst_11 = arith.constant dense<0.000000e+00> : vector<2x1024xf32>
    %12 = tpu.matmul %10, %11, %cst_11 {dimension_numbers = #tpu.dot_dimension_numbers<[1], [0], [0], [1], [0, 0, 1, 1], [], []>} : vector<2x256xf32>, vector<256x1024xf32>, vector<2x1024xf32> -> vector<2x1024xf32>
    %13 = arith.addf %0, %12 : vector<2x1024xf32>
    %c0_12 = arith.constant 0 : index
    %c1 = arith.constant 1 : index
    %c0_13 = arith.constant 0 : index
    %14 = vector.load %arg1[%c0_12, %c1, %c0_13] : memref<2x4x32xf32, #tpu.memory_space<vmem>>, vector<2x1x32xf32>
    %15 = vector.shape_cast %14 : vector<2x1x32xf32> to vector<2x32xf32>
    %c1_14 = arith.constant 1 : index
    %c0_15 = arith.constant 0 : index
    %c0_16 = arith.constant 0 : index
    %16 = vector.load %arg2[%c1_14, %c0_15, %c0_16] : memref<4x32x256xf32, #tpu.memory_space<vmem>>, vector<1x32x256xf32>
    %17 = vector.shape_cast %16 : vector<1x32x256xf32> to vector<32x256xf32>
    %cst_17 = arith.constant dense<0.000000e+00> : vector<2x256xf32>
    %18 = tpu.matmul %15, %17, %cst_17 {dimension_numbers = #tpu.dot_dimension_numbers<[1], [0], [0], [1], [0, 0, 1, 1], [], []>} : vector<2x32xf32>, vector<32x256xf32>, vector<2x256xf32> -> vector<2x256xf32>
    %c1_18 = arith.constant 1 : index
    %c0_19 = arith.constant 0 : index
    %19 = vector.load %arg3[%c1_18, %c0_19] : memref<4x256xf32, #tpu.memory_space<vmem>>, vector<1x256xf32>
    %20 = vector.broadcast %19 : vector<1x256xf32> to vector<2x256xf32>
    %21 = arith.addf %18, %20 : vector<2x256xf32>
    %cst_20 = arith.constant 0.000000e+00 : f32
    %22 = vector.broadcast %cst_20 : f32 to vector<2x256xf32>
    %23 = arith.maximumf %21, %22 : vector<2x256xf32>
    %c256 = arith.constant 256 : index
    %c0_21 = arith.constant 0 : index
    %24 = vector.load %arg4[%c256, %c0_21] : memref<1024x1024xf32, #tpu.memory_space<vmem>>, vector<256x1024xf32>
    %cst_22 = arith.constant dense<0.000000e+00> : vector<2x1024xf32>
    %25 = tpu.matmul %23, %24, %cst_22 {dimension_numbers = #tpu.dot_dimension_numbers<[1], [0], [0], [1], [0, 0, 1, 1], [], []>} : vector<2x256xf32>, vector<256x1024xf32>, vector<2x1024xf32> -> vector<2x1024xf32>
    %26 = arith.addf %13, %25 : vector<2x1024xf32>
    %c0_23 = arith.constant 0 : index
    %c2 = arith.constant 2 : index
    %c0_24 = arith.constant 0 : index
    %27 = vector.load %arg1[%c0_23, %c2, %c0_24] : memref<2x4x32xf32, #tpu.memory_space<vmem>>, vector<2x1x32xf32>
    %28 = vector.shape_cast %27 : vector<2x1x32xf32> to vector<2x32xf32>
    %c2_25 = arith.constant 2 : index
    %c0_26 = arith.constant 0 : index
    %c0_27 = arith.constant 0 : index
    %29 = vector.load %arg2[%c2_25, %c0_26, %c0_27] : memref<4x32x256xf32, #tpu.memory_space<vmem>>, vector<1x32x256xf32>
    %30 = vector.shape_cast %29 : vector<1x32x256xf32> to vector<32x256xf32>
    %cst_28 = arith.constant dense<0.000000e+00> : vector<2x256xf32>
    %31 = tpu.matmul %28, %30, %cst_28 {dimension_numbers = #tpu.dot_dimension_numbers<[1], [0], [0], [1], [0, 0, 1, 1], [], []>} : vector<2x32xf32>, vector<32x256xf32>, vector<2x256xf32> -> vector<2x256xf32>
    %c2_29 = arith.constant 2 : index
    %c0_30 = arith.constant 0 : index
    %32 = vector.load %arg3[%c2_29, %c0_30] : memref<4x256xf32, #tpu.memory_space<vmem>>, vector<1x256xf32>
    %33 = vector.broadcast %32 : vector<1x256xf32> to vector<2x256xf32>
    %34 = arith.addf %31, %33 : vector<2x256xf32>
    %cst_31 = arith.constant 0.000000e+00 : f32
    %35 = vector.broadcast %cst_31 : f32 to vector<2x256xf32>
    %36 = arith.maximumf %34, %35 : vector<2x256xf32>
    %c512 = arith.constant 512 : index
    %c0_32 = arith.constant 0 : index
    %37 = vector.load %arg4[%c512, %c0_32] : memref<1024x1024xf32, #tpu.memory_space<vmem>>, vector<256x1024xf32>
    %cst_33 = arith.constant dense<0.000000e+00> : vector<2x1024xf32>
    %38 = tpu.matmul %36, %37, %cst_33 {dimension_numbers = #tpu.dot_dimension_numbers<[1], [0], [0], [1], [0, 0, 1, 1], [], []>} : vector<2x256xf32>, vector<256x1024xf32>, vector<2x1024xf32> -> vector<2x1024xf32>
    %39 = arith.addf %26, %38 : vector<2x1024xf32>
    %c0_34 = arith.constant 0 : index
    %c3 = arith.constant 3 : index
    %c0_35 = arith.constant 0 : index
    %40 = vector.load %arg1[%c0_34, %c3, %c0_35] : memref<2x4x32xf32, #tpu.memory_space<vmem>>, vector<2x1x32xf32>
    %41 = vector.shape_cast %40 : vector<2x1x32xf32> to vector<2x32xf32>
    %c3_36 = arith.constant 3 : index
    %c0_37 = arith.constant 0 : index
    %c0_38 = arith.constant 0 : index
    %42 = vector.load %arg2[%c3_36, %c0_37, %c0_38] : memref<4x32x256xf32, #tpu.memory_space<vmem>>, vector<1x32x256xf32>
    %43 = vector.shape_cast %42 : vector<1x32x256xf32> to vector<32x256xf32>
    %cst_39 = arith.constant dense<0.000000e+00> : vector<2x256xf32>
    %44 = tpu.matmul %41, %43, %cst_39 {dimension_numbers = #tpu.dot_dimension_numbers<[1], [0], [0], [1], [0, 0, 1, 1], [], []>} : vector<2x32xf32>, vector<32x256xf32>, vector<2x256xf32> -> vector<2x256xf32>
    %c3_40 = arith.constant 3 : index
    %c0_41 = arith.constant 0 : index
    %45 = vector.load %arg3[%c3_40, %c0_41] : memref<4x256xf32, #tpu.memory_space<vmem>>, vector<1x256xf32>
    %46 = vector.broadcast %45 : vector<1x256xf32> to vector<2x256xf32>
    %47 = arith.addf %44, %46 : vector<2x256xf32>
    %cst_42 = arith.constant 0.000000e+00 : f32
    %48 = vector.broadcast %cst_42 : f32 to vector<2x256xf32>
    %49 = arith.maximumf %47, %48 : vector<2x256xf32>
    %c768 = arith.constant 768 : index
    %c0_43 = arith.constant 0 : index
    %50 = vector.load %arg4[%c768, %c0_43] : memref<1024x1024xf32, #tpu.memory_space<vmem>>, vector<256x1024xf32>
    %cst_44 = arith.constant dense<0.000000e+00> : vector<2x1024xf32>
    %51 = tpu.matmul %49, %50, %cst_44 {dimension_numbers = #tpu.dot_dimension_numbers<[1], [0], [0], [1], [0, 0, 1, 1], [], []>} : vector<2x256xf32>, vector<256x1024xf32>, vector<2x1024xf32> -> vector<2x1024xf32>
    %52 = arith.addf %39, %51 : vector<2x1024xf32>
    %c0_45 = arith.constant 0 : index
    %c0_46 = arith.constant 0 : index
    %53 = vector.load %arg5[%c0_45, %c0_46] : memref<1x1024xf32, #tpu.memory_space<vmem>>, vector<1x1024xf32>
    %54 = vector.broadcast %53 : vector<1x1024xf32> to vector<2x1024xf32>
    %55 = arith.addf %52, %54 : vector<2x1024xf32>
    %56 = arith.mulf %55, %55 : vector<2x1024xf32>
    %cst_47 = arith.constant dense<0.000000e+00> : vector<2xf32>
    %57 = vector.multi_reduction <add>, %56, %cst_47 [1] : vector<2x1024xf32> to vector<2xf32>
    %58 = vector.shape_cast %57 : vector<2xf32> to vector<2x1xf32>
    %59 = math.sqrt %58 : vector<2x1xf32>
    %cst_48 = arith.constant 9.99999996E-13 : f32
    %60 = vector.broadcast %cst_48 : f32 to vector<2x1xf32>
    %61 = arith.maximumf %59, %60 : vector<2x1xf32>
    %62 = vector.broadcast %61 : vector<2x1xf32> to vector<2x1024xf32>
    %63 = arith.divf %55, %62 : vector<2x1024xf32>
    %c0_49 = arith.constant 0 : index
    %c0_50 = arith.constant 0 : index
    %64 = vector.load %arg6[%c0_49, %c0_50] : memref<2x1024xf32, #tpu.memory_space<vmem>>, vector<2x1024xf32>
    tpu.vector_store %arg6[%c0_49, %c0_50], %63 {strides = array<i32>} : memref<2x1024xf32, #tpu.memory_space<vmem>>, vector<2x1024xf32>,
    return
  }
  func.func @transform_0(%arg0: i32) -> (i32, i32, i32) {
    %c0_i32 = arith.constant 0 : i32
    %c0_i32_0 = arith.constant 0 : i32
    %c0_i32_1 = arith.constant 0 : i32
    %c0_i32_2 = arith.constant 0 : i32
    return %c0_i32, %c0_i32_0, %c0_i32_1 : i32, i32, i32
  }
  func.func @transform_1(%arg0: i32) -> (i32, i32, i32) {
    %c0_i32 = arith.constant 0 : i32
    %c0_i32_0 = arith.constant 0 : i32
    %c0_i32_1 = arith.constant 0 : i32
    %c0_i32_2 = arith.constant 0 : i32
    return %c0_i32, %c0_i32_0, %c0_i32_1 : i32, i32, i32
  }
  func.func @transform_2(%arg0: i32) -> (i32, i32) {
    %c0_i32 = arith.constant 0 : i32
    %c0_i32_0 = arith.constant 0 : i32
    %c0_i32_1 = arith.constant 0 : i32
    return %c0_i32, %c0_i32_0 : i32, i32
  }
  func.func @transform_3(%arg0: i32) -> (i32, i32) {
    %c0_i32 = arith.constant 0 : i32
    %c0_i32_0 = arith.constant 0 : i32
    %c0_i32_1 = arith.constant 0 : i32
    return %c0_i32, %c0_i32_0 : i32, i32
  }
  func.func @transform_4(%arg0: i32) -> (i32, i32) {
    %c0_i32 = arith.constant 0 : i32
    %c0_i32_0 = arith.constant 0 : i32
    %c0_i32_1 = arith.constant 0 : i32
    return %c0_i32, %c0_i32_0 : i32, i32
  }
  func.func @transform_5(%arg0: i32) -> (i32, i32) {
    %c0_i32 = arith.constant 0 : i32
    %c0_i32_0 = arith.constant 0 : i32
    %c0_i32_1 = arith.constant 0 : i32
    return %c0_i32, %c0_i32_0 : i32, i32
  }
}

</mosaic_0001>

<bundles_post_ra>
// kernel: tpu_custom_call.1
= control target key start
LH: loop header
LB: loop body
LE: loop exit
PB: predicated region body
PF: predicated region fallthrough
CT: control target
= control target key end

     0   :  { %10 = vsyncpa [#allocation3], 0  ;;  %s4280_s0 = inlined_call_operand.hbm [shape: f32[2,4,32], index: 0, kind: input, shape index: {}]   ;;  %s4281_s1 = inlined_call_operand.hbm [shape: f32[4,32,256], index: 1, kind: input, shape index: {}]   ;;  %s4282_s2 = inlined_call_operand.hbm [shape: f32[4,256], index: 2, kind: input, shape index: {}]   ;;  %s4283_s3 = inlined_call_operand.hbm [shape: f32[1024,1024], index: 3, kind: input, shape index: {}]   ;;  %s4284_s4 = inlined_call_operand.hbm [shape: f32[1,1024], index: 4, kind: input, shape index: {}]   ;;  %s4285_s5 = inlined_call_operand.hbm [shape: f32[2,1024], index: 5, kind: output, shape index: {}]  }
   0x1   :  { %11 = vsyncpa [#allocation6], 0 }
   0x2   :  { %12 = vsyncpa [#allocation9], 0 }
   0x3   :  { %13 = vsyncpa [#allocation4], 0  ;;  %s4070_s18 = smov [#allocation5]   ;;  %s3930_s22 = scalar_lea.hbm %s4281_s1, 4096 }
   0x4   :  { %s31_s19 = sshll.u32 %s4070_s18, 4  ;;  %p3931_p0 = scmp.ne.s32.totalorder %s4281_s1, %s3930_s22  ;;  %s32_s19 = int_to_ptr.vmem [resolvable:$true] %s31_s19 }
   0x5   :  { %p3934_p1 = scmp.lt.u32.totalorder %s3930_s22, %s4281_s1 }
   0x7   :  { %p3936_p2 = pnand %p3934_p1, %p3931_p0 }
   0x9   :  { %3939 = shalt.err (!%p3936_p2)
}
   0xa   :  { %s3940_s27 = scalar_lea.vmem %s32_s19, 4096  ;;  %p3945_p4 = scmp.lt.s32.totalorder %s32_s19, %s32_s19 }
   0xb   :  { %p3941_p3 = scmp.ne.s32.totalorder %s32_s19, %s3940_s27  ;;  %p3946_p5 = scmp.lt.s32.totalorder %s3940_s27, %s3940_s27 }
   0xd   :  { %p3947_p6 = por %p3946_p5, %p3945_p4 }
   0xf   :  { %p3948_p7 = pnand %p3947_p6, %p3941_p3 }
  0x11   :  { %3951 = shalt.err (!%p3948_p7)
}
  0x12   :  { %s4071_s28 = smov 256   ;;  %s4072_s29 = smov 16  }
  0x13   :  { %37 = dma.hbm_to_vmem [thread:$0]  %s4281_s1, 4096, %s32_s19, [#allocation6], %s4071_s28, %s4071_s28, %s4072_s29  }
  0x14   :  { %s4073_s7 = smov [#allocation8]   ;;  %s4074_s9 = smov [#allocation2]  }
  0x15   :  { %s53_s8 = sshll.u32 %s4073_s7, 4  ;;  %s19_s10 = sshll.u32 %s4074_s9, 4  ;;  %s54_s8 = int_to_ptr.vmem [resolvable:$true] %s53_s8  ;;  %s20_s10 = int_to_ptr.vmem [resolvable:$true] %s19_s10 }
  0x16   :  { %s3952_s13 = scalar_lea.hbm %s4283_s3, 131072 }
  0x17   :  { %p3953_p8 = scmp.ne.s32.totalorder %s4283_s3, %s3952_s13  ;;  %p3956_p9 = scmp.lt.u32.totalorder %s3952_s13, %s4283_s3 }
  0x19   :  { %p3958_p10 = pnand %p3956_p9, %p3953_p8 }
  0x1b   :  { %3961 = shalt.err (!%p3958_p10)
}
  0x1c   :  { %s3962_s1 = scalar_lea.vmem %s54_s8, 131072  ;;  %p3967_p12 = scmp.lt.s32.totalorder %s54_s8, %s54_s8 }
  0x1d   :  { %p3963_p11 = scmp.ne.s32.totalorder %s54_s8, %s3962_s1  ;;  %p3968_p13 = scmp.lt.s32.totalorder %s3962_s1, %s3962_s1 }
  0x1f   :  { %p3969_p0 = por %p3968_p13, %p3967_p12 }
  0x21   :  { %p3970_p1 = pnand %p3969_p0, %p3963_p11 }
  0x23   :  { %3973 = shalt.err (!%p3970_p1)
}
  0x24   :  { %s4075_s18 = smov 1024   ;;  %s4076_s19 = smov 64  }
  0x25   :  { %59 = dma.hbm_to_vmem [thread:$0]  %s4283_s3, 131072, %s54_s8, [#allocation9], %s4075_s18, %s4075_s18, %s4076_s19  }
  0x26   :  { %s3974_s24 = scalar_lea.hbm %s4280_s0, 128 }
  0x27   :  { %p3975_p2 = scmp.ne.s32.totalorder %s4280_s0, %s3974_s24  ;;  %p3978_p3 = scmp.lt.u32.totalorder %s3974_s24, %s4280_s0 }
  0x29   :  { %p3980_p4 = pnand %p3978_p3, %p3975_p2 }
  0x2b   :  { %3983 = shalt.err (!%p3980_p4)
}
  0x2c   :  { %s3984_s29 = scalar_lea.vmem %s20_s10, 128  ;;  %p3989_p6 = scmp.lt.s32.totalorder %s20_s10, %s20_s10 }
  0x2d   :  { %p3985_p5 = scmp.ne.s32.totalorder %s20_s10, %s3984_s29  ;;  %p3990_p7 = scmp.lt.s32.totalorder %s3984_s29, %s3984_s29 }
  0x2f   :  { %p3991_p8 = por %p3990_p7, %p3989_p6 }
  0x31   :  { %p3992_p9 = pnand %p3991_p8, %p3985_p5 }
  0x33   :  { %3995 = shalt.err (!%p3992_p9)
}
  0x34   :  { %s4077_s3 = smov 4   ;;  %s4078_s7 = smov [#allocation7]  }
  0x35   :  { %25 = dma.hbm_to_vmem [thread:$0]  %s4280_s0, 128, %s20_s10, [#allocation3], %s4076_s19, %s4076_s19, %s4077_s3  }
  0x36   :  { %s44_s8 = sshll.u32 %s4078_s7, 4  ;;  %s4079_s9 = smov [#allocation10]   ;;  %s45_s8 = int_to_ptr.vmem [resolvable:$true] %s44_s8 }
  0x37   :  { %s66_s11 = sshll.u32 %s4079_s9, 4  ;;  %s3996_s14 = scalar_lea.hbm %s4282_s2, 128  ;;  %s67_s11 = int_to_ptr.vmem [resolvable:$true] %s66_s11 }
  0x38   :  { %p3997_p10 = scmp.ne.s32.totalorder %s4282_s2, %s3996_s14  ;;  %p4000_p11 = scmp.lt.u32.totalorder %s3996_s14, %s4282_s2 }
  0x3a   :  { %p4002_p12 = pnand %p4000_p11, %p3997_p10 }
  0x3c   :  { %4005 = shalt.err (!%p4002_p12)
}
  0x3d   :  { %s4006_s0 = scalar_lea.vmem %s45_s8, 128  ;;  %p4011_p0 = scmp.lt.s32.totalorder %s45_s8, %s45_s8 }
  0x3e   :  { %p4007_p13 = scmp.ne.s32.totalorder %s45_s8, %s4006_s0  ;;  %p4012_p1 = scmp.lt.s32.totalorder %s4006_s0, %s4006_s0 }
  0x40   :  { %p4013_p2 = por %p4012_p1, %p4011_p0 }
  0x42   :  { %p4014_p3 = pnand %p4013_p2, %p4007_p13 }
  0x44   :  { %4017 = shalt.err (!%p4014_p3)
}
  0x45   :  { %47 = dma.hbm_to_vmem [thread:$0]  %s4282_s2, 128, %s45_s8, [#allocation6]  }
  0x46   :  { %s4018_s21 = scalar_lea.hbm %s4284_s4, 128 }
  0x47   :  { %p4019_p4 = scmp.ne.s32.totalorder %s4284_s4, %s4018_s21  ;;  %p4022_p5 = scmp.lt.u32.totalorder %s4018_s21, %s4284_s4 }
  0x49   :  { %p4024_p6 = pnand %p4022_p5, %p4019_p4 }
  0x4b   :  { %4027 = shalt.err (!%p4024_p6)
}
  0x4c   :  { %s4028_s26 = scalar_lea.vmem %s67_s11, 128  ;;  %p4033_p8 = scmp.lt.s32.totalorder %s67_s11, %s67_s11 }
  0x4d   :  { %p4029_p7 = scmp.ne.s32.totalorder %s67_s11, %s4028_s26  ;;  %p4034_p9 = scmp.lt.s32.totalorder %s4028_s26, %s4028_s26 }
  0x4f   :  { %p4035_p10 = por %p4034_p9, %p4033_p8 }
  0x51   :  { %p4036_p11 = pnand %p4035_p10, %p4029_p7 }
  0x53   :  { %4039 = shalt.err (!%p4036_p11)
}
  0x54   :  { %69 = dma.hbm_to_vmem [thread:$0]  %s4284_s4, 128, %s67_s11, [#allocation9]  }
  0x55   :  { %4062 = dma.done.wait [#allocation3], 128  }
  0x56   :  { %4063 = vsyncadd [#allocation3], 4294967168 }
  0x57   :  { %4064 = dma.done.wait [#allocation6], 4224  }
  0x58   :  { %4065 = vsyncadd [#allocation6], 4294963072 }
  0x59   :  { %4066 = dma.done.wait [#allocation9], 131200  }
  0x5a   :  { %4067 = vsyncadd [#allocation9], 4294836096  ;;  %v4080_v0 = vmov 0.0   ;;  %v448_v1 = vld [vmem:[#allocation5 + $0x48] sm:$0xff]  ;;  %v450_v2 = vld [vmem:[#allocation5 + $0x58] sm:$0xff]  ;;  %vm110_vm0 = vcmask 1041409  }
  0x5b   :  { %538 = vmatprep.mubr.f32.mxu1 %v4080_v0  ;;  %179 = vmatprep.mubr.f32.mxu0 %v4080_v0  ;;  %v447_v3 = vld [vmem:[#allocation5 + $0x40] sm:$0xff]  ;;  %v2841_v4 = vpack.c.bf16 %v450_v2, %v448_v1  ;;  %v449_v5 = vld [vmem:[#allocation5 + $0x50] sm:$0xff]  ;;  %v452_v6 = vld [vmem:[#allocation5 + $0x68] sm:$0xff]  ;;  %vm112_vm1 = vcmask 261120   ;;  %vm2731_vm2 = vcmask 1041408   ;;  %s4082_s4 = smov [#allocation11]  }
  0x5c   :  { %v454_v7 = vld [vmem:[#allocation5 + $0x78] sm:$0xff]  ;;  %v2843_v8 = vpack.c.bf16 %v449_v5, %v447_v3  ;;  %v451_v10 = vld [vmem:[#allocation5 + $0x60] sm:$0xff]  ;;  %v453_v11 = vld [vmem:[#allocation5 + $0x70] sm:$0xff]  ;;  %s2818_s28 = sshll.u32 %s4082_s4, 4  ;;  %s2819_s28 = int_to_ptr.vmem [resolvable:$true] %s2818_s28 }
  0x5d   :  { %v2845_v9 = vpack.c.bf16 %v454_v7, %v452_v6  ;;  %2842 = vmatprep.subr.bf16.mxu1 %v2841_v4  ;;  %v444_v12 = vld [vmem:[#allocation2 + $0x1] sm:$0x1]  ;;  %v445_v13 = vld [vmem:[#allocation2 + $0x5] sm:$0x1]  ;;  %v88_v14 = vld [vmem:[#allocation5 + $0x8] sm:$0xff]  ;;  %v2847_v16 = vpack.c.bf16 %v453_v11, %v451_v10  ;;  %s4040_s29 = scalar_lea.vmem %s2819_s28, 256  ;;  %p4045_p13 = scmp.lt.s32.totalorder %s2819_s28, %s2819_s28 }
  0x5e   :  { %v90_v15 = vld [vmem:[#allocation5 + $0x18] sm:$0xff]  ;;  %2844 = vmatpush1.bf16.msra.mxu1 %v2843_v8  ;;  %v470_v17 = vrot.slane %v445_v13, 7  ;;  %v87_v19 = vld [vmem:[#allocation5] sm:$0xff]  ;;  %v89_v20 = vld [vmem:[#allocation5 + $0x10] sm:$0xff]  ;;  %p4041_p12 = scmp.ne.s32.totalorder %s2819_s28, %s4040_s29  ;;  %p4046_p0 = scmp.lt.s32.totalorder %s4040_s29, %s4040_s29 }
  0x5f   :  { %v2833_v18 = vpack.c.bf16 %v90_v15, %v88_v14  ;;  %v92_v21 = vld [vmem:[#allocation5 + $0x28] sm:$0xff]  ;;  %2846 = vmatprep.subr.bf16.mxu1 %v2845_v9  ;;  %v2835_v22 = vpack.c.bf16 %v89_v20, %v87_v19  ;;  %v94_v23 = vld [vmem:[#allocation5 + $0x38] sm:$0xff]  ;;  %v91_v24 = vld [vmem:[#allocation5 + $0x20] sm:$0xff] }
  0x60   :  { %v93_v25 = vld [vmem:[#allocation5 + $0x30] sm:$0xff]  ;;  %v2837_v26 = vpack.c.bf16 %v94_v23, %v92_v21  ;;  %v85_v27 = vld [vmem:[#allocation2] sm:$0x1]  ;;  %v86_v28 = vld [vmem:[#allocation2 + $0x4] sm:$0x1]  ;;  %v471_v35 = vsel %vm110_vm0, %v470_v17, %v444_v12  ;;  %p4047_p1 = por %p4046_p0, %p4045_p13 }
  0x61   :  { %2834 = vmatprep.subr.bf16.mxu0 %v2833_v18  ;;  %v548_v29 = vld [vmem:[#allocation8 + $0x808] sm:$0xff]  ;;  %v2839_v30 = vpack.c.bf16 %v93_v25, %v91_v24  ;;  %v109_v31 = vrot.slane %v86_v28, 7  ;;  %v550_v33 = vld [vmem:[#allocation8 + $0x818] sm:$0xff]  ;;  %v547_v38 = vld [vmem:[#allocation8 + $0x800] sm:$0xff] }
  0x62   :  { %2836 = vmatpush1.bf16.msra.mxu0 %v2835_v22  ;;  %v556_v32 = vld [vmem:[#allocation8 + $0x848] sm:$0xff]  ;;  %v558_v34 = vld [vmem:[#allocation8 + $0x858] sm:$0xff]  ;;  %2848 = vmatpush1.bf16.msra.mxu1 %v2847_v16  ;;  %v555_v39 = vld [vmem:[#allocation8 + $0x840] sm:$0xff]  ;;  %p4048_p2 = pnand %p4047_p1, %p4041_p12 }
  0x63   :  { %2838 = vmatprep.subr.bf16.mxu0 %v2837_v26  ;;  %v2849_v36 = vpack.c.bf16 %v556_v32, %v548_v29  ;;  %v2913_v37 = vpack.c.bf16 %v558_v34, %v550_v33  ;;  %v549_v40 = vld [vmem:[#allocation8 + $0x810] sm:$0xff]  ;;  %v564_v42 = vld [vmem:[#allocation8 + $0x888] sm:$0xff]  ;;  %v566_v45 = vld [vmem:[#allocation8 + $0x898] sm:$0xff]  ;;  %v111_v47 = vsel %vm110_vm0, %v109_v31, %v85_v27  ;;  %v2851_v48 = vpack.c.bf16 %v555_v39, %v547_v38 }
  0x64   :  { %v557_v41 = vld [vmem:[#allocation8 + $0x850] sm:$0xff]  ;;  %v572_v43 = vld [vmem:[#allocation8 + $0x8c8] sm:$0xff]  ;;  %v574_v46 = vld [vmem:[#allocation8 + $0x8d8] sm:$0xff] }
  0x65   :  { %2914 = vmatprep.subr.bf16.mxu1 %v2913_v37  ;;  %v2915_v44 = vpack.c.bf16 %v557_v41, %v549_v40  ;;  %2830 = vmatmul.mubr.msk.f32.vlgmr.msra.gmra.mrb[0].mxu1 %vm112_vm1, %v471_v35  ;;  %v2917_v49 = vpack.c.bf16 %v574_v46, %v566_v45  ;;  %v565_v50 = vld [vmem:[#allocation8 + $0x890] sm:$0xff]  ;;  %v2853_v52 = vpack.c.bf16 %v572_v43, %v564_v42  ;;  %v563_v53 = vld [vmem:[#allocation8 + $0x880] sm:$0xff]  ;;  %v582_v56 = vld [vmem:[#allocation8 + $0x918] sm:$0xff] }
  0x66   :  { %2840 = vmatpush1.bf16.msra.mxu0 %v2839_v30  ;;  %v573_v51 = vld [vmem:[#allocation8 + $0x8d0] sm:$0xff]  ;;  %v571_v54 = vld [vmem:[#allocation8 + $0x8c0] sm:$0xff]  ;;  %v580_v57 = vld [vmem:[#allocation8 + $0x908] sm:$0xff] }
  0x67   :  { %2850 = vmatprep.subr.bf16.mxu0 %v2849_v36  ;;  %2916 = vmatpush1.bf16.msra.mxu1 %v2915_v44  ;;  %v2919_v55 = vpack.c.bf16 %v573_v51, %v565_v50  ;;  %v588_v58 = vld [vmem:[#allocation8 + $0x948] sm:$0xff]  ;;  %v590_v59 = vld [vmem:[#allocation8 + $0x958] sm:$0xff]  ;;  %v581_v61 = vld [vmem:[#allocation8 + $0x910] sm:$0xff]  ;;  %v2855_v63 = vpack.c.bf16 %v571_v54, %v563_v53 }
  0x68   :  { %2918 = vmatprep.subr.bf16.mxu1 %v2917_v49  ;;  %v2921_v60 = vpack.c.bf16 %v590_v59, %v582_v56  ;;  %v589_v62 = vld [vmem:[#allocation8 + $0x950] sm:$0xff]  ;;  %v598_v1 = vld [vmem:[#allocation8 + $0x998] sm:$0xff]  ;;  %v2857_v3 = vpack.c.bf16 %v588_v58, %v580_v57  ;;  %v579_v4 = vld [vmem:[#allocation8 + $0x900] sm:$0xff] }
  0x69   :  { %2829 = vmatmul.mubr.msk.f32.vlgmr.msra.gmra.mrb[0].mxu0 %vm112_vm1, %v111_v47  ;;  %v606_v2 = vld [vmem:[#allocation8 + $0x9d8] sm:$0xff]  ;;  %v587_v5 = vld [vmem:[#allocation8 + $0x940] sm:$0xff]  ;;  %v2923_v6 = vpack.c.bf16 %v589_v62, %v581_v61  ;;  %v596_v7 = vld [vmem:[#allocation8 + $0x988] sm:$0xff] }
  0x6a   :  { %2852 = vmatpush1.bf16.msra.mxu0 %v2851_v48  ;;  %v604_v8 = vld [vmem:[#allocation8 + $0x9c8] sm:$0xff]  ;;  %v2925_v9 = vpack.c.bf16 %v606_v2, %v598_v1  ;;  %v597_v10 = vld [vmem:[#allocation8 + $0x990] sm:$0xff]  ;;  %v614_v12 = vld [vmem:[#allocation8 + $0xa18] sm:$0xff]  ;;  %v2859_v14 = vpack.c.bf16 %v587_v5, %v579_v4 }
  0x6b   :  { %2854 = vmatprep.subr.bf16.mxu0 %v2853_v52  ;;  %2920 = vmatpush1.bf16.msra.mxu1 %v2919_v55  ;;  %v605_v11 = vld [vmem:[#allocation8 + $0x9d0] sm:$0xff]  ;;  %v622_v13 = vld [vmem:[#allocation8 + $0xa58] sm:$0xff]  ;;  %v2861_v15 = vpack.c.bf16 %v604_v8, %v596_v7  ;;  %v595_v16 = vld [vmem:[#allocation8 + $0x980] sm:$0xff] }
  0x6c   :  { %2922 = vmatprep.subr.bf16.mxu1 %v2921_v60  ;;  %v603_v17 = vld [vmem:[#allocation8 + $0x9c0] sm:$0xff]  ;;  %v2927_v18 = vpack.c.bf16 %v605_v11, %v597_v10  ;;  %v612_v19 = vld [vmem:[#allocation8 + $0xa08] sm:$0xff]  ;;  %v2929_v21 = vpack.c.bf16 %v622_v13, %v614_v12  ;;  %v613_v22 = vld [vmem:[#allocation8 + $0xa10] sm:$0xff] }
  0x6d   :  { %v620_v20 = vld [vmem:[#allocation8 + $0xa48] sm:$0xff]  ;;  %v621_v23 = vld [vmem:[#allocation8 + $0xa50] sm:$0xff]  ;;  %v630_v24 = vld [vmem:[#allocation8 + $0xa98] sm:$0xff]  ;;  %v2863_v26 = vpack.c.bf16 %v603_v17, %v595_v16 }
  0x6e   :  { %2856 = vmatpush1.bf16.msra.mxu0 %v2855_v63  ;;  %v638_v25 = vld [vmem:[#allocation8 + $0xad8] sm:$0xff]  ;;  %v2865_v27 = vpack.c.bf16 %v620_v20, %v612_v19  ;;  %v611_v28 = vld [vmem:[#allocation8 + $0xa00] sm:$0xff]  ;;  %v2931_v30 = vpack.c.bf16 %v621_v23, %v613_v22  ;;  %v628_v31 = vld [vmem:[#allocation8 + $0xa88] sm:$0xff] }
  0x6f   :  { %2858 = vmatprep.subr.bf16.mxu0 %v2857_v3  ;;  %2924 = vmatpush1.bf16.msra.mxu1 %v2923_v6  ;;  %v619_v29 = vld [vmem:[#allocation8 + $0xa40] sm:$0xff]  ;;  %v636_v32 = vld [vmem:[#allocation8 + $0xac8] sm:$0xff]  ;;  %v2933_v33 = vpack.c.bf16 %v638_v25, %v630_v24  ;;  %v629_v34 = vld [vmem:[#allocation8 + $0xa90] sm:$0xff] }
  0x70   :  { %2926 = vmatprep.subr.bf16.mxu1 %v2925_v9  ;;  %v637_v35 = vld [vmem:[#allocation8 + $0xad0] sm:$0xff]  ;;  %v646_v36 = vld [vmem:[#allocation8 + $0xb18] sm:$0xff]  ;;  %v2867_v38 = vpack.c.bf16 %v619_v29, %v611_v28  ;;  %v2869_v39 = vpack.c.bf16 %v636_v32, %v628_v31  ;;  %v627_v40 = vld [vmem:[#allocation8 + $0xa80] sm:$0xff] }
  0x71   :  { %v654_v37 = vld [vmem:[#allocation8 + $0xb58] sm:$0xff]  ;;  %v635_v41 = vld [vmem:[#allocation8 + $0xac0] sm:$0xff]  ;;  %v2935_v42 = vpack.c.bf16 %v637_v35, %v629_v34  ;;  %v644_v43 = vld [vmem:[#allocation8 + $0xb08] sm:$0xff] }
  0x72   :  { %2860 = vmatpush1.bf16.msra.mxu0 %v2859_v14  ;;  %v652_v44 = vld [vmem:[#allocation8 + $0xb48] sm:$0xff]  ;;  %v2937_v45 = vpack.c.bf16 %v654_v37, %v646_v36  ;;  %v645_v46 = vld [vmem:[#allocation8 + $0xb10] sm:$0xff]  ;;  %v662_v48 = vld [vmem:[#allocation8 + $0xb98] sm:$0xff]  ;;  %v2871_v50 = vpack.c.bf16 %v635_v41, %v627_v40 }
  0x73   :  { %2862 = vmatprep.subr.bf16.mxu0 %v2861_v15  ;;  %2928 = vmatpush1.bf16.msra.mxu1 %v2927_v18  ;;  %v653_v47 = vld [vmem:[#allocation8 + $0xb50] sm:$0xff]  ;;  %v670_v49 = vld [vmem:[#allocation8 + $0xbd8] sm:$0xff]  ;;  %v2873_v51 = vpack.c.bf16 %v652_v44, %v644_v43  ;;  %v643_v52 = vld [vmem:[#allocation8 + $0xb00] sm:$0xff] }
  0x74   :  { %2930 = vmatprep.subr.bf16.mxu1 %v2929_v21  ;;  %v651_v53 = vld [vmem:[#allocation8 + $0xb40] sm:$0xff]  ;;  %v2939_v54 = vpack.c.bf16 %v653_v47, %v645_v46  ;;  %v660_v55 = vld [vmem:[#allocation8 + $0xb88] sm:$0xff]  ;;  %v2941_v57 = vpack.c.bf16 %v670_v49, %v662_v48  ;;  %v661_v58 = vld [vmem:[#allocation8 + $0xb90] sm:$0xff] }
  0x75   :  { %v668_v56 = vld [vmem:[#allocation8 + $0xbc8] sm:$0xff]  ;;  %v669_v59 = vld [vmem:[#allocation8 + $0xbd0] sm:$0xff]  ;;  %v678_v60 = vld [vmem:[#allocation8 + $0xc18] sm:$0xff]  ;;  %v2875_v62 = vpack.c.bf16 %v651_v53, %v643_v52 }
  0x76   :  { %2864 = vmatpush1.bf16.msra.mxu0 %v2863_v26  ;;  %v686_v61 = vld [vmem:[#allocation8 + $0xc58] sm:$0xff]  ;;  %v2877_v63 = vpack.c.bf16 %v668_v56, %v660_v55  ;;  %v659_v1 = vld [vmem:[#allocation8 + $0xb80] sm:$0xff]  ;;  %v2943_v3 = vpack.c.bf16 %v669_v59, %v661_v58  ;;  %v676_v4 = vld [vmem:[#allocation8 + $0xc08] sm:$0xff] }
  0x77   :  { %2866 = vmatprep.subr.bf16.mxu0 %v2865_v27  ;;  %2932 = vmatpush1.bf16.msra.mxu1 %v2931_v30  ;;  %v667_v2 = vld [vmem:[#allocation8 + $0xbc0] sm:$0xff]  ;;  %v684_v5 = vld [vmem:[#allocation8 + $0xc48] sm:$0xff]  ;;  %v2945_v6 = vpack.c.bf16 %v686_v61, %v678_v60  ;;  %v677_v7 = vld [vmem:[#allocation8 + $0xc10] sm:$0xff] }
  0x78   :  { %2934 = vmatprep.subr.bf16.mxu1 %v2933_v33  ;;  %v685_v8 = vld [vmem:[#allocation8 + $0xc50] sm:$0xff]  ;;  %v694_v9 = vld [vmem:[#allocation8 + $0xc98] sm:$0xff]  ;;  %v2879_v11 = vpack.c.bf16 %v667_v2, %v659_v1  ;;  %v2881_v12 = vpack.c.bf16 %v684_v5, %v676_v4  ;;  %v675_v13 = vld [vmem:[#allocation8 + $0xc00] sm:$0xff] }
  0x79   :  { %v702_v10 = vld [vmem:[#allocation8 + $0xcd8] sm:$0xff]  ;;  %v683_v14 = vld [vmem:[#allocation8 + $0xc40] sm:$0xff]  ;;  %v2947_v15 = vpack.c.bf16 %v685_v8, %v677_v7  ;;  %v692_v16 = vld [vmem:[#allocation8 + $0xc88] sm:$0xff] }
  0x7a   :  { %2868 = vmatpush1.bf16.msra.mxu0 %v2867_v38  ;;  %v700_v17 = vld [vmem:[#allocation8 + $0xcc8] sm:$0xff]  ;;  %v2949_v18 = vpack.c.bf16 %v702_v10, %v694_v9  ;;  %v693_v19 = vld [vmem:[#allocation8 + $0xc90] sm:$0xff]  ;;  %v710_v21 = vld [vmem:[#allocation8 + $0xd18] sm:$0xff]  ;;  %v2883_v23 = vpack.c.bf16 %v683_v14, %v675_v13 }
  0x7b   :  { %2870 = vmatprep.subr.bf16.mxu0 %v2869_v39  ;;  %2936 = vmatpush1.bf16.msra.mxu1 %v2935_v42  ;;  %v701_v20 = vld [vmem:[#allocation8 + $0xcd0] sm:$0xff]  ;;  %v718_v22 = vld [vmem:[#allocation8 + $0xd58] sm:$0xff]  ;;  %v2885_v24 = vpack.c.bf16 %v700_v17, %v692_v16  ;;  %v691_v25 = vld [vmem:[#allocation8 + $0xc80] sm:$0xff] }
  0x7c   :  { %2938 = vmatprep.subr.bf16.mxu1 %v2937_v45  ;;  %v699_v26 = vld [vmem:[#allocation8 + $0xcc0] sm:$0xff]  ;;  %v2951_v27 = vpack.c.bf16 %v701_v20, %v693_v19  ;;  %v708_v28 = vld [vmem:[#allocation8 + $0xd08] sm:$0xff]  ;;  %v2953_v30 = vpack.c.bf16 %v718_v22, %v710_v21  ;;  %v709_v31 = vld [vmem:[#allocation8 + $0xd10] sm:$0xff] }
  0x7d   :  { %v716_v29 = vld [vmem:[#allocation8 + $0xd48] sm:$0xff]  ;;  %v717_v32 = vld [vmem:[#allocation8 + $0xd50] sm:$0xff]  ;;  %v726_v33 = vld [vmem:[#allocation8 + $0xd98] sm:$0xff]  ;;  %v2887_v35 = vpack.c.bf16 %v699_v26, %v691_v25 }
  0x7e   :  { %2872 = vmatpush1.bf16.msra.mxu0 %v2871_v50  ;;  %v734_v34 = vld [vmem:[#allocation8 + $0xdd8] sm:$0xff]  ;;  %v2889_v36 = vpack.c.bf16 %v716_v29, %v708_v28  ;;  %v707_v37 = vld [vmem:[#allocation8 + $0xd00] sm:$0xff]  ;;  %v2955_v39 = vpack.c.bf16 %v717_v32, %v709_v31  ;;  %v724_v40 = vld [vmem:[#allocation8 + $0xd88] sm:$0xff] }
  0x7f   :  { %2874 = vmatprep.subr.bf16.mxu0 %v2873_v51  ;;  %2940 = vmatpush1.bf16.msra.mxu1 %v2939_v54  ;;  %v715_v38 = vld [vmem:[#allocation8 + $0xd40] sm:$0xff]  ;;  %v732_v41 = vld [vmem:[#allocation8 + $0xdc8] sm:$0xff]  ;;  %v2957_v42 = vpack.c.bf16 %v734_v34, %v726_v33  ;;  %v725_v43 = vld [vmem:[#allocation8 + $0xd90] sm:$0xff] }
  0x80   :  { %2942 = vmatprep.subr.bf16.mxu1 %v2941_v57  ;;  %v733_v44 = vld [vmem:[#allocation8 + $0xdd0] sm:$0xff]  ;;  %v742_v45 = vld [vmem:[#allocation8 + $0xe18] sm:$0xff]  ;;  %v2891_v47 = vpack.c.bf16 %v715_v38, %v707_v37  ;;  %v2893_v48 = vpack.c.bf16 %v732_v41, %v724_v40  ;;  %v723_v49 = vld [vmem:[#allocation8 + $0xd80] sm:$0xff] }
  0x81   :  { %v750_v46 = vld [vmem:[#allocation8 + $0xe58] sm:$0xff]  ;;  %v731_v50 = vld [vmem:[#allocation8 + $0xdc0] sm:$0xff]  ;;  %v2959_v51 = vpack.c.bf16 %v733_v44, %v725_v43  ;;  %v740_v52 = vld [vmem:[#allocation8 + $0xe08] sm:$0xff] }
  0x82   :  { %2876 = vmatpush1.bf16.msra.mxu0 %v2875_v62  ;;  %v748_v53 = vld [vmem:[#allocation8 + $0xe48] sm:$0xff]  ;;  %v2961_v54 = vpack.c.bf16 %v750_v46, %v742_v45  ;;  %v741_v55 = vld [vmem:[#allocation8 + $0xe10] sm:$0xff]  ;;  %v758_v57 = vld [vmem:[#allocation8 + $0xe98] sm:$0xff]  ;;  %v2895_v59 = vpack.c.bf16 %v731_v50, %v723_v49 }
  0x83   :  { %2878 = vmatprep.subr.bf16.mxu0 %v2877_v63  ;;  %2944 = vmatpush1.bf16.msra.mxu1 %v2943_v3  ;;  %v749_v56 = vld [vmem:[#allocation8 + $0xe50] sm:$0xff]  ;;  %v766_v58 = vld [vmem:[#allocation8 + $0xed8] sm:$0xff]  ;;  %v2897_v60 = vpack.c.bf16 %v748_v53, %v740_v52  ;;  %v739_v61 = vld [vmem:[#allocation8 + $0xe00] sm:$0xff] }
  0x84   :  { %2946 = vmatprep.subr.bf16.mxu1 %v2945_v6  ;;  %v747_v62 = vld [vmem:[#allocation8 + $0xe40] sm:$0xff]  ;;  %v2963_v63 = vpack.c.bf16 %v749_v56, %v741_v55  ;;  %v756_v1 = vld [vmem:[#allocation8 + $0xe88] sm:$0xff]  ;;  %v2965_v3 = vpack.c.bf16 %v766_v58, %v758_v57  ;;  %v757_v4 = vld [vmem:[#allocation8 + $0xe90] sm:$0xff] }
  0x85   :  { %v764_v2 = vld [vmem:[#allocation8 + $0xec8] sm:$0xff]  ;;  %v765_v5 = vld [vmem:[#allocation8 + $0xed0] sm:$0xff]  ;;  %v774_v6 = vld [vmem:[#allocation8 + $0xf18] sm:$0xff]  ;;  %v2899_v8 = vpack.c.bf16 %v747_v62, %v739_v61 }
  0x86   :  { %2880 = vmatpush1.bf16.msra.mxu0 %v2879_v11  ;;  %v782_v7 = vld [vmem:[#allocation8 + $0xf58] sm:$0xff]  ;;  %v2901_v9 = vpack.c.bf16 %v764_v2, %v756_v1  ;;  %v755_v10 = vld [vmem:[#allocation8 + $0xe80] sm:$0xff]  ;;  %v772_v13 = vld [vmem:[#allocation8 + $0xf08] sm:$0xff] }
  0x87   :  { %2882 = vmatprep.subr.bf16.mxu0 %v2881_v12  ;;  %2948 = vmatpush1.bf16.msra.mxu1 %v2947_v15  ;;  %v763_v11 = vld [vmem:[#allocation8 + $0xec0] sm:$0xff]  ;;  %v2967_v12 = vpack.c.bf16 %v765_v5, %v757_v4  ;;  %v780_v14 = vld [vmem:[#allocation8 + $0xf48] sm:$0xff]  ;;  %v2969_v15 = vpack.c.bf16 %v782_v7, %v774_v6  ;;  %v773_v16 = vld [vmem:[#allocation8 + $0xf10] sm:$0xff] }
  0x88   :  { %2950 = vmatprep.subr.bf16.mxu1 %v2949_v18  ;;  %v781_v17 = vld [vmem:[#allocation8 + $0xf50] sm:$0xff]  ;;  %v2903_v18 = vpack.c.bf16 %v763_v11, %v755_v10  ;;  %v2905_v19 = vpack.c.bf16 %v780_v14, %v772_v13  ;;  %v771_v20 = vld [vmem:[#allocation8 + $0xf00] sm:$0xff]  ;;  %v796_v25 = vld [vmem:[#allocation8 + $0xfc8] sm:$0xff] }
  0x89   :  { %v779_v21 = vld [vmem:[#allocation8 + $0xf40] sm:$0xff]  ;;  %v2971_v22 = vpack.c.bf16 %v781_v17, %v773_v16  ;;  %v790_v26 = vld [vmem:[#allocation8 + $0xf98] sm:$0xff]  ;;  %v789_v33 = vld [vmem:[#allocation8 + $0xf90] sm:$0xff] }
  0x8a   :  { %2884 = vmatpush1.bf16.msra.mxu0 %v2883_v23  ;;  %v2907_v23 = vpack.c.bf16 %v779_v21, %v771_v20  ;;  %v798_v28 = vld [vmem:[#allocation8 + $0xfd8] sm:$0xff]  ;;  %v787_v29 = vld [vmem:[#allocation8 + $0xf80] sm:$0xff]  ;;  %v797_v34 = vld [vmem:[#allocation8 + $0xfd0] sm:$0xff] }
  0x8b   :  { %2886 = vmatprep.subr.bf16.mxu0 %v2885_v24  ;;  %2952 = vmatpush1.bf16.msra.mxu1 %v2951_v27  ;;  %v788_v24 = vld [vmem:[#allocation8 + $0xf88] sm:$0xff]  ;;  %v2973_v31 = vpack.c.bf16 %v798_v28, %v790_v26  ;;  %v554_v38 = vld [vmem:[#allocation8 + $0x838] sm:$0xff]  ;;  %v551_v50 = vld [vmem:[#allocation8 + $0x820] sm:$0xff] }
  0x8c   :  { %2954 = vmatprep.subr.bf16.mxu1 %v2953_v30  ;;  %v2909_v27 = vpack.c.bf16 %v796_v25, %v788_v24  ;;  %v795_v30 = vld [vmem:[#allocation8 + $0xfc0] sm:$0xff]  ;;  %v560_v37 = vld [vmem:[#allocation8 + $0x868] sm:$0xff]  ;;  %v562_v40 = vld [vmem:[#allocation8 + $0x878] sm:$0xff] }
  0x8d   :  { %v2911_v32 = vpack.c.bf16 %v795_v30, %v787_v29  ;;  %v3041_v41 = vpack.c.bf16 %v562_v40, %v554_v38  ;;  %v456_v45 = vld [vmem:[#allocation7 + $0x1] ss:$4 sm:$0x3]  ;;  %v559_v53 = vld [vmem:[#allocation8 + $0x860] sm:$0xff]  ;;  %v561_v55 = vld [vmem:[#allocation8 + $0x870] sm:$0xff] }
  0x8e   :  { %2888 = vmatpush1.bf16.msra.mxu0 %v2887_v35  ;;  %v2975_v35 = vpack.c.bf16 %v797_v34, %v789_v33  ;;  %v568_v57 = vld [vmem:[#allocation8 + $0x8a8] sm:$0xff]  ;;  %v567_v2 = vld [vmem:[#allocation8 + $0x8a0] sm:$0xff]  ;;  %v569_v6 = vld [vmem:[#allocation8 + $0x8b0] sm:$0xff] }
  0x8f   :  { %2890 = vmatprep.subr.bf16.mxu0 %v2889_v36  ;;  %2956 = vmatpush1.bf16.msra.mxu1 %v2955_v39  ;;  %v552_v36 = vld [vmem:[#allocation8 + $0x828] sm:$0xff]  ;;  %v577_v7 = vld [vmem:[#allocation8 + $0x8f0] sm:$0xff]  ;;  %v594_v13 = vld [vmem:[#allocation8 + $0x978] sm:$0xff] }
  0x90   :  { %2958 = vmatprep.subr.bf16.mxu1 %v2957_v42  ;;  %v2977_v39 = vpack.c.bf16 %v560_v37, %v552_v36  ;;  %v97_v42 = vlaneseq  ;;  %v576_v58 = vld [vmem:[#allocation8 + $0x8e8] sm:$0xff]  ;;  %v583_v16 = vld [vmem:[#allocation8 + $0x920] sm:$0xff]  ;;  %v585_v20 = vld [vmem:[#allocation8 + $0x930] sm:$0xff] }
  0x91   :  { %v592_v11 = vld [vmem:[#allocation8 + $0x968] sm:$0xff]  ;;  %v591_v17 = vld [vmem:[#allocation8 + $0x960] sm:$0xff]  ;;  %v593_v21 = vld [vmem:[#allocation8 + $0x970] sm:$0xff] }
  0x92   :  { %2892 = vmatpush1.bf16.msra.mxu0 %v2891_v47  ;;  %v4179_v43 = vshrl.u32 %v97_v42, 7  ;;  %v602_v24 = vld [vmem:[#allocation8 + $0x9b8] sm:$0xff]  ;;  %v2987_v26 = vpack.c.bf16 %v591_v17, %v583_v16  ;;  %v599_v28 = vld [vmem:[#allocation8 + $0x9a0] sm:$0xff]  ;;  %v609_v33 = vld [vmem:[#allocation8 + $0x9f0] sm:$0xff] }
  0x93   :  { %2894 = vmatprep.subr.bf16.mxu0 %v2893_v48  ;;  %2960 = vmatpush1.bf16.msra.mxu1 %v2959_v51  ;;  %v610_v25 = vld [vmem:[#allocation8 + $0x9f8] sm:$0xff]  ;;  %v607_v29 = vld [vmem:[#allocation8 + $0x9e0] sm:$0xff]  ;;  %v616_v34 = vld [vmem:[#allocation8 + $0xa28] sm:$0xff] }
  0x94   :  { %2962 = vmatprep.subr.bf16.mxu1 %v2961_v54  ;;  %v4182_v44 = vsub.s32 0, %v4179_v43  ;;  %v4185_v46 = vsub.s32 1, %v4179_v43  ;;  %v553_v54 = vld [vmem:[#allocation8 + $0x830] sm:$0xff]  ;;  %v618_v36 = vld [vmem:[#allocation8 + $0xa38] sm:$0xff]  ;;  %v2991_v38 = vpack.c.bf16 %v607_v29, %v599_v28  ;;  %v615_v40 = vld [vmem:[#allocation8 + $0xa20] sm:$0xff] }
  0x95   :  { %v3043_v1 = vpack.c.bf16 %v561_v55, %v553_v54  ;;  %v626_v37 = vld [vmem:[#allocation8 + $0xa78] sm:$0xff]  ;;  %v631_v55 = vld [vmem:[#allocation8 + $0xaa0] sm:$0xff] }
  0x96   :  { %2896 = vmatpush1.bf16.msra.mxu0 %v2895_v59  ;;  %v461_v47 = vrot.slane %v456_v45, %v4182_v44  ;;  %v465_v48 = vrot.slane %v456_v45, %v4185_v46  ;;  %v570_v59 = vld [vmem:[#allocation8 + $0x8b8] sm:$0xff]  ;;  %v3057_v45 = vpack.c.bf16 %v626_v37, %v618_v36  ;;  %v689_v36 = vld [vmem:[#allocation8 + $0xc70] sm:$0xff]  ;;  %v696_v37 = vld [vmem:[#allocation8 + $0xca8] sm:$0xff] }
  0x97   :  { %2898 = vmatprep.subr.bf16.mxu0 %v2897_v60  ;;  %2964 = vmatpush1.bf16.msra.mxu1 %v2963_v63  ;;  %v578_v60 = vld [vmem:[#allocation8 + $0x8f8] sm:$0xff]  ;;  %v2979_v63 = vpack.c.bf16 %v559_v53, %v551_v50  ;;  %v640_v50 = vld [vmem:[#allocation8 + $0xae8] sm:$0xff] }
  0x98   :  { %2966 = vmatprep.subr.bf16.mxu1 %v2965_v3  ;;  %v575_v3 = vld [vmem:[#allocation8 + $0x8e0] sm:$0xff]  ;;  %v3045_v10 = vpack.c.bf16 %v578_v60, %v570_v59  ;;  %v633_v59 = vld [vmem:[#allocation8 + $0xab0] sm:$0xff]  ;;  %v674_v16 = vld [vmem:[#allocation8 + $0xbf8] sm:$0xff] }
  0x99   :  { %v2983_v14 = vpack.c.bf16 %v575_v3, %v567_v2  ;;  %v641_v60 = vld [vmem:[#allocation8 + $0xaf0] sm:$0xff]  ;;  %v658_v2 = vld [vmem:[#allocation8 + $0xb78] sm:$0xff] }
  0x9a   :  { %2900 = vmatpush1.bf16.msra.mxu0 %v2899_v8  ;;  %v584_v8 = vld [vmem:[#allocation8 + $0x928] sm:$0xff]  ;;  %v690_v28 = vld [vmem:[#allocation8 + $0xc78] sm:$0xff] }
  0x9b   :  { %2902 = vmatprep.subr.bf16.mxu0 %v2901_v9  ;;  %2968 = vmatpush1.bf16.msra.mxu1 %v2967_v12  ;;  %v2981_v9 = vpack.c.bf16 %v576_v58, %v568_v57  ;;  %v586_v12 = vld [vmem:[#allocation8 + $0x938] sm:$0xff] }
  0x9c   :  { %2970 = vmatprep.subr.bf16.mxu1 %v2969_v15  ;;  %v3047_v15 = vpack.c.bf16 %v577_v7, %v569_v6  ;;  %v3063_v6 = vpack.c.bf16 %v641_v60, %v633_v59  ;;  %v647_v7 = vld [vmem:[#allocation8 + $0xb20] sm:$0xff] }
  0x9d   :  { %v719_v59 = vld [vmem:[#allocation8 + $0xd60] sm:$0xff] }
  0x9e   :  { %2904 = vmatpush1.bf16.msra.mxu0 %v2903_v18  ;;  %v2985_v18 = vpack.c.bf16 %v592_v11, %v584_v8  ;;  %v655_v8 = vld [vmem:[#allocation8 + $0xb60] sm:$0xff]  ;;  %v649_v11 = vld [vmem:[#allocation8 + $0xb30] sm:$0xff] }
  0x9f   :  { %2906 = vmatprep.subr.bf16.mxu0 %v2905_v19  ;;  %2972 = vmatpush1.bf16.msra.mxu1 %v2971_v22  ;;  %v3049_v19 = vpack.c.bf16 %v594_v13, %v586_v12  ;;  %v600_v22 = vld [vmem:[#allocation8 + $0x9a8] sm:$0xff]  ;;  %v657_v12 = vld [vmem:[#allocation8 + $0xb70] sm:$0xff]  ;;  %v3003_v17 = vpack.c.bf16 %v655_v8, %v647_v7  ;;  %v738_v7 = vld [vmem:[#allocation8 + $0xdf8] sm:$0xff] }
  0xa0   :  { %2974 = vmatprep.subr.bf16.mxu1 %v2973_v31  ;;  %v3053_v31 = vpack.c.bf16 %v610_v25, %v602_v24  ;;  %v664_v13 = vld [vmem:[#allocation8 + $0xba8] sm:$0xff]  ;;  %v673_v24 = vld [vmem:[#allocation8 + $0xbf0] sm:$0xff] }
  0xa1   :  { %v680_v25 = vld [vmem:[#allocation8 + $0xc28] sm:$0xff] }
  0xa2   :  { %2908 = vmatpush1.bf16.msra.mxu0 %v2907_v23  ;;  %v608_v23 = vld [vmem:[#allocation8 + $0x9e8] sm:$0xff] }
  0xa3   :  { %2910 = vmatprep.subr.bf16.mxu0 %v2909_v27  ;;  %2976 = vmatpush1.bf16.msra.mxu1 %v2975_v35  ;;  %v3051_v27 = vpack.c.bf16 %v593_v21, %v585_v20  ;;  %v2989_v30 = vpack.c.bf16 %v608_v23, %v600_v22  ;;  %v624_v35 = vld [vmem:[#allocation8 + $0xa68] sm:$0xff]  ;;  %v671_v20 = vld [vmem:[#allocation8 + $0xbe0] sm:$0xff]  ;;  %v665_v23 = vld [vmem:[#allocation8 + $0xbb0] sm:$0xff] }
  0xa4   :  { %3042 = vmatprep.subr.bf16.mxu1 %v3041_v41  ;;  %v623_v41 = vld [vmem:[#allocation8 + $0xa60] sm:$0xff]  ;;  %v2993_v42 = vpack.c.bf16 %v624_v35, %v616_v34  ;;  %v681_v35 = vld [vmem:[#allocation8 + $0xc30] sm:$0xff] }
  0xa5   :  { %v2995_v53 = vpack.c.bf16 %v623_v41, %v615_v40  ;;  %v706_v40 = vld [vmem:[#allocation8 + $0xcf8] sm:$0xff] }
  0xa6   :  { %2912 = vmatpush1.bf16.msra.mxu0 %v2911_v32  ;;  %v601_v32 = vld [vmem:[#allocation8 + $0x9b0] sm:$0xff] }
  0xa7   :  { %2978 = vmatprep.subr.bf16.mxu0 %v2977_v39  ;;  %v3055_v39 = vpack.c.bf16 %v609_v33, %v601_v32  ;;  %v687_v32 = vld [vmem:[#allocation8 + $0xc60] sm:$0xff] }
 0x138   :  { %v540_v49 = vpop.f32.mrb[0].mxu1 }
 0x139   :  { %v541_v51 = vadd.f32 %v540_v49, %v461_v47  ;;  %v542_v52 = vpop.f32.mrb[1].mxu1  ;;  %v617_v47 = vld [vmem:[#allocation8 + $0xa30] sm:$0xff]  ;;  %v632_v49 = vld [vmem:[#allocation8 + $0xaa8] sm:$0xff] }
 0x13a   :  { %v543_v56 = vadd.f32 %v542_v52, %v465_v48  ;;  %v625_v48 = vld [vmem:[#allocation8 + $0xa70] sm:$0xff]  ;;  %v642_v52 = vld [vmem:[#allocation8 + $0xaf8] sm:$0xff]  ;;  %v2997_v57 = vpack.c.bf16 %v640_v50, %v632_v49 }
 0x13b   :  { %v4193_v5 = vmax.f32 %v541_v51, 0.0  ;;  %v634_v51 = vld [vmem:[#allocation8 + $0xab8] sm:$0xff]  ;;  %v3059_v54 = vpack.c.bf16 %v625_v48, %v617_v47  ;;  %v703_v47 = vld [vmem:[#allocation8 + $0xce0] sm:$0xff]  ;;  %v697_v50 = vld [vmem:[#allocation8 + $0xcb0] sm:$0xff] }
 0x13c   :  { %v4189_v61 = vpop.f32.mrb[0].mxu0  ;;  %v546_v62 = vmax.f32 %v543_v56, 0.0  ;;  %v639_v56 = vld [vmem:[#allocation8 + $0xae0] sm:$0xff]  ;;  %v3061_v58 = vpack.c.bf16 %v642_v52, %v634_v51  ;;  %v705_v51 = vld [vmem:[#allocation8 + $0xcf0] sm:$0xff]  ;;  %v712_v52 = vld [vmem:[#allocation8 + $0xd28] sm:$0xff] }
 0x13d   :  { %v4191_v4 = vpop.f32.mrb[1].mxu0  ;;  %v2999_v3 = vpack.c.bf16 %v639_v56, %v631_v55  ;;  %v722_v55 = vld [vmem:[#allocation8 + $0xd78] sm:$0xff] }
 0x13e   :  { %867 = vmatprep.mubr.f32.mxu0 %v546_v62  ;;  %938 = vmatprep.mubr.f32.mxu1 %v546_v62 }
 0x13f   :  { %868 = vmatmul.mubr.f32.vlgmr.msra.gmra.mrb[2].mxu0 %v4193_v5  ;;  %939 = vmatmul.mubr.f32.vlgmr.msra.gmra.mrb[2].mxu1 %v4193_v5 }
 0x140   :  { %2980 = vmatpush1.bf16.msra.mxu0 %v2979_v63  ;;  %3044 = vmatpush1.bf16.msra.mxu1 %v3043_v1  ;;  %v656_v63 = vld [vmem:[#allocation8 + $0xb68] sm:$0xff]  ;;  %v650_v1 = vld [vmem:[#allocation8 + $0xb38] sm:$0xff] }
 0x141   :  { %1009 = vmatprep.mubr.f32.mxu0 %v546_v62  ;;  %1080 = vmatprep.mubr.f32.mxu1 %v546_v62  ;;  %v648_v62 = vld [vmem:[#allocation8 + $0xb28] sm:$0xff] }
 0x142   :  { %2982 = vmatprep.subr.bf16.mxu0 %v2981_v9  ;;  %3046 = vmatprep.subr.bf16.mxu1 %v3045_v10  ;;  %v3001_v9 = vpack.c.bf16 %v656_v63, %v648_v62  ;;  %v3065_v10 = vpack.c.bf16 %v658_v2, %v650_v1  ;;  %v713_v63 = vld [vmem:[#allocation8 + $0xd30] sm:$0xff]  ;;  %v728_v2 = vld [vmem:[#allocation8 + $0xda8] sm:$0xff] }
 0x143   :  { %v721_v1 = vld [vmem:[#allocation8 + $0xd70] sm:$0xff] }
 0x144   :  { %2984 = vmatpush1.bf16.msra.mxu0 %v2983_v14  ;;  %3048 = vmatpush1.bf16.msra.mxu1 %v3047_v15  ;;  %v672_v14 = vld [vmem:[#allocation8 + $0xbe8] sm:$0xff]  ;;  %v666_v15 = vld [vmem:[#allocation8 + $0xbb8] sm:$0xff] }
 0x145   :  { %2986 = vmatprep.subr.bf16.mxu0 %v2985_v18  ;;  %3050 = vmatprep.subr.bf16.mxu1 %v3049_v19  ;;  %v3067_v18 = vpack.c.bf16 %v657_v12, %v649_v11  ;;  %v663_v19 = vld [vmem:[#allocation8 + $0xba0] sm:$0xff]  ;;  %v3005_v21 = vpack.c.bf16 %v672_v14, %v664_v13  ;;  %v3069_v22 = vpack.c.bf16 %v674_v16, %v666_v15  ;;  %v729_v14 = vld [vmem:[#allocation8 + $0xdb0] sm:$0xff]  ;;  %v744_v16 = vld [vmem:[#allocation8 + $0xe28] sm:$0xff] }
 0x146   :  { %v3007_v29 = vpack.c.bf16 %v671_v20, %v663_v19  ;;  %v735_v11 = vld [vmem:[#allocation8 + $0xde0] sm:$0xff]  ;;  %v737_v15 = vld [vmem:[#allocation8 + $0xdf0] sm:$0xff]  ;;  %v754_v19 = vld [vmem:[#allocation8 + $0xe78] sm:$0xff] }
 0x148   :  { %2988 = vmatpush1.bf16.msra.mxu0 %v2987_v26  ;;  %3052 = vmatpush1.bf16.msra.mxu1 %v3051_v27  ;;  %v688_v26 = vld [vmem:[#allocation8 + $0xc68] sm:$0xff]  ;;  %v682_v27 = vld [vmem:[#allocation8 + $0xc38] sm:$0xff] }
 0x149   :  { %2990 = vmatprep.subr.bf16.mxu0 %v2989_v30  ;;  %3054 = vmatprep.subr.bf16.mxu1 %v3053_v31  ;;  %v3071_v30 = vpack.c.bf16 %v673_v24, %v665_v23  ;;  %v679_v31 = vld [vmem:[#allocation8 + $0xc20] sm:$0xff]  ;;  %v3009_v33 = vpack.c.bf16 %v688_v26, %v680_v25  ;;  %v3073_v34 = vpack.c.bf16 %v690_v28, %v682_v27  ;;  %v745_v26 = vld [vmem:[#allocation8 + $0xe30] sm:$0xff]  ;;  %v760_v28 = vld [vmem:[#allocation8 + $0xea8] sm:$0xff] }
 0x14a   :  { %v3011_v41 = vpack.c.bf16 %v687_v32, %v679_v31  ;;  %v751_v23 = vld [vmem:[#allocation8 + $0xe60] sm:$0xff]  ;;  %v753_v27 = vld [vmem:[#allocation8 + $0xe70] sm:$0xff]  ;;  %v770_v31 = vld [vmem:[#allocation8 + $0xef8] sm:$0xff] }
 0x14c   :  { %2992 = vmatpush1.bf16.msra.mxu0 %v2991_v38  ;;  %3056 = vmatpush1.bf16.msra.mxu1 %v3055_v39  ;;  %v704_v38 = vld [vmem:[#allocation8 + $0xce8] sm:$0xff]  ;;  %v698_v39 = vld [vmem:[#allocation8 + $0xcb8] sm:$0xff] }
 0x14d   :  { %2994 = vmatprep.subr.bf16.mxu0 %v2993_v42  ;;  %3058 = vmatprep.subr.bf16.mxu1 %v3057_v45  ;;  %v3075_v42 = vpack.c.bf16 %v689_v36, %v681_v35  ;;  %v695_v45 = vld [vmem:[#allocation8 + $0xca0] sm:$0xff]  ;;  %v3013_v48 = vpack.c.bf16 %v704_v38, %v696_v37  ;;  %v3077_v49 = vpack.c.bf16 %v706_v40, %v698_v39  ;;  %v761_v38 = vld [vmem:[#allocation8 + $0xeb0] sm:$0xff]  ;;  %v776_v40 = vld [vmem:[#allocation8 + $0xf28] sm:$0xff] }
 0x14e   :  { %v3015_v56 = vpack.c.bf16 %v703_v47, %v695_v45  ;;  %v767_v35 = vld [vmem:[#allocation8 + $0xee0] sm:$0xff]  ;;  %v769_v39 = vld [vmem:[#allocation8 + $0xef0] sm:$0xff]  ;;  %v786_v45 = vld [vmem:[#allocation8 + $0xf78] sm:$0xff] }
 0x150   :  { %2996 = vmatpush1.bf16.msra.mxu0 %v2995_v53  ;;  %3060 = vmatpush1.bf16.msra.mxu1 %v3059_v54  ;;  %v720_v53 = vld [vmem:[#allocation8 + $0xd68] sm:$0xff]  ;;  %v714_v54 = vld [vmem:[#allocation8 + $0xd38] sm:$0xff] }
 0x151   :  { %2998 = vmatprep.subr.bf16.mxu0 %v2997_v57  ;;  %3062 = vmatprep.subr.bf16.mxu1 %v3061_v58  ;;  %v3079_v57 = vpack.c.bf16 %v705_v51, %v697_v50  ;;  %v711_v58 = vld [vmem:[#allocation8 + $0xd20] sm:$0xff]  ;;  %v3017_v60 = vpack.c.bf16 %v720_v53, %v712_v52  ;;  %v3081_v62 = vpack.c.bf16 %v722_v55, %v714_v54  ;;  %v777_v53 = vld [vmem:[#allocation8 + $0xf30] sm:$0xff]  ;;  %v792_v55 = vld [vmem:[#allocation8 + $0xfa8] sm:$0xff] }
 0x152   :  { %v3019_v8 = vpack.c.bf16 %v719_v59, %v711_v58  ;;  %v783_v50 = vld [vmem:[#allocation8 + $0xf60] sm:$0xff]  ;;  %v785_v54 = vld [vmem:[#allocation8 + $0xf70] sm:$0xff]  ;;  %v802_v58 = vld [vmem:[#allocation8 + $0xff8] sm:$0xff] }
 0x153   :  { %v4197_v59 = vld [vmem:[#allocation7] ss:$4 sm:$0x3] }
 0x154   :  { %3000 = vmatpush1.bf16.msra.mxu0 %v2999_v3  ;;  %3064 = vmatpush1.bf16.msra.mxu1 %v3063_v6  ;;  %v736_v3 = vld [vmem:[#allocation8 + $0xde8] sm:$0xff]  ;;  %v730_v6 = vld [vmem:[#allocation8 + $0xdb8] sm:$0xff] }
 0x155   :  { %3002 = vmatprep.subr.bf16.mxu0 %v3001_v9  ;;  %3066 = vmatprep.subr.bf16.mxu1 %v3065_v10  ;;  %v3083_v9 = vpack.c.bf16 %v721_v1, %v713_v63  ;;  %v727_v10 = vld [vmem:[#allocation8 + $0xda0] sm:$0xff]  ;;  %v3021_v12 = vpack.c.bf16 %v736_v3, %v728_v2  ;;  %v3085_v13 = vpack.c.bf16 %v738_v7, %v730_v6  ;;  %v793_v6 = vld [vmem:[#allocation8 + $0xfb0] sm:$0xff] }
 0x156   :  { %v3023_v20 = vpack.c.bf16 %v735_v11, %v727_v10  ;;  %v791_v63 = vld [vmem:[#allocation8 + $0xfa0] sm:$0xff]  ;;  %v801_v7 = vld [vmem:[#allocation8 + $0xff0] sm:$0xff]  ;;  %v191_v10 = vld [vmem:[#allocation8 + $0x18] sm:$0xff] }
 0x157   :  { %v799_v1 = vld [vmem:[#allocation8 + $0xfe0] sm:$0xff]  ;;  %v199_v11 = vld [vmem:[#allocation8 + $0x58] sm:$0xff] }
 0x158   :  { %3004 = vmatpush1.bf16.msra.mxu0 %v3003_v17  ;;  %3068 = vmatpush1.bf16.msra.mxu1 %v3067_v18  ;;  %v752_v17 = vld [vmem:[#allocation8 + $0xe68] sm:$0xff]  ;;  %v746_v18 = vld [vmem:[#allocation8 + $0xe38] sm:$0xff] }
 0x159   :  { %3006 = vmatprep.subr.bf16.mxu0 %v3005_v21  ;;  %3070 = vmatprep.subr.bf16.mxu1 %v3069_v22  ;;  %v3087_v21 = vpack.c.bf16 %v737_v15, %v729_v14  ;;  %v743_v22 = vld [vmem:[#allocation8 + $0xe20] sm:$0xff]  ;;  %v3025_v24 = vpack.c.bf16 %v752_v17, %v744_v16  ;;  %v3089_v25 = vpack.c.bf16 %v754_v19, %v746_v18  ;;  %v190_v19 = vld [vmem:[#allocation8 + $0x10] sm:$0xff] }
 0x15a   :  { %v3027_v32 = vpack.c.bf16 %v751_v23, %v743_v22  ;;  %v3103_v14 = vpack.c.bf16 %v801_v7, %v793_v6  ;;  %v188_v15 = vld [vmem:[#allocation8] sm:$0xff]  ;;  %v3169_v18 = vpack.c.bf16 %v199_v11, %v191_v10  ;;  %v213_v22 = vld [vmem:[#allocation8 + $0xc8] sm:$0xff]  ;;  %v207_v23 = vld [vmem:[#allocation8 + $0x98] sm:$0xff] }
 0x15b   :  { %v196_v16 = vld [vmem:[#allocation8 + $0x40] sm:$0xff]  ;;  %v254_v11 = vld [vmem:[#allocation8 + $0x210] sm:$0xff] }
 0x15c   :  { %3008 = vmatpush1.bf16.msra.mxu0 %v3007_v29  ;;  %3072 = vmatpush1.bf16.msra.mxu1 %v3071_v30  ;;  %v768_v29 = vld [vmem:[#allocation8 + $0xee8] sm:$0xff]  ;;  %v762_v30 = vld [vmem:[#allocation8 + $0xeb8] sm:$0xff]  ;;  %v252_v7 = vld [vmem:[#allocation8 + $0x200] sm:$0xff] }
 0x15d   :  { %3010 = vmatprep.subr.bf16.mxu0 %v3009_v33  ;;  %3074 = vmatprep.subr.bf16.mxu1 %v3073_v34  ;;  %v3091_v33 = vpack.c.bf16 %v753_v27, %v745_v26  ;;  %v759_v34 = vld [vmem:[#allocation8 + $0xea0] sm:$0xff]  ;;  %v3029_v36 = vpack.c.bf16 %v768_v29, %v760_v28  ;;  %v3093_v37 = vpack.c.bf16 %v770_v31, %v762_v30 }
 0x15e   :  { %v3031_v47 = vpack.c.bf16 %v767_v35, %v759_v34  ;;  %v3107_v26 = vpack.c.bf16 %v196_v16, %v188_v15  ;;  %v204_v28 = vld [vmem:[#allocation8 + $0x80] sm:$0xff]  ;;  %v221_v34 = vld [vmem:[#allocation8 + $0x108] sm:$0xff]  ;;  %v271_v15 = vld [vmem:[#allocation8 + $0x298] sm:$0xff] }
 0x15f   :  { %v212_v29 = vld [vmem:[#allocation8 + $0xc0] sm:$0xff]  ;;  %v229_v35 = vld [vmem:[#allocation8 + $0x148] sm:$0xff]  ;;  %v279_v16 = vld [vmem:[#allocation8 + $0x2d8] sm:$0xff] }
 0x160   :  { %3012 = vmatpush1.bf16.msra.mxu0 %v3011_v41  ;;  %3076 = vmatpush1.bf16.msra.mxu1 %v3075_v42  ;;  %v784_v41 = vld [vmem:[#allocation8 + $0xf68] sm:$0xff]  ;;  %v778_v42 = vld [vmem:[#allocation8 + $0xf38] sm:$0xff] }
 0x161   :  { %3014 = vmatprep.subr.bf16.mxu0 %v3013_v48  ;;  %3078 = vmatprep.subr.bf16.mxu1 %v3077_v49  ;;  %v3095_v48 = vpack.c.bf16 %v769_v39, %v761_v38  ;;  %v775_v49 = vld [vmem:[#allocation8 + $0xf20] sm:$0xff]  ;;  %v3033_v51 = vpack.c.bf16 %v784_v41, %v776_v40  ;;  %v3097_v52 = vpack.c.bf16 %v786_v45, %v778_v42 }
 0x162   :  { %v220_v40 = vld [vmem:[#allocation8 + $0x100] sm:$0xff]  ;;  %v3113_v42 = vpack.c.bf16 %v229_v35, %v221_v34  ;;  %v286_v35 = vld [vmem:[#allocation8 + $0x310] sm:$0xff] }
 0x163   :  { %v228_v41 = vld [vmem:[#allocation8 + $0x140] sm:$0xff] }
 0x164   :  { %3016 = vmatpush1.bf16.msra.mxu0 %v3015_v56  ;;  %3080 = vmatpush1.bf16.msra.mxu1 %v3079_v57  ;;  %v800_v56 = vld [vmem:[#allocation8 + $0xfe8] sm:$0xff]  ;;  %v794_v57 = vld [vmem:[#allocation8 + $0xfb8] sm:$0xff] }
 0x165   :  { %3018 = vmatprep.subr.bf16.mxu0 %v3017_v60  ;;  %3082 = vmatprep.subr.bf16.mxu1 %v3081_v62  ;;  %v3035_v60 = vpack.c.bf16 %v783_v50, %v775_v49  ;;  %v3099_v62 = vpack.c.bf16 %v785_v54, %v777_v53  ;;  %v3037_v2 = vpack.c.bf16 %v800_v56, %v792_v55  ;;  %v237_v49 = vld [vmem:[#allocation8 + $0x188] sm:$0xff]  ;;  %v236_v54 = vld [vmem:[#allocation8 + $0x180] sm:$0xff] }
 0x166   :  { %v3101_v3 = vpack.c.bf16 %v802_v58, %v794_v57  ;;  %v245_v50 = vld [vmem:[#allocation8 + $0x1c8] sm:$0xff]  ;;  %v244_v55 = vld [vmem:[#allocation8 + $0x1c0] sm:$0xff]  ;;  %v238_v58 = vld [vmem:[#allocation8 + $0x190] sm:$0xff] }
 0x167   :  { %v3117_v56 = vpack.c.bf16 %v245_v50, %v237_v49  ;;  %v302_v50 = vld [vmem:[#allocation8 + $0x390] sm:$0xff] }
 0x168   :  { %3020 = vmatpush1.bf16.msra.mxu0 %v3019_v8  ;;  %3084 = vmatpush1.bf16.msra.mxu1 %v3083_v9  ;;  %v189_v8 = vld [vmem:[#allocation8 + $0x8] sm:$0xff] }
 0x169   :  { %3022 = vmatprep.subr.bf16.mxu0 %v3021_v12  ;;  %3086 = vmatprep.subr.bf16.mxu1 %v3085_v13  ;;  %v197_v9 = vld [vmem:[#allocation8 + $0x48] sm:$0xff]  ;;  %v104_v12 = vrot.slane %v4197_v59, %v4185_v46  ;;  %v3039_v13 = vpack.c.bf16 %v799_v1, %v791_v63  ;;  %v255_v1 = vld [vmem:[#allocation8 + $0x218] sm:$0xff] }
 0x16a   :  { %v3105_v17 = vpack.c.bf16 %v197_v9, %v189_v8  ;;  %v261_v63 = vld [vmem:[#allocation8 + $0x248] sm:$0xff]  ;;  %v260_v8 = vld [vmem:[#allocation8 + $0x240] sm:$0xff] }
 0x16c   :  { %3024 = vmatpush1.bf16.msra.mxu0 %v3023_v20  ;;  %3088 = vmatpush1.bf16.msra.mxu1 %v3087_v21  ;;  %v198_v20 = vld [vmem:[#allocation8 + $0x50] sm:$0xff]  ;;  %v205_v21 = vld [vmem:[#allocation8 + $0x88] sm:$0xff] }
 0x16d   :  { %3026 = vmatprep.subr.bf16.mxu0 %v3025_v24  ;;  %3090 = vmatprep.subr.bf16.mxu1 %v3089_v25  ;;  %v215_v24 = vld [vmem:[#allocation8 + $0xd8] sm:$0xff]  ;;  %v184_v25 = vadd.f32 %v4191_v4, %v104_v12  ;;  %v3171_v27 = vpack.c.bf16 %v198_v20, %v190_v19  ;;  %v3109_v30 = vpack.c.bf16 %v213_v22, %v205_v21  ;;  %v262_v12 = vld [vmem:[#allocation8 + $0x250] sm:$0xff]  ;;  %v268_v19 = vld [vmem:[#allocation8 + $0x280] sm:$0xff] }
 0x16e   :  { %v3173_v31 = vpack.c.bf16 %v215_v24, %v207_v23  ;;  %v3111_v4 = vpack.c.bf16 %v212_v29, %v204_v28  ;;  %v276_v20 = vld [vmem:[#allocation8 + $0x2c0] sm:$0xff]  ;;  %v3189_v22 = vpack.c.bf16 %v279_v16, %v271_v15  ;;  %v270_v23 = vld [vmem:[#allocation8 + $0x290] sm:$0xff]  ;;  %v295_v28 = vld [vmem:[#allocation8 + $0x358] sm:$0xff] }
 0x16f   :  { %v4202_v38 = vmax.f32 %v184_v25, 0.0  ;;  %v278_v24 = vld [vmem:[#allocation8 + $0x2d0] sm:$0xff]  ;;  %v285_v25 = vld [vmem:[#allocation8 + $0x308] sm:$0xff]  ;;  %v3127_v29 = vpack.c.bf16 %v276_v20, %v268_v19  ;;  %v359_v19 = vld [vmem:[#allocation8 + $0x558] sm:$0xff] }
 0x170   :  { %3028 = vmatpush1.bf16.msra.mxu0 %v3027_v32  ;;  %3092 = vmatpush1.bf16.msra.mxu1 %v3091_v33  ;;  %v206_v32 = vld [vmem:[#allocation8 + $0x90] sm:$0xff]  ;;  %v349_v16 = vld [vmem:[#allocation8 + $0x508] sm:$0xff] }
 0x171   :  { %3030 = vmatprep.subr.bf16.mxu0 %v3029_v36  ;;  %3094 = vmatprep.subr.bf16.mxu1 %v3093_v37  ;;  %v214_v33 = vld [vmem:[#allocation8 + $0xd0] sm:$0xff]  ;;  %v223_v36 = vld [vmem:[#allocation8 + $0x118] sm:$0xff] }
 0x172   :  { %v231_v37 = vld [vmem:[#allocation8 + $0x158] sm:$0xff]  ;;  %v3175_v39 = vpack.c.bf16 %v214_v33, %v206_v32  ;;  %v292_v32 = vld [vmem:[#allocation8 + $0x340] sm:$0xff]  ;;  %v342_v15 = vld [vmem:[#allocation8 + $0x4d0] sm:$0xff] }
 0x173   :  { %v3177_v45 = vpack.c.bf16 %v231_v37, %v223_v36  ;;  %v294_v36 = vld [vmem:[#allocation8 + $0x350] sm:$0xff]  ;;  %v301_v37 = vld [vmem:[#allocation8 + $0x388] sm:$0xff] }
 0x174   :  { %3032 = vmatpush1.bf16.msra.mxu0 %v3031_v47  ;;  %3096 = vmatpush1.bf16.msra.mxu1 %v3095_v48  ;;  %v222_v47 = vld [vmem:[#allocation8 + $0x110] sm:$0xff] }
 0x175   :  { %3034 = vmatprep.subr.bf16.mxu0 %v3033_v51  ;;  %3098 = vmatprep.subr.bf16.mxu1 %v3097_v52  ;;  %v230_v48 = vld [vmem:[#allocation8 + $0x150] sm:$0xff]  ;;  %v239_v51 = vld [vmem:[#allocation8 + $0x198] sm:$0xff] }
 0x176   :  { %v247_v52 = vld [vmem:[#allocation8 + $0x1d8] sm:$0xff]  ;;  %v3179_v53 = vpack.c.bf16 %v230_v48, %v222_v47  ;;  %v308_v47 = vld [vmem:[#allocation8 + $0x3c0] sm:$0xff] }
 0x177   :  { %v3181_v57 = vpack.c.bf16 %v247_v52, %v239_v51  ;;  %v310_v51 = vld [vmem:[#allocation8 + $0x3d0] sm:$0xff]  ;;  %v317_v52 = vld [vmem:[#allocation8 + $0x408] sm:$0xff] }
 0x178   :  { %3036 = vmatpush1.bf16.msra.mxu0 %v3035_v60  ;;  %3100 = vmatpush1.bf16.msra.mxu1 %v3099_v62  ;;  %v246_v60 = vld [vmem:[#allocation8 + $0x1d0] sm:$0xff]  ;;  %v253_v62 = vld [vmem:[#allocation8 + $0x208] sm:$0xff] }
 0x179   :  { %3038 = vmatprep.subr.bf16.mxu0 %v3037_v2  ;;  %3102 = vmatprep.subr.bf16.mxu1 %v3101_v3  ;;  %v263_v2 = vld [vmem:[#allocation8 + $0x258] sm:$0xff]  ;;  %v3119_v3 = vpack.c.bf16 %v244_v55, %v236_v54  ;;  %v3183_v6 = vpack.c.bf16 %v246_v60, %v238_v58  ;;  %v3121_v9 = vpack.c.bf16 %v261_v63, %v253_v62  ;;  %v324_v58 = vld [vmem:[#allocation8 + $0x440] sm:$0xff]  ;;  %v318_v63 = vld [vmem:[#allocation8 + $0x410] sm:$0xff] }
 0x17a   :  { %v3185_v10 = vpack.c.bf16 %v263_v2, %v255_v1  ;;  %v327_v54 = vld [vmem:[#allocation8 + $0x458] sm:$0xff]  ;;  %v326_v1 = vld [vmem:[#allocation8 + $0x450] sm:$0xff]  ;;  %v333_v2 = vld [vmem:[#allocation8 + $0x488] sm:$0xff] }
 0x17c   :  { %3040 = vmatpush1.bf16.msra.mxu0 %v3039_v13  ;;  %3104 = vmatpush1.bf16.msra.mxu1 %v3103_v14  ;;  %v269_v13 = vld [vmem:[#allocation8 + $0x288] sm:$0xff] }
 0x17d   :  { %3106 = vmatprep.subr.bf16.mxu0 %v3105_v17  ;;  %3170 = vmatprep.subr.bf16.mxu1 %v3169_v18  ;;  %v277_v14 = vld [vmem:[#allocation8 + $0x2c8] sm:$0xff]  ;;  %v3123_v17 = vpack.c.bf16 %v260_v8, %v252_v7  ;;  %v3187_v18 = vpack.c.bf16 %v262_v12, %v254_v11  ;;  %v343_v7 = vld [vmem:[#allocation8 + $0x4d8] sm:$0xff]  ;;  %v340_v11 = vld [vmem:[#allocation8 + $0x4c0] sm:$0xff] }
 0x17e   :  { %v3125_v21 = vpack.c.bf16 %v277_v14, %v269_v13  ;;  %v334_v14 = vld [vmem:[#allocation8 + $0x490] sm:$0xff] }
 0x17f   :  { %1010 = vmatmul.mubr.f32.vlgmr.msra.gmra.mrb[4].mxu0 %v4193_v5  ;;  %1081 = vmatmul.mubr.f32.vlgmr.msra.gmra.mrb[4].mxu1 %v4193_v5  ;;  %v3115_v5 = vpack.c.bf16 %v228_v41, %v220_v40  ;;  %v311_v40 = vld [vmem:[#allocation8 + $0x3d8] sm:$0xff] }
 0x180   :  { %3108 = vmatpush1.bf16.msra.mxu0 %v3107_v26  ;;  %3172 = vmatpush1.bf16.msra.mxu1 %v3171_v27  ;;  %v293_v26 = vld [vmem:[#allocation8 + $0x348] sm:$0xff]  ;;  %v287_v27 = vld [vmem:[#allocation8 + $0x318] sm:$0xff] }
 0x181   :  { %3110 = vmatprep.subr.bf16.mxu0 %v3109_v30  ;;  %3174 = vmatprep.subr.bf16.mxu1 %v3173_v31  ;;  %v3191_v30 = vpack.c.bf16 %v278_v24, %v270_v23  ;;  %v284_v31 = vld [vmem:[#allocation8 + $0x300] sm:$0xff]  ;;  %v3129_v33 = vpack.c.bf16 %v293_v26, %v285_v25  ;;  %v3193_v34 = vpack.c.bf16 %v295_v28, %v287_v27  ;;  %v350_v26 = vld [vmem:[#allocation8 + $0x510] sm:$0xff]  ;;  %v365_v28 = vld [vmem:[#allocation8 + $0x588] sm:$0xff] }
 0x182   :  { %1151 = vmatprep.mubr.f32.mxu0 %v4202_v38  ;;  %1222 = vmatprep.mubr.f32.mxu1 %v4202_v38  ;;  %v3131_v41 = vpack.c.bf16 %v292_v32, %v284_v31  ;;  %v356_v23 = vld [vmem:[#allocation8 + $0x540] sm:$0xff]  ;;  %v358_v27 = vld [vmem:[#allocation8 + $0x550] sm:$0xff]  ;;  %v375_v31 = vld [vmem:[#allocation8 + $0x5d8] sm:$0xff] }
 0x184   :  { %3112 = vmatpush1.bf16.msra.mxu0 %v3111_v4  ;;  %3176 = vmatpush1.bf16.msra.mxu1 %v3175_v39  ;;  %v309_v4 = vld [vmem:[#allocation8 + $0x3c8] sm:$0xff]  ;;  %v303_v39 = vld [vmem:[#allocation8 + $0x398] sm:$0xff] }
 0x185   :  { %3114 = vmatprep.subr.bf16.mxu0 %v3113_v42  ;;  %3178 = vmatprep.subr.bf16.mxu1 %v3177_v45  ;;  %v3195_v42 = vpack.c.bf16 %v294_v36, %v286_v35  ;;  %v300_v45 = vld [vmem:[#allocation8 + $0x380] sm:$0xff]  ;;  %v3133_v48 = vpack.c.bf16 %v309_v4, %v301_v37  ;;  %v3197_v49 = vpack.c.bf16 %v311_v40, %v303_v39  ;;  %v366_v4 = vld [vmem:[#allocation8 + $0x590] sm:$0xff]  ;;  %v381_v40 = vld [vmem:[#allocation8 + $0x608] sm:$0xff] }
 0x186   :  { %v3135_v55 = vpack.c.bf16 %v308_v47, %v300_v45  ;;  %v372_v35 = vld [vmem:[#allocation8 + $0x5c0] sm:$0xff]  ;;  %v374_v39 = vld [vmem:[#allocation8 + $0x5d0] sm:$0xff]  ;;  %v391_v45 = vld [vmem:[#allocation8 + $0x658] sm:$0xff] }
 0x188   :  { %3116 = vmatpush1.bf16.msra.mxu0 %v3115_v5  ;;  %3180 = vmatpush1.bf16.msra.mxu1 %v3179_v53  ;;  %v325_v5 = vld [vmem:[#allocation8 + $0x448] sm:$0xff]  ;;  %v319_v53 = vld [vmem:[#allocation8 + $0x418] sm:$0xff] }
 0x189   :  { %3118 = vmatprep.subr.bf16.mxu0 %v3117_v56  ;;  %3182 = vmatprep.subr.bf16.mxu1 %v3181_v57  ;;  %v3199_v56 = vpack.c.bf16 %v310_v51, %v302_v50  ;;  %v316_v57 = vld [vmem:[#allocation8 + $0x400] sm:$0xff]  ;;  %v3137_v60 = vpack.c.bf16 %v325_v5, %v317_v52  ;;  %v3201_v62 = vpack.c.bf16 %v327_v54, %v319_v53  ;;  %v382_v5 = vld [vmem:[#allocation8 + $0x610] sm:$0xff]  ;;  %v397_v54 = vld [vmem:[#allocation8 + $0x688] sm:$0xff] }
 0x18a   :  { %v3139_v8 = vpack.c.bf16 %v324_v58, %v316_v57  ;;  %v388_v50 = vld [vmem:[#allocation8 + $0x640] sm:$0xff]  ;;  %v390_v53 = vld [vmem:[#allocation8 + $0x650] sm:$0xff]  ;;  %v407_v57 = vld [vmem:[#allocation8 + $0x6d8] sm:$0xff] }
 0x18c   :  { %3120 = vmatpush1.bf16.msra.mxu0 %v3119_v3  ;;  %3184 = vmatpush1.bf16.msra.mxu1 %v3183_v6  ;;  %v341_v3 = vld [vmem:[#allocation8 + $0x4c8] sm:$0xff]  ;;  %v335_v6 = vld [vmem:[#allocation8 + $0x498] sm:$0xff] }
 0x18d   :  { %3122 = vmatprep.subr.bf16.mxu0 %v3121_v9  ;;  %3186 = vmatprep.subr.bf16.mxu1 %v3185_v10  ;;  %v3203_v9 = vpack.c.bf16 %v326_v1, %v318_v63  ;;  %v332_v10 = vld [vmem:[#allocation8 + $0x480] sm:$0xff]  ;;  %v3141_v12 = vpack.c.bf16 %v341_v3, %v333_v2  ;;  %v3205_v13 = vpack.c.bf16 %v343_v7, %v335_v6  ;;  %v398_v3 = vld [vmem:[#allocation8 + $0x690] sm:$0xff]  ;;  %v413_v7 = vld [vmem:[#allocation8 + $0x708] sm:$0xff] }
 0x18e   :  { %v3143_v20 = vpack.c.bf16 %v340_v11, %v332_v10  ;;  %v404_v63 = vld [vmem:[#allocation8 + $0x6c0] sm:$0xff]  ;;  %v406_v6 = vld [vmem:[#allocation8 + $0x6d0] sm:$0xff]  ;;  %v423_v10 = vld [vmem:[#allocation8 + $0x758] sm:$0xff] }
 0x190   :  { %3124 = vmatpush1.bf16.msra.mxu0 %v3123_v17  ;;  %3188 = vmatpush1.bf16.msra.mxu1 %v3187_v18  ;;  %v357_v17 = vld [vmem:[#allocation8 + $0x548] sm:$0xff]  ;;  %v351_v18 = vld [vmem:[#allocation8 + $0x518] sm:$0xff] }
 0x191   :  { %3126 = vmatprep.subr.bf16.mxu0 %v3125_v21  ;;  %3190 = vmatprep.subr.bf16.mxu1 %v3189_v22  ;;  %v3207_v21 = vpack.c.bf16 %v342_v15, %v334_v14  ;;  %v348_v22 = vld [vmem:[#allocation8 + $0x500] sm:$0xff]  ;;  %v3145_v24 = vpack.c.bf16 %v357_v17, %v349_v16  ;;  %v3209_v25 = vpack.c.bf16 %v359_v19, %v351_v18  ;;  %v414_v17 = vld [vmem:[#allocation8 + $0x710] sm:$0xff]  ;;  %v429_v19 = vld [vmem:[#allocation8 + $0x788] sm:$0xff] }
 0x192   :  { %v3147_v32 = vpack.c.bf16 %v356_v23, %v348_v22  ;;  %v420_v14 = vld [vmem:[#allocation8 + $0x740] sm:$0xff]  ;;  %v422_v18 = vld [vmem:[#allocation8 + $0x750] sm:$0xff]  ;;  %v439_v22 = vld [vmem:[#allocation8 + $0x7d8] sm:$0xff]  ;;  %v100_v23 = vrot.slane %v4197_v59, %v4182_v44 }
 0x194   :  { %3128 = vmatpush1.bf16.msra.mxu0 %v3127_v29  ;;  %3192 = vmatpush1.bf16.msra.mxu1 %v3191_v30  ;;  %v373_v29 = vld [vmem:[#allocation8 + $0x5c8] sm:$0xff]  ;;  %v367_v30 = vld [vmem:[#allocation8 + $0x598] sm:$0xff] }
 0x195   :  { %3130 = vmatprep.subr.bf16.mxu0 %v3129_v33  ;;  %3194 = vmatprep.subr.bf16.mxu1 %v3193_v34  ;;  %v3211_v33 = vpack.c.bf16 %v358_v27, %v350_v26  ;;  %v364_v34 = vld [vmem:[#allocation8 + $0x580] sm:$0xff]  ;;  %v3149_v36 = vpack.c.bf16 %v373_v29, %v365_v28  ;;  %v3213_v37 = vpack.c.bf16 %v375_v31, %v367_v30  ;;  %v430_v30 = vld [vmem:[#allocation8 + $0x790] sm:$0xff] }
 0x196   :  { %v3151_v47 = vpack.c.bf16 %v372_v35, %v364_v34  ;;  %v428_v26 = vld [vmem:[#allocation8 + $0x780] sm:$0xff]  ;;  %v438_v31 = vld [vmem:[#allocation8 + $0x7d0] sm:$0xff]  ;;  %v195_v34 = vld [vmem:[#allocation8 + $0x38] sm:$0xff] }
 0x197   :  { %v436_v27 = vld [vmem:[#allocation8 + $0x7c0] sm:$0xff]  ;;  %v203_v35 = vld [vmem:[#allocation8 + $0x78] sm:$0xff] }
 0x198   :  { %3132 = vmatpush1.bf16.msra.mxu0 %v3131_v41  ;;  %3196 = vmatpush1.bf16.msra.mxu1 %v3195_v42  ;;  %v389_v41 = vld [vmem:[#allocation8 + $0x648] sm:$0xff]  ;;  %v383_v42 = vld [vmem:[#allocation8 + $0x618] sm:$0xff]  ;;  %v3167_v59 = vpack.c.bf16 %v436_v27, %v428_v26 }
 0x199   :  { %3134 = vmatprep.subr.bf16.mxu0 %v3133_v48  ;;  %3198 = vmatprep.subr.bf16.mxu1 %v3197_v49  ;;  %v3215_v48 = vpack.c.bf16 %v374_v39, %v366_v4  ;;  %v380_v49 = vld [vmem:[#allocation8 + $0x600] sm:$0xff]  ;;  %v3153_v51 = vpack.c.bf16 %v389_v41, %v381_v40  ;;  %v3217_v52 = vpack.c.bf16 %v391_v45, %v383_v42  ;;  %v194_v42 = vld [vmem:[#allocation8 + $0x30] sm:$0xff] }
 0x19a   :  { %v3155_v58 = vpack.c.bf16 %v388_v50, %v380_v49  ;;  %v3297_v39 = vpack.c.bf16 %v203_v35, %v195_v34  ;;  %v192_v40 = vld [vmem:[#allocation8 + $0x20] sm:$0xff]  ;;  %v202_v45 = vld [vmem:[#allocation8 + $0x70] sm:$0xff]  ;;  %v217_v49 = vld [vmem:[#allocation8 + $0xe8] sm:$0xff] }
 0x19b   :  { %v200_v41 = vld [vmem:[#allocation8 + $0x60] sm:$0xff]  ;;  %v211_v50 = vld [vmem:[#allocation8 + $0xb8] sm:$0xff]  ;;  %v273_v34 = vld [vmem:[#allocation8 + $0x2a8] sm:$0xff] }
 0x19c   :  { %3136 = vmatpush1.bf16.msra.mxu0 %v3135_v55  ;;  %3200 = vmatpush1.bf16.msra.mxu1 %v3199_v56  ;;  %v405_v55 = vld [vmem:[#allocation8 + $0x6c8] sm:$0xff]  ;;  %v399_v56 = vld [vmem:[#allocation8 + $0x698] sm:$0xff] }
 0x19d   :  { %3138 = vmatprep.subr.bf16.mxu0 %v3137_v60  ;;  %3202 = vmatprep.subr.bf16.mxu1 %v3201_v62  ;;  %v3219_v60 = vpack.c.bf16 %v390_v53, %v382_v5  ;;  %v396_v62 = vld [vmem:[#allocation8 + $0x680] sm:$0xff]  ;;  %v3157_v1 = vpack.c.bf16 %v405_v55, %v397_v54  ;;  %v3221_v2 = vpack.c.bf16 %v407_v57, %v399_v56  ;;  %v210_v54 = vld [vmem:[#allocation8 + $0xb0] sm:$0xff]  ;;  %v281_v35 = vld [vmem:[#allocation8 + $0x2e8] sm:$0xff] }
 0x19e   :  { %v3159_v11 = vpack.c.bf16 %v404_v63, %v396_v62  ;;  %v208_v5 = vld [vmem:[#allocation8 + $0xa0] sm:$0xff]  ;;  %v218_v57 = vld [vmem:[#allocation8 + $0xf0] sm:$0xff]  ;;  %v227_v62 = vld [vmem:[#allocation8 + $0x138] sm:$0xff] }
 0x19f   :  { %v216_v53 = vld [vmem:[#allocation8 + $0xe0] sm:$0xff]  ;;  %v235_v63 = vld [vmem:[#allocation8 + $0x178] sm:$0xff] }
 0x1a0   :  { %3140 = vmatpush1.bf16.msra.mxu0 %v3139_v8  ;;  %3204 = vmatpush1.bf16.msra.mxu1 %v3203_v9  ;;  %v421_v8 = vld [vmem:[#allocation8 + $0x748] sm:$0xff]  ;;  %v415_v9 = vld [vmem:[#allocation8 + $0x718] sm:$0xff] }
 0x1a1   :  { %3142 = vmatprep.subr.bf16.mxu0 %v3141_v12  ;;  %3206 = vmatprep.subr.bf16.mxu1 %v3205_v13  ;;  %v3223_v12 = vpack.c.bf16 %v406_v6, %v398_v3  ;;  %v412_v13 = vld [vmem:[#allocation8 + $0x700] sm:$0xff]  ;;  %v3161_v15 = vpack.c.bf16 %v421_v8, %v413_v7  ;;  %v3225_v16 = vpack.c.bf16 %v423_v10, %v415_v9  ;;  %v226_v8 = vld [vmem:[#allocation8 + $0x130] sm:$0xff] }
 0x1a2   :  { %v224_v6 = vld [vmem:[#allocation8 + $0x120] sm:$0xff]  ;;  %v3305_v9 = vpack.c.bf16 %v235_v63, %v227_v62  ;;  %v234_v10 = vld [vmem:[#allocation8 + $0x170] sm:$0xff]  ;;  %v313_v62 = vld [vmem:[#allocation8 + $0x3e8] sm:$0xff] }
 0x1a3   :  { %v232_v7 = vld [vmem:[#allocation8 + $0x160] sm:$0xff]  ;;  %v307_v63 = vld [vmem:[#allocation8 + $0x3b8] sm:$0xff] }
 0x1a4   :  { %3144 = vmatpush1.bf16.msra.mxu0 %v3143_v20  ;;  %3208 = vmatpush1.bf16.msra.mxu1 %v3207_v21  ;;  %v437_v20 = vld [vmem:[#allocation8 + $0x7c8] sm:$0xff]  ;;  %v431_v21 = vld [vmem:[#allocation8 + $0x798] sm:$0xff] }
 0x1a5   :  { %3146 = vmatprep.subr.bf16.mxu0 %v3145_v24  ;;  %3210 = vmatprep.subr.bf16.mxu1 %v3209_v25  ;;  %v3163_v24 = vpack.c.bf16 %v420_v14, %v412_v13  ;;  %v3227_v25 = vpack.c.bf16 %v422_v18, %v414_v17  ;;  %v3165_v28 = vpack.c.bf16 %v437_v20, %v429_v19  ;;  %v243_v13 = vld [vmem:[#allocation8 + $0x1b8] sm:$0xff]  ;;  %v248_v18 = vld [vmem:[#allocation8 + $0x1e0] sm:$0xff]  ;;  %v242_v19 = vld [vmem:[#allocation8 + $0x1b0] sm:$0xff] }
 0x1a6   :  { %v3229_v29 = vpack.c.bf16 %v439_v22, %v431_v21  ;;  %v251_v14 = vld [vmem:[#allocation8 + $0x1f8] sm:$0xff]  ;;  %v250_v21 = vld [vmem:[#allocation8 + $0x1f0] sm:$0xff]  ;;  %v257_v22 = vld [vmem:[#allocation8 + $0x228] sm:$0xff] }
 0x1a7   :  { %v3309_v20 = vpack.c.bf16 %v251_v14, %v243_v13  ;;  %v3311_v27 = vpack.c.bf16 %v250_v21, %v242_v19  ;;  %v329_v13 = vld [vmem:[#allocation8 + $0x468] sm:$0xff]  ;;  %v323_v14 = vld [vmem:[#allocation8 + $0x438] sm:$0xff]  ;;  %v328_v19 = vld [vmem:[#allocation8 + $0x460] sm:$0xff] }
 0x1a8   :  { %3148 = vmatpush1.bf16.msra.mxu0 %v3147_v32  ;;  %3212 = vmatpush1.bf16.msra.mxu1 %v3211_v33  ;;  %v193_v32 = vld [vmem:[#allocation8 + $0x28] sm:$0xff] }
 0x1a9   :  { %3150 = vmatprep.subr.bf16.mxu0 %v3149_v36  ;;  %3214 = vmatprep.subr.bf16.mxu1 %v3213_v37  ;;  %v201_v33 = vld [vmem:[#allocation8 + $0x68] sm:$0xff]  ;;  %v182_v36 = vadd.f32 %v4189_v61, %v100_v23  ;;  %v3231_v37 = vpack.c.bf16 %v438_v31, %v430_v30  ;;  %v3235_v61 = vpack.c.bf16 %v200_v41, %v192_v40  ;;  %v264_v30 = vld [vmem:[#allocation8 + $0x260] sm:$0xff]  ;;  %v258_v31 = vld [vmem:[#allocation8 + $0x230] sm:$0xff] }
 0x1aa   :  { %v3233_v4 = vpack.c.bf16 %v201_v33, %v193_v32  ;;  %v265_v23 = vld [vmem:[#allocation8 + $0x268] sm:$0xff]  ;;  %v266_v33 = vld [vmem:[#allocation8 + $0x270] sm:$0xff]  ;;  %v272_v40 = vld [vmem:[#allocation8 + $0x2a0] sm:$0xff] }
 0x1ab   :  { %v280_v41 = vld [vmem:[#allocation8 + $0x2e0] sm:$0xff] }
 0x1ac   :  { %3152 = vmatpush1.bf16.msra.mxu0 %v3151_v47  ;;  %3216 = vmatpush1.bf16.msra.mxu1 %v3215_v48  ;;  %v209_v47 = vld [vmem:[#allocation8 + $0xa8] sm:$0xff]  ;;  %v4211_v48 = vmax.f32 %v182_v36, 0.0  ;;  %v275_v36 = vld [vmem:[#allocation8 + $0x2b8] sm:$0xff] }
 0x1ad   :  { %3154 = vmatprep.subr.bf16.mxu0 %v3153_v51  ;;  %3218 = vmatprep.subr.bf16.mxu1 %v3217_v52  ;;  %v219_v51 = vld [vmem:[#allocation8 + $0xf8] sm:$0xff]  ;;  %v3299_v52 = vpack.c.bf16 %v202_v45, %v194_v42  ;;  %v3237_v55 = vpack.c.bf16 %v217_v49, %v209_v47  ;;  %v274_v42 = vld [vmem:[#allocation8 + $0x2b0] sm:$0xff]  ;;  %v289_v49 = vld [vmem:[#allocation8 + $0x328] sm:$0xff] }
 0x1ae   :  { %v3301_v56 = vpack.c.bf16 %v219_v51, %v211_v50  ;;  %v282_v47 = vld [vmem:[#allocation8 + $0x2f0] sm:$0xff]  ;;  %v297_v50 = vld [vmem:[#allocation8 + $0x368] sm:$0xff]  ;;  %v291_v51 = vld [vmem:[#allocation8 + $0x338] sm:$0xff] }
 0x1b0   :  { %3156 = vmatpush1.bf16.msra.mxu0 %v3155_v58  ;;  %3220 = vmatpush1.bf16.msra.mxu1 %v3219_v60  ;;  %v225_v58 = vld [vmem:[#allocation8 + $0x128] sm:$0xff] }
 0x1b1   :  { %3158 = vmatprep.subr.bf16.mxu0 %v3157_v1  ;;  %3222 = vmatprep.subr.bf16.mxu1 %v3221_v2  ;;  %v233_v60 = vld [vmem:[#allocation8 + $0x168] sm:$0xff]  ;;  %v3239_v1 = vpack.c.bf16 %v216_v53, %v208_v5  ;;  %v3303_v2 = vpack.c.bf16 %v218_v57, %v210_v54  ;;  %v3319_v5 = vpack.c.bf16 %v282_v47, %v274_v42  ;;  %v288_v54 = vld [vmem:[#allocation8 + $0x320] sm:$0xff] }
 0x1b2   :  { %v3241_v3 = vpack.c.bf16 %v233_v60, %v225_v58  ;;  %v3257_v53 = vpack.c.bf16 %v297_v50, %v289_v49  ;;  %v298_v58 = vld [vmem:[#allocation8 + $0x370] sm:$0xff]  ;;  %v305_v60 = vld [vmem:[#allocation8 + $0x3a8] sm:$0xff]  ;;  %v360_v42 = vld [vmem:[#allocation8 + $0x560] sm:$0xff] }
 0x1b3   :  { %v362_v49 = vld [vmem:[#allocation8 + $0x570] sm:$0xff]  ;;  %v369_v50 = vld [vmem:[#allocation8 + $0x5a8] sm:$0xff] }
 0x1b4   :  { %3160 = vmatpush1.bf16.msra.mxu0 %v3159_v11  ;;  %3224 = vmatpush1.bf16.msra.mxu1 %v3223_v12  ;;  %v241_v11 = vld [vmem:[#allocation8 + $0x1a8] sm:$0xff] }
 0x1b5   :  { %3162 = vmatprep.subr.bf16.mxu0 %v3161_v15  ;;  %3226 = vmatprep.subr.bf16.mxu1 %v3225_v16  ;;  %v249_v12 = vld [vmem:[#allocation8 + $0x1e8] sm:$0xff]  ;;  %v3243_v15 = vpack.c.bf16 %v232_v7, %v224_v6  ;;  %v3307_v16 = vpack.c.bf16 %v234_v10, %v226_v8  ;;  %v3261_v6 = vpack.c.bf16 %v313_v62, %v305_v60  ;;  %v304_v7 = vld [vmem:[#allocation8 + $0x3a0] sm:$0xff]  ;;  %v378_v60 = vld [vmem:[#allocation8 + $0x5f0] sm:$0xff] }
 0x1b6   :  { %v3245_v17 = vpack.c.bf16 %v249_v12, %v241_v11  ;;  %v312_v8 = vld [vmem:[#allocation8 + $0x3e0] sm:$0xff]  ;;  %v314_v11 = vld [vmem:[#allocation8 + $0x3f0] sm:$0xff]  ;;  %v321_v12 = vld [vmem:[#allocation8 + $0x428] sm:$0xff] }
 0x1b7   :  { %v385_v62 = vld [vmem:[#allocation8 + $0x628] sm:$0xff] }
 0x1b8   :  { %3164 = vmatpush1.bf16.msra.mxu0 %v3163_v24  ;;  %3228 = vmatpush1.bf16.msra.mxu1 %v3227_v25  ;;  %v259_v24 = vld [vmem:[#allocation8 + $0x238] sm:$0xff] }
 0x1b9   :  { %3166 = vmatprep.subr.bf16.mxu0 %v3165_v28  ;;  %3230 = vmatprep.subr.bf16.mxu1 %v3229_v29  ;;  %v267_v25 = vld [vmem:[#allocation8 + $0x278] sm:$0xff]  ;;  %v3249_v28 = vpack.c.bf16 %v265_v23, %v257_v22  ;;  %v256_v29 = vld [vmem:[#allocation8 + $0x220] sm:$0xff]  ;;  %v330_v22 = vld [vmem:[#allocation8 + $0x470] sm:$0xff] }
 0x1ba   :  { %v3313_v32 = vpack.c.bf16 %v267_v25, %v259_v24  ;;  %v337_v23 = vld [vmem:[#allocation8 + $0x4a8] sm:$0xff]  ;;  %v339_v25 = vld [vmem:[#allocation8 + $0x4b8] sm:$0xff] }
 0x1bb   :  { %v345_v24 = vld [vmem:[#allocation8 + $0x4e8] sm:$0xff] }
 0x1bc   :  { %3168 = vmatpush1.bf16.msra.mxu0 %v3167_v59  ;;  %3232 = vmatpush1.bf16.msra.mxu1 %v3231_v37  ;;  %v283_v59 = vld [vmem:[#allocation8 + $0x2f8] sm:$0xff]  ;;  %v3251_v37 = vpack.c.bf16 %v264_v30, %v256_v29  ;;  %v3269_v29 = vpack.c.bf16 %v345_v24, %v337_v23  ;;  %v336_v30 = vld [vmem:[#allocation8 + $0x4a0] sm:$0xff]  ;;  %v410_v23 = vld [vmem:[#allocation8 + $0x6f0] sm:$0xff] }
 0x1bd   :  { %3234 = vmatprep.subr.bf16.mxu0 %v3233_v4  ;;  %3298 = vmatprep.subr.bf16.mxu1 %v3297_v39  ;;  %v3315_v4 = vpack.c.bf16 %v266_v33, %v258_v31  ;;  %v3253_v39 = vpack.c.bf16 %v281_v35, %v273_v34  ;;  %v3317_v45 = vpack.c.bf16 %v283_v59, %v275_v36  ;;  %v344_v31 = vld [vmem:[#allocation8 + $0x4e0] sm:$0xff]  ;;  %v346_v34 = vld [vmem:[#allocation8 + $0x4f0] sm:$0xff]  ;;  %v353_v35 = vld [vmem:[#allocation8 + $0x528] sm:$0xff] }
 0x1be   :  { %v361_v36 = vld [vmem:[#allocation8 + $0x568] sm:$0xff]  ;;  %v355_v59 = vld [vmem:[#allocation8 + $0x538] sm:$0xff] }
 0x1bf   :  { %1152 = vmatmul.mubr.f32.vlgmr.msra.gmra.mrb[2].mxu0 %v4211_v48  ;;  %1223 = vmatmul.mubr.f32.vlgmr.msra.gmra.mrb[2].mxu1 %v4211_v48  ;;  %v417_v24 = vld [vmem:[#allocation8 + $0x728] sm:$0xff] }
 0x1c0   :  { %3236 = vmatpush1.bf16.msra.mxu0 %v3235_v61  ;;  %1293 = vmatprep.mubr.f32.mxu0 %v4202_v38  ;;  %v299_v61 = vld [vmem:[#allocation8 + $0x378] sm:$0xff] }
 0x1c1   :  { %3300 = vmatpush1.bf16.msra.mxu1 %v3299_v52  ;;  %1364 = vmatprep.mubr.f32.mxu1 %v4202_v38  ;;  %v240_v38 = vld [vmem:[#allocation8 + $0x1a0] sm:$0xff]  ;;  %v3255_v52 = vpack.c.bf16 %v280_v41, %v272_v40  ;;  %v3321_v57 = vpack.c.bf16 %v299_v61, %v291_v51  ;;  %v3273_v40 = vpack.c.bf16 %v361_v36, %v353_v35  ;;  %v377_v51 = vld [vmem:[#allocation8 + $0x5e8] sm:$0xff]  ;;  %v371_v61 = vld [vmem:[#allocation8 + $0x5b8] sm:$0xff] }
 0x1c2   :  { %3238 = vmatprep.subr.bf16.mxu0 %v3237_v55  ;;  %3302 = vmatprep.subr.bf16.mxu1 %v3301_v56  ;;  %v3247_v26 = vpack.c.bf16 %v248_v18, %v240_v38  ;;  %v296_v55 = vld [vmem:[#allocation8 + $0x360] sm:$0xff]  ;;  %v290_v56 = vld [vmem:[#allocation8 + $0x330] sm:$0xff]  ;;  %v3265_v38 = vpack.c.bf16 %v329_v13, %v321_v12  ;;  %v401_v13 = vld [vmem:[#allocation8 + $0x6a8] sm:$0xff] }
 0x1c3   :  { %v320_v18 = vld [vmem:[#allocation8 + $0x420] sm:$0xff]  ;;  %v394_v12 = vld [vmem:[#allocation8 + $0x670] sm:$0xff]  ;;  %v433_v36 = vld [vmem:[#allocation8 + $0x7a8] sm:$0xff] }
 0x1c4   :  { %3240 = vmatpush1.bf16.msra.mxu0 %v3239_v1  ;;  %v315_v1 = vld [vmem:[#allocation8 + $0x3f8] sm:$0xff]  ;;  %v352_v41 = vld [vmem:[#allocation8 + $0x520] sm:$0xff]  ;;  %v426_v35 = vld [vmem:[#allocation8 + $0x770] sm:$0xff] }
 0x1c5   :  { %3304 = vmatpush1.bf16.msra.mxu1 %v3303_v2  ;;  %3242 = vmatprep.subr.bf16.mxu0 %v3241_v3  ;;  %v3259_v2 = vpack.c.bf16 %v296_v55, %v288_v54  ;;  %v3323_v3 = vpack.c.bf16 %v298_v58, %v290_v56  ;;  %v3325_v10 = vpack.c.bf16 %v315_v1, %v307_v63  ;;  %v368_v55 = vld [vmem:[#allocation8 + $0x5a0] sm:$0xff]  ;;  %v393_v63 = vld [vmem:[#allocation8 + $0x668] sm:$0xff]  ;;  %v387_v1 = vld [vmem:[#allocation8 + $0x638] sm:$0xff] }
 0x1c6   :  { %3306 = vmatprep.subr.bf16.mxu1 %v3305_v9  ;;  %v306_v9 = vld [vmem:[#allocation8 + $0x3b0] sm:$0xff]  ;;  %v3277_v54 = vpack.c.bf16 %v377_v51, %v369_v50  ;;  %v376_v56 = vld [vmem:[#allocation8 + $0x5e0] sm:$0xff] }
 0x1c7   :  { %v442_v50 = vld [vmem:[#allocation8 + $0x7f0] sm:$0xff]  ;;  %v1375_v51 = vld [vmem:[#allocation5 + $0x88] sm:$0xff] }
 0x1c8   :  { %3244 = vmatpush1.bf16.msra.mxu0 %v3243_v15  ;;  %v331_v15 = vld [vmem:[#allocation8 + $0x478] sm:$0xff] }
 0x1c9   :  { %3308 = vmatpush1.bf16.msra.mxu1 %v3307_v16  ;;  %3246 = vmatprep.subr.bf16.mxu0 %v3245_v17  ;;  %v3263_v16 = vpack.c.bf16 %v312_v8, %v304_v7  ;;  %v3327_v17 = vpack.c.bf16 %v314_v11, %v306_v9  ;;  %v3329_v21 = vpack.c.bf16 %v331_v15, %v323_v14  ;;  %v384_v8 = vld [vmem:[#allocation8 + $0x620] sm:$0xff]  ;;  %v409_v14 = vld [vmem:[#allocation8 + $0x6e8] sm:$0xff]  ;;  %v403_v15 = vld [vmem:[#allocation8 + $0x6b8] sm:$0xff] }
 0x1ca   :  { %3310 = vmatprep.subr.bf16.mxu1 %v3309_v20  ;;  %v322_v20 = vld [vmem:[#allocation8 + $0x430] sm:$0xff]  ;;  %v3281_v7 = vpack.c.bf16 %v393_v63, %v385_v62  ;;  %v392_v9 = vld [vmem:[#allocation8 + $0x660] sm:$0xff] }
 0x1cb   :  { %v1476_v63 = vld [vmem:[#allocation8 + $0x1010] sm:$0xff] }
 0x1cc   :  { %3248 = vmatpush1.bf16.msra.mxu0 %v3247_v26  ;;  %v347_v26 = vld [vmem:[#allocation8 + $0x4f8] sm:$0xff] }
 0x1cd   :  { %3312 = vmatpush1.bf16.msra.mxu1 %v3311_v27  ;;  %3250 = vmatprep.subr.bf16.mxu0 %v3249_v28  ;;  %v3267_v27 = vpack.c.bf16 %v328_v19, %v320_v18  ;;  %v3331_v28 = vpack.c.bf16 %v330_v22, %v322_v20  ;;  %v3333_v33 = vpack.c.bf16 %v347_v26, %v339_v25  ;;  %v400_v19 = vld [vmem:[#allocation8 + $0x6a0] sm:$0xff]  ;;  %v425_v25 = vld [vmem:[#allocation8 + $0x768] sm:$0xff]  ;;  %v419_v26 = vld [vmem:[#allocation8 + $0x738] sm:$0xff] }
 0x1ce   :  { %3314 = vmatprep.subr.bf16.mxu1 %v3313_v32  ;;  %v338_v32 = vld [vmem:[#allocation8 + $0x4b0] sm:$0xff]  ;;  %v3285_v18 = vpack.c.bf16 %v409_v14, %v401_v13  ;;  %v408_v20 = vld [vmem:[#allocation8 + $0x6e0] sm:$0xff] }
 0x1d0   :  { %3252 = vmatpush1.bf16.msra.mxu0 %v3251_v37  ;;  %v363_v37 = vld [vmem:[#allocation8 + $0x578] sm:$0xff] }
 0x1d1   :  { %3316 = vmatpush1.bf16.msra.mxu1 %v3315_v4  ;;  %3254 = vmatprep.subr.bf16.mxu0 %v3253_v39  ;;  %v3271_v4 = vpack.c.bf16 %v344_v31, %v336_v30  ;;  %v3335_v39 = vpack.c.bf16 %v346_v34, %v338_v32  ;;  %v3337_v47 = vpack.c.bf16 %v363_v37, %v355_v59  ;;  %v416_v31 = vld [vmem:[#allocation8 + $0x720] sm:$0xff]  ;;  %v441_v59 = vld [vmem:[#allocation8 + $0x7e8] sm:$0xff]  ;;  %v435_v37 = vld [vmem:[#allocation8 + $0x7b8] sm:$0xff] }
 0x1d2   :  { %3318 = vmatprep.subr.bf16.mxu1 %v3317_v45  ;;  %v354_v45 = vld [vmem:[#allocation8 + $0x530] sm:$0xff]  ;;  %v3289_v30 = vpack.c.bf16 %v425_v25, %v417_v24  ;;  %v424_v32 = vld [vmem:[#allocation8 + $0x760] sm:$0xff]  ;;  %v1491_v24 = vld [vmem:[#allocation8 + $0x1088] sm:$0xff] }
 0x1d3   :  { %v1499_v25 = vld [vmem:[#allocation8 + $0x10c8] sm:$0xff] }
 0x1d4   :  { %3256 = vmatpush1.bf16.msra.mxu0 %v3255_v52  ;;  %v379_v52 = vld [vmem:[#allocation8 + $0x5f8] sm:$0xff] }
 0x1d5   :  { %3320 = vmatpush1.bf16.msra.mxu1 %v3319_v5  ;;  %3258 = vmatprep.subr.bf16.mxu0 %v3257_v53  ;;  %v3275_v5 = vpack.c.bf16 %v360_v42, %v352_v41  ;;  %v3339_v53 = vpack.c.bf16 %v362_v49, %v354_v45  ;;  %v3341_v58 = vpack.c.bf16 %v379_v52, %v371_v61  ;;  %v432_v42 = vld [vmem:[#allocation8 + $0x7a0] sm:$0xff]  ;;  %v1377_v61 = vld [vmem:[#allocation5 + $0x98] sm:$0xff]  ;;  %v1477_v52 = vld [vmem:[#allocation8 + $0x1018] sm:$0xff] }
 0x1d6   :  { %3322 = vmatprep.subr.bf16.mxu1 %v3321_v57  ;;  %v370_v57 = vld [vmem:[#allocation8 + $0x5b0] sm:$0xff]  ;;  %v3293_v41 = vpack.c.bf16 %v441_v59, %v433_v36  ;;  %v440_v45 = vld [vmem:[#allocation8 + $0x7e0] sm:$0xff]  ;;  %v1507_v36 = vld [vmem:[#allocation8 + $0x1108] sm:$0xff] }
 0x1d7   :  { %v1515_v59 = vld [vmem:[#allocation8 + $0x1148] sm:$0xff] }
 0x1d8   :  { %3260 = vmatpush1.bf16.msra.mxu0 %v3259_v2  ;;  %v395_v2 = vld [vmem:[#allocation8 + $0x678] sm:$0xff] }
 0x1d9   :  { %3324 = vmatpush1.bf16.msra.mxu1 %v3323_v3  ;;  %3262 = vmatprep.subr.bf16.mxu0 %v3261_v6  ;;  %v3279_v3 = vpack.c.bf16 %v376_v56, %v368_v55  ;;  %v3343_v6 = vpack.c.bf16 %v378_v60, %v370_v57  ;;  %v3345_v11 = vpack.c.bf16 %v395_v2, %v387_v1  ;;  %v1374_v56 = vld [vmem:[#allocation5 + $0x80] sm:$0xff]  ;;  %v1376_v57 = vld [vmem:[#allocation5 + $0x90] sm:$0xff]  ;;  %v1381_v60 = vld [vmem:[#allocation5 + $0xb8] sm:$0xff] }
 0x1da   :  { %3326 = vmatprep.subr.bf16.mxu1 %v3325_v10  ;;  %v386_v10 = vld [vmem:[#allocation8 + $0x630] sm:$0xff]  ;;  %v3361_v55 = vpack.c.bf16 %v1377_v61, %v1375_v51  ;;  %v3363_v2 = vpack.c.bf16 %v1376_v57, %v1374_v56  ;;  %v1523_v51 = vld [vmem:[#allocation8 + $0x1188] sm:$0xff]  ;;  %v1557_v56 = vld [vmem:[#allocation8 + $0x1298] sm:$0xff] }
 0x1db   :  { %v1484_v1 = vld [vmem:[#allocation8 + $0x1050] sm:$0xff]  ;;  %v1531_v61 = vld [vmem:[#allocation8 + $0x11c8] sm:$0xff]  ;;  %v1565_v57 = vld [vmem:[#allocation8 + $0x12d8] sm:$0xff] }
 0x1dc   :  { %3264 = vmatpush1.bf16.msra.mxu0 %v3263_v16  ;;  %v411_v16 = vld [vmem:[#allocation8 + $0x6f8] sm:$0xff]  ;;  %v3435_v13 = vpack.c.bf16 %v1484_v1, %v1476_v63  ;;  %v1539_v63 = vld [vmem:[#allocation8 + $0x1208] sm:$0xff] }
 0x1dd   :  { %3328 = vmatpush1.bf16.msra.mxu1 %v3327_v17  ;;  %3266 = vmatprep.subr.bf16.mxu0 %v3265_v38  ;;  %v3283_v17 = vpack.c.bf16 %v392_v9, %v384_v8  ;;  %v3347_v38 = vpack.c.bf16 %v394_v12, %v386_v10  ;;  %v3349_v22 = vpack.c.bf16 %v411_v16, %v403_v15  ;;  %v1378_v8 = vld [vmem:[#allocation5 + $0xa0] sm:$0xff]  ;;  %v1380_v9 = vld [vmem:[#allocation5 + $0xb0] sm:$0xff]  ;;  %v1372_v10 = vld [vmem:[#allocation2 + $0x6] sm:$0x1] }
 0x1de   :  { %3330 = vmatprep.subr.bf16.mxu1 %v3329_v21  ;;  %v402_v21 = vld [vmem:[#allocation8 + $0x6b0] sm:$0xff]  ;;  %v1483_v12 = vld [vmem:[#allocation8 + $0x1048] sm:$0xff] }
 0x1df   :  { %v1492_v15 = vld [vmem:[#allocation8 + $0x1090] sm:$0xff]  ;;  %v1547_v1 = vld [vmem:[#allocation8 + $0x1248] sm:$0xff] }
 0x1e0   :  { %3268 = vmatpush1.bf16.msra.mxu0 %v3267_v27  ;;  %v427_v27 = vld [vmem:[#allocation8 + $0x778] sm:$0xff]  ;;  %v1500_v16 = vld [vmem:[#allocation8 + $0x10d0] sm:$0xff] }
 0x1e1   :  { %3332 = vmatpush1.bf16.msra.mxu1 %v3331_v28  ;;  %3270 = vmatprep.subr.bf16.mxu0 %v3269_v29  ;;  %v3287_v28 = vpack.c.bf16 %v408_v20, %v400_v19  ;;  %v3351_v29 = vpack.c.bf16 %v410_v23, %v402_v21  ;;  %v3353_v34 = vpack.c.bf16 %v427_v27, %v419_v26  ;;  %v1517_v19 = vld [vmem:[#allocation8 + $0x1158] sm:$0xff]  ;;  %v1371_v20 = vld [vmem:[#allocation2 + $0x2] sm:$0x1]  ;;  %v1482_v23 = vld [vmem:[#allocation8 + $0x1040] sm:$0xff] }
 0x1e2   :  { %3334 = vmatprep.subr.bf16.mxu1 %v3333_v33  ;;  %v418_v33 = vld [vmem:[#allocation8 + $0x730] sm:$0xff]  ;;  %v3439_v26 = vpack.c.bf16 %v1500_v16, %v1492_v15  ;;  %v1563_v15 = vld [vmem:[#allocation8 + $0x12c8] sm:$0xff] }
 0x1e4   :  { %3272 = vmatpush1.bf16.msra.mxu0 %v3271_v4  ;;  %v443_v4 = vld [vmem:[#allocation8 + $0x7f8] sm:$0xff] }
 0x1e5   :  { %3336 = vmatpush1.bf16.msra.mxu1 %v3335_v39  ;;  %3274 = vmatprep.subr.bf16.mxu0 %v3273_v40  ;;  %v3291_v39 = vpack.c.bf16 %v424_v32, %v416_v31  ;;  %v3355_v40 = vpack.c.bf16 %v426_v35, %v418_v33  ;;  %v3357_v49 = vpack.c.bf16 %v443_v4, %v435_v37  ;;  %v1525_v31 = vld [vmem:[#allocation8 + $0x1198] sm:$0xff]  ;;  %v1498_v35 = vld [vmem:[#allocation8 + $0x10c0] sm:$0xff] }
 0x1e6   :  { %3338 = vmatprep.subr.bf16.mxu1 %v3337_v47  ;;  %v434_v47 = vld [vmem:[#allocation8 + $0x7b0] sm:$0xff]  ;;  %v1533_v32 = vld [vmem:[#allocation8 + $0x11d8] sm:$0xff]  ;;  %v3373_v33 = vpack.c.bf16 %v1499_v25, %v1491_v24  ;;  %v1562_v24 = vld [vmem:[#allocation8 + $0x12c0] sm:$0xff] }
 0x1e7   :  { %v3445_v4 = vpack.c.bf16 %v1533_v32, %v1525_v31  ;;  %v1571_v25 = vld [vmem:[#allocation8 + $0x1308] sm:$0xff]  ;;  %v1605_v31 = vld [vmem:[#allocation8 + $0x1418] sm:$0xff] }
 0x1e8   :  { %3276 = vmatpush1.bf16.msra.mxu0 %v3275_v5  ;;  %v1485_v5 = vld [vmem:[#allocation8 + $0x1058] sm:$0xff] }
 0x1e9   :  { %3340 = vmatpush1.bf16.msra.mxu1 %v3339_v53  ;;  %3278 = vmatprep.subr.bf16.mxu0 %v3277_v54  ;;  %v3295_v53 = vpack.c.bf16 %v440_v45, %v432_v42  ;;  %v3359_v54 = vpack.c.bf16 %v442_v50, %v434_v47  ;;  %v3433_v62 = vpack.c.bf16 %v1485_v5, %v1477_v52  ;;  %v1541_v42 = vld [vmem:[#allocation8 + $0x1218] sm:$0xff]  ;;  %v1514_v50 = vld [vmem:[#allocation8 + $0x1140] sm:$0xff] }
 0x1ea   :  { %3342 = vmatprep.subr.bf16.mxu1 %v3341_v58  ;;  %v1379_v58 = vld [vmem:[#allocation5 + $0xa8] sm:$0xff]  ;;  %v1549_v45 = vld [vmem:[#allocation8 + $0x1258] sm:$0xff]  ;;  %v3377_v47 = vpack.c.bf16 %v1515_v59, %v1507_v36  ;;  %v1587_v36 = vld [vmem:[#allocation8 + $0x1388] sm:$0xff] }
 0x1eb   :  { %v3449_v5 = vpack.c.bf16 %v1549_v45, %v1541_v42  ;;  %v1613_v32 = vld [vmem:[#allocation8 + $0x1458] sm:$0xff]  ;;  %v1595_v59 = vld [vmem:[#allocation8 + $0x13c8] sm:$0xff] }
 0x1ec   :  { %3280 = vmatpush1.bf16.msra.mxu0 %v3279_v3  ;;  %v1493_v3 = vld [vmem:[#allocation8 + $0x1098] sm:$0xff] }
 0x1ed   :  { %3344 = vmatpush1.bf16.msra.mxu1 %v3343_v6  ;;  %3282 = vmatprep.subr.bf16.mxu0 %v3281_v7  ;;  %v1501_v6 = vld [vmem:[#allocation8 + $0x10d8] sm:$0xff]  ;;  %v3365_v7 = vpack.c.bf16 %v1381_v60, %v1379_v58  ;;  %v3381_v58 = vpack.c.bf16 %v1531_v61, %v1523_v51  ;;  %v1522_v60 = vld [vmem:[#allocation8 + $0x1180] sm:$0xff]  ;;  %v1603_v51 = vld [vmem:[#allocation8 + $0x1408] sm:$0xff] }
 0x1ee   :  { %3346 = vmatprep.subr.bf16.mxu1 %v3345_v11  ;;  %v1475_v11 = vld [vmem:[#allocation8 + $0x1008] sm:$0xff]  ;;  %v3437_v14 = vpack.c.bf16 %v1501_v6, %v1493_v3  ;;  %v3453_v3 = vpack.c.bf16 %v1565_v57, %v1557_v56  ;;  %v1556_v6 = vld [vmem:[#allocation8 + $0x1290] sm:$0xff]  ;;  %v1621_v42 = vld [vmem:[#allocation8 + $0x1498] sm:$0xff] }
 0x1ef   :  { %v3369_v21 = vpack.c.bf16 %v1483_v12, %v1475_v11  ;;  %v3385_v11 = vpack.c.bf16 %v1547_v1, %v1539_v63  ;;  %v1538_v12 = vld [vmem:[#allocation8 + $0x1200] sm:$0xff]  ;;  %v1629_v45 = vld [vmem:[#allocation8 + $0x14d8] sm:$0xff]  ;;  %v1611_v61 = vld [vmem:[#allocation8 + $0x1448] sm:$0xff] }
 0x1f0   :  { %3284 = vmatpush1.bf16.msra.mxu0 %v3283_v17  ;;  %v3367_v17 = vpack.c.bf16 %v1380_v9, %v1378_v8  ;;  %v1573_v9 = vld [vmem:[#allocation8 + $0x1318] sm:$0xff]  ;;  %v1619_v63 = vld [vmem:[#allocation8 + $0x1488] sm:$0xff] }
 0x1f1   :  { %3348 = vmatpush1.bf16.msra.mxu1 %v3347_v38  ;;  %3286 = vmatprep.subr.bf16.mxu0 %v3285_v18  ;;  %v1397_v38 = vrot.slane %v1372_v10, 7  ;;  %v1509_v18 = vld [vmem:[#allocation8 + $0x1118] sm:$0xff]  ;;  %v1627_v1 = vld [vmem:[#allocation8 + $0x14c8] sm:$0xff] }
 0x1f2   :  { %3350 = vmatprep.subr.bf16.mxu1 %v3349_v22  ;;  %v1474_v22 = vld [vmem:[#allocation8 + $0x1000] sm:$0xff]  ;;  %v3441_v27 = vpack.c.bf16 %v1517_v19, %v1509_v18  ;;  %v1581_v10 = vld [vmem:[#allocation8 + $0x1358] sm:$0xff]  ;;  %v1580_v18 = vld [vmem:[#allocation8 + $0x1350] sm:$0xff] }
 0x1f3   :  { %v1637_v56 = vld [vmem:[#allocation8 + $0x1518] sm:$0xff] }
 0x1f4   :  { %3288 = vmatpush1.bf16.msra.mxu0 %v3287_v28  ;;  %v1508_v28 = vld [vmem:[#allocation8 + $0x1110] sm:$0xff]  ;;  %v1645_v57 = vld [vmem:[#allocation8 + $0x1558] sm:$0xff] }
 0x1f5   :  { %3352 = vmatpush1.bf16.msra.mxu1 %v3351_v29  ;;  %3290 = vmatprep.subr.bf16.mxu0 %v3289_v30  ;;  %v1398_v29 = vsel %vm110_vm0, %v1397_v38, %v1371_v20  ;;  %v3371_v30 = vpack.c.bf16 %v1482_v23, %v1474_v22  ;;  %v1572_v38 = vld [vmem:[#allocation8 + $0x1310] sm:$0xff]  ;;  %v1589_v20 = vld [vmem:[#allocation8 + $0x1398] sm:$0xff]  ;;  %v1554_v23 = vld [vmem:[#allocation8 + $0x1280] sm:$0xff] }
 0x1f6   :  { %3354 = vmatprep.subr.bf16.mxu1 %v3353_v34  ;;  %v1490_v34 = vld [vmem:[#allocation8 + $0x1080] sm:$0xff] }
 0x1f8   :  { %3292 = vmatpush1.bf16.msra.mxu0 %v3291_v39  ;;  %v1524_v39 = vld [vmem:[#allocation8 + $0x1190] sm:$0xff] }
 0x1f9   :  { %3356 = vmatpush1.bf16.msra.mxu1 %v3355_v40  ;;  %3294 = vmatprep.subr.bf16.mxu0 %v3293_v41  ;;  %v1532_v40 = vld [vmem:[#allocation8 + $0x11d0] sm:$0xff]  ;;  %v3375_v41 = vpack.c.bf16 %v1498_v35, %v1490_v34  ;;  %v1570_v34 = vld [vmem:[#allocation8 + $0x1300] sm:$0xff] }
 0x1fa   :  { %3358 = vmatprep.subr.bf16.mxu1 %v3357_v49  ;;  %v1506_v49 = vld [vmem:[#allocation8 + $0x1100] sm:$0xff]  ;;  %v3447_v52 = vpack.c.bf16 %v1532_v40, %v1524_v39  ;;  %v1604_v39 = vld [vmem:[#allocation8 + $0x1410] sm:$0xff] }
 0x1fb   :  { %v1578_v35 = vld [vmem:[#allocation8 + $0x1340] sm:$0xff]  ;;  %v1612_v40 = vld [vmem:[#allocation8 + $0x1450] sm:$0xff] }
 0x1fc   :  { %3296 = vmatpush1.bf16.msra.mxu0 %v3295_v53  ;;  %v1540_v53 = vld [vmem:[#allocation8 + $0x1210] sm:$0xff] }
 0x1fd   :  { %3360 = vmatpush1.bf16.msra.mxu1 %v3359_v54  ;;  %3362 = vmatprep.subr.bf16.mxu0 %v3361_v55  ;;  %v1548_v54 = vld [vmem:[#allocation8 + $0x1250] sm:$0xff]  ;;  %v3379_v55 = vpack.c.bf16 %v1514_v50, %v1506_v49  ;;  %v1586_v49 = vld [vmem:[#allocation8 + $0x1380] sm:$0xff] }
 0x1fe   :  { %3434 = vmatprep.subr.bf16.mxu1 %v3433_v62  ;;  %v1530_v62 = vld [vmem:[#allocation8 + $0x11c0] sm:$0xff] }
 0x1ff   :  { %1294 = vmatmul.mubr.f32.vlgmr.msra.gmra.mrb[4].mxu0 %v4211_v48  ;;  %v3383_v8 = vpack.c.bf16 %v1530_v62, %v1522_v60  ;;  %v1594_v50 = vld [vmem:[#allocation8 + $0x13c0] sm:$0xff] }
 0x200   :  { %1365 = vmatmul.mubr.f32.vlgmr.msra.gmra.mrb[4].mxu1 %v4211_v48  ;;  %3364 = vmatpush1.bf16.msra.mxu0 %v3363_v2  ;;  %v1516_v48 = vld [vmem:[#allocation8 + $0x1150] sm:$0xff]  ;;  %v3451_v2 = vpack.c.bf16 %v1548_v54, %v1540_v53  ;;  %v1602_v60 = vld [vmem:[#allocation8 + $0x1400] sm:$0xff] }
 0x201   :  { %3366 = vmatprep.subr.bf16.mxu0 %v3365_v7  ;;  %1465 = vmatprep.mubr.f32.mxu0 %v4080_v0  ;;  %v3443_v37 = vpack.c.bf16 %v1516_v48, %v1508_v28  ;;  %v1564_v7 = vld [vmem:[#allocation8 + $0x12d0] sm:$0xff]  ;;  %v1610_v62 = vld [vmem:[#allocation8 + $0x1440] sm:$0xff] }
 0x202   :  { %3436 = vmatpush1.bf16.msra.mxu1 %v3435_v13  ;;  %v1546_v13 = vld [vmem:[#allocation8 + $0x1240] sm:$0xff]  ;;  %v3455_v16 = vpack.c.bf16 %v1564_v7, %v1556_v6  ;;  %v1588_v48 = vld [vmem:[#allocation8 + $0x1390] sm:$0xff] }
 0x203   :  { %3438 = vmatprep.subr.bf16.mxu1 %v3437_v14  ;;  %v1555_v14 = vld [vmem:[#allocation8 + $0x1288] sm:$0xff]  ;;  %v3387_v19 = vpack.c.bf16 %v1546_v13, %v1538_v12  ;;  %v1620_v53 = vld [vmem:[#allocation8 + $0x1490] sm:$0xff]  ;;  %v1618_v12 = vld [vmem:[#allocation8 + $0x1480] sm:$0xff] }
 0x204   :  { %3368 = vmatpush1.bf16.msra.mxu0 %v3367_v17  ;;  %v3457_v17 = vpack.c.bf16 %v1581_v10, %v1573_v9  ;;  %v3389_v22 = vpack.c.bf16 %v1563_v15, %v1555_v14  ;;  %v1628_v54 = vld [vmem:[#allocation8 + $0x14d0] sm:$0xff]  ;;  %v1653_v9 = vld [vmem:[#allocation8 + $0x1598] sm:$0xff]  ;;  %v1626_v13 = vld [vmem:[#allocation8 + $0x14c0] sm:$0xff] }
 0x205   :  { %3370 = vmatprep.subr.bf16.mxu0 %v3369_v21  ;;  %v1597_v21 = vld [vmem:[#allocation8 + $0x13d8] sm:$0xff]  ;;  %v1636_v6 = vld [vmem:[#allocation8 + $0x1510] sm:$0xff]  ;;  %v1635_v14 = vld [vmem:[#allocation8 + $0x1508] sm:$0xff] }
 0x206   :  { %3440 = vmatpush1.bf16.msra.mxu1 %v3439_v26  ;;  %v1579_v26 = vld [vmem:[#allocation8 + $0x1348] sm:$0xff]  ;;  %v3461_v28 = vpack.c.bf16 %v1597_v21, %v1589_v20  ;;  %v1644_v7 = vld [vmem:[#allocation8 + $0x1550] sm:$0xff]  ;;  %v1661_v10 = vld [vmem:[#allocation8 + $0x15d8] sm:$0xff] }
 0x207   :  { %2831 = vmatmul.mubr.msk.f32.vlgmr.msra.gmra.mrb[6].mxu0 %vm112_vm1, %v1398_v29  ;;  %3442 = vmatprep.subr.bf16.mxu1 %v3441_v27  ;;  %v3459_v27 = vpack.c.bf16 %v1580_v18, %v1572_v38  ;;  %v1596_v29 = vld [vmem:[#allocation8 + $0x13d0] sm:$0xff]  ;;  %v1643_v15 = vld [vmem:[#allocation8 + $0x1548] sm:$0xff]  ;;  %v1669_v20 = vld [vmem:[#allocation8 + $0x1618] sm:$0xff] }
 0x208   :  { %3372 = vmatpush1.bf16.msra.mxu0 %v3371_v30  ;;  %v3391_v30 = vpack.c.bf16 %v1562_v24, %v1554_v23  ;;  %v1652_v38 = vld [vmem:[#allocation8 + $0x1590] sm:$0xff]  ;;  %v1677_v21 = vld [vmem:[#allocation8 + $0x1658] sm:$0xff]  ;;  %v1634_v23 = vld [vmem:[#allocation8 + $0x1500] sm:$0xff] }
 0x209   :  { %3374 = vmatprep.subr.bf16.mxu0 %v3373_v33  ;;  %v3393_v33 = vpack.c.bf16 %v1579_v26, %v1571_v25  ;;  %v1660_v18 = vld [vmem:[#allocation8 + $0x15d0] sm:$0xff]  ;;  %v1642_v24 = vld [vmem:[#allocation8 + $0x1540] sm:$0xff]  ;;  %v1651_v25 = vld [vmem:[#allocation8 + $0x1588] sm:$0xff] }
 0x20a   :  { %3444 = vmatpush1.bf16.msra.mxu1 %v3443_v37  ;;  %v3463_v37 = vpack.c.bf16 %v1596_v29, %v1588_v48  ;;  %v1659_v26 = vld [vmem:[#allocation8 + $0x15c8] sm:$0xff]  ;;  %v1668_v48 = vld [vmem:[#allocation8 + $0x1610] sm:$0xff] }
 0x20b   :  { %3446 = vmatprep.subr.bf16.mxu1 %v3445_v4  ;;  %v3465_v4 = vpack.c.bf16 %v1613_v32, %v1605_v31  ;;  %v1676_v29 = vld [vmem:[#allocation8 + $0x1650] sm:$0xff]  ;;  %v1685_v31 = vld [vmem:[#allocation8 + $0x1698] sm:$0xff] }
 0x20c   :  { %3376 = vmatpush1.bf16.msra.mxu0 %v3375_v41  ;;  %v3395_v41 = vpack.c.bf16 %v1578_v35, %v1570_v34  ;;  %v1693_v32 = vld [vmem:[#allocation8 + $0x16d8] sm:$0xff]  ;;  %v1650_v34 = vld [vmem:[#allocation8 + $0x1580] sm:$0xff] }
 0x20d   :  { %3378 = vmatprep.subr.bf16.mxu0 %v3377_v47  ;;  %v3397_v47 = vpack.c.bf16 %v1595_v59, %v1587_v36  ;;  %v1658_v35 = vld [vmem:[#allocation8 + $0x15c0] sm:$0xff]  ;;  %v1667_v36 = vld [vmem:[#allocation8 + $0x1608] sm:$0xff] }
 0x20e   :  { %3448 = vmatpush1.bf16.msra.mxu1 %v3447_v52  ;;  %v3467_v52 = vpack.c.bf16 %v1612_v40, %v1604_v39  ;;  %v1675_v59 = vld [vmem:[#allocation8 + $0x1648] sm:$0xff]  ;;  %v1684_v39 = vld [vmem:[#allocation8 + $0x1690] sm:$0xff] }
 0x20f   :  { %3450 = vmatprep.subr.bf16.mxu1 %v3449_v5  ;;  %v3469_v5 = vpack.c.bf16 %v1629_v45, %v1621_v42  ;;  %v1692_v40 = vld [vmem:[#allocation8 + $0x16d0] sm:$0xff]  ;;  %v1701_v42 = vld [vmem:[#allocation8 + $0x1718] sm:$0xff] }
 0x210   :  { %3380 = vmatpush1.bf16.msra.mxu0 %v3379_v55  ;;  %v3399_v55 = vpack.c.bf16 %v1594_v50, %v1586_v49  ;;  %v1709_v45 = vld [vmem:[#allocation8 + $0x1758] sm:$0xff]  ;;  %v1666_v49 = vld [vmem:[#allocation8 + $0x1600] sm:$0xff] }
 0x211   :  { %3382 = vmatprep.subr.bf16.mxu0 %v3381_v58  ;;  %v3401_v58 = vpack.c.bf16 %v1611_v61, %v1603_v51  ;;  %v1674_v50 = vld [vmem:[#allocation8 + $0x1640] sm:$0xff]  ;;  %v1683_v51 = vld [vmem:[#allocation8 + $0x1688] sm:$0xff] }
 0x212   :  { %3452 = vmatpush1.bf16.msra.mxu1 %v3451_v2  ;;  %v3471_v2 = vpack.c.bf16 %v1628_v54, %v1620_v53  ;;  %v1691_v61 = vld [vmem:[#allocation8 + $0x16c8] sm:$0xff]  ;;  %v1700_v53 = vld [vmem:[#allocation8 + $0x1710] sm:$0xff] }
 0x213   :  { %3454 = vmatprep.subr.bf16.mxu1 %v3453_v3  ;;  %v3473_v3 = vpack.c.bf16 %v1645_v57, %v1637_v56  ;;  %v1708_v54 = vld [vmem:[#allocation8 + $0x1750] sm:$0xff]  ;;  %v3421_v56 = vpack.c.bf16 %v1691_v61, %v1683_v51  ;;  %v1682_v57 = vld [vmem:[#allocation8 + $0x1680] sm:$0xff] }
 0x214   :  { %3384 = vmatpush1.bf16.msra.mxu0 %v3383_v8  ;;  %v3403_v8 = vpack.c.bf16 %v1610_v62, %v1602_v60  ;;  %v1699_v60 = vld [vmem:[#allocation8 + $0x1708] sm:$0xff] }
 0x215   :  { %3386 = vmatprep.subr.bf16.mxu0 %v3385_v11  ;;  %v3405_v11 = vpack.c.bf16 %v1627_v1, %v1619_v63  ;;  %v1707_v62 = vld [vmem:[#allocation8 + $0x1748] sm:$0xff]  ;;  %v3491_v63 = vpack.c.bf16 %v1708_v54, %v1700_v53  ;;  %v1521_v53 = vld [vmem:[#allocation8 + $0x1178] sm:$0xff] }
 0x216   :  { %3456 = vmatpush1.bf16.msra.mxu1 %v3455_v16  ;;  %v3475_v16 = vpack.c.bf16 %v1644_v7, %v1636_v6  ;;  %v1706_v6 = vld [vmem:[#allocation8 + $0x1740] sm:$0xff] }
 0x217   :  { %3458 = vmatprep.subr.bf16.mxu1 %v3457_v17  ;;  %v3477_v17 = vpack.c.bf16 %v1661_v10, %v1653_v9  ;;  %v1723_v9 = vld [vmem:[#allocation8 + $0x17c8] sm:$0xff]  ;;  %v1717_v10 = vld [vmem:[#allocation8 + $0x1798] sm:$0xff] }
 0x218   :  { %3388 = vmatpush1.bf16.msra.mxu0 %v3387_v19  ;;  %v3407_v19 = vpack.c.bf16 %v1626_v13, %v1618_v12  ;;  %v1725_v12 = vld [vmem:[#allocation8 + $0x17d8] sm:$0xff]  ;;  %v1714_v13 = vld [vmem:[#allocation8 + $0x1780] sm:$0xff] }
 0x219   :  { %3390 = vmatprep.subr.bf16.mxu0 %v3389_v22  ;;  %v3409_v22 = vpack.c.bf16 %v1643_v15, %v1635_v14  ;;  %v1722_v14 = vld [vmem:[#allocation8 + $0x17c0] sm:$0xff]  ;;  %v3493_v15 = vpack.c.bf16 %v1725_v12, %v1717_v10 }
 0x21a   :  { %3460 = vmatpush1.bf16.msra.mxu1 %v3459_v27  ;;  %v3479_v27 = vpack.c.bf16 %v1660_v18, %v1652_v38  ;;  %v1724_v38 = vld [vmem:[#allocation8 + $0x17d0] sm:$0xff]  ;;  %v1534_v10 = vld [vmem:[#allocation8 + $0x11e0] sm:$0xff] }
 0x21b   :  { %3462 = vmatprep.subr.bf16.mxu1 %v3461_v28  ;;  %v3481_v28 = vpack.c.bf16 %v1677_v21, %v1669_v20  ;;  %v1487_v20 = vld [vmem:[#allocation8 + $0x1068] sm:$0xff]  ;;  %v1481_v21 = vld [vmem:[#allocation8 + $0x1038] sm:$0xff] }
 0x21c   :  { %3392 = vmatpush1.bf16.msra.mxu0 %v3391_v30  ;;  %v3411_v30 = vpack.c.bf16 %v1642_v24, %v1634_v23  ;;  %v1489_v23 = vld [vmem:[#allocation8 + $0x1078] sm:$0xff] }
 0x21d   :  { %3394 = vmatprep.subr.bf16.mxu0 %v3393_v33  ;;  %v3413_v33 = vpack.c.bf16 %v1659_v26, %v1651_v25  ;;  %v3561_v24 = vpack.c.bf16 %v1489_v23, %v1481_v21  ;;  %v1383_v25 = vld [vmem:[#allocation7 + $0x2] ss:$4 sm:$0x3]  ;;  %v1550_v21 = vld [vmem:[#allocation8 + $0x1260] sm:$0xff] }
 0x21e   :  { %3464 = vmatpush1.bf16.msra.mxu1 %v3463_v37  ;;  %v3483_v37 = vpack.c.bf16 %v1676_v29, %v1668_v48  ;;  %v1388_v26 = vrot.slane %v1383_v25, %v4182_v44  ;;  %v1478_v48 = vld [vmem:[#allocation8 + $0x1020] sm:$0xff] }
 0x21f   :  { %3466 = vmatprep.subr.bf16.mxu1 %v3465_v4  ;;  %v3485_v4 = vpack.c.bf16 %v1693_v32, %v1685_v31  ;;  %v1486_v31 = vld [vmem:[#allocation8 + $0x1060] sm:$0xff]  ;;  %v1480_v32 = vld [vmem:[#allocation8 + $0x1030] sm:$0xff] }
 0x220   :  { %3396 = vmatpush1.bf16.msra.mxu0 %v3395_v41  ;;  %v3415_v41 = vpack.c.bf16 %v1658_v35, %v1650_v34  ;;  %v1495_v35 = vld [vmem:[#allocation8 + $0x10a8] sm:$0xff] }
 0x221   :  { %3398 = vmatprep.subr.bf16.mxu0 %v3397_v47  ;;  %v3417_v47 = vpack.c.bf16 %v1675_v59, %v1667_v36  ;;  %v1503_v36 = vld [vmem:[#allocation8 + $0x10e8] sm:$0xff]  ;;  %v1497_v59 = vld [vmem:[#allocation8 + $0x10b8] sm:$0xff] }
 0x222   :  { %3468 = vmatpush1.bf16.msra.mxu1 %v3467_v52  ;;  %v3487_v52 = vpack.c.bf16 %v1692_v40, %v1684_v39  ;;  %v3499_v39 = vpack.c.bf16 %v1486_v31, %v1478_v48  ;;  %v3501_v51 = vpack.c.bf16 %v1503_v36, %v1495_v35  ;;  %v1569_v48 = vld [vmem:[#allocation8 + $0x12f8] sm:$0xff]  ;;  %v1558_v31 = vld [vmem:[#allocation8 + $0x12a0] sm:$0xff]  ;;  %v1560_v35 = vld [vmem:[#allocation8 + $0x12b0] sm:$0xff] }
 0x223   :  { %3470 = vmatprep.subr.bf16.mxu1 %v3469_v5  ;;  %v3489_v5 = vpack.c.bf16 %v1709_v45, %v1701_v42  ;;  %v1502_v42 = vld [vmem:[#allocation8 + $0x10e0] sm:$0xff]  ;;  %v1568_v36 = vld [vmem:[#allocation8 + $0x12f0] sm:$0xff] }
 0x224   :  { %3400 = vmatpush1.bf16.msra.mxu0 %v3399_v55  ;;  %v3419_v55 = vpack.c.bf16 %v1674_v50, %v1666_v49  ;;  %v1504_v49 = vld [vmem:[#allocation8 + $0x10f0] sm:$0xff]  ;;  %v1511_v50 = vld [vmem:[#allocation8 + $0x1128] sm:$0xff] }
 0x225   :  { %3402 = vmatprep.subr.bf16.mxu0 %v3401_v58  ;;  %v1690_v58 = vld [vmem:[#allocation8 + $0x16c0] sm:$0xff] }
 0x226   :  { %3472 = vmatpush1.bf16.msra.mxu1 %v3471_v2  ;;  %v3423_v1 = vpack.c.bf16 %v1690_v58, %v1682_v57  ;;  %v3425_v2 = vpack.c.bf16 %v1707_v62, %v1699_v60  ;;  %v1518_v57 = vld [vmem:[#allocation8 + $0x1160] sm:$0xff]  ;;  %v1512_v62 = vld [vmem:[#allocation8 + $0x1130] sm:$0xff] }
 0x227   :  { %3474 = vmatprep.subr.bf16.mxu1 %v3473_v3  ;;  %v1698_v3 = vld [vmem:[#allocation8 + $0x1700] sm:$0xff] }
 0x228   :  { %3404 = vmatpush1.bf16.msra.mxu0 %v3403_v8  ;;  %v3427_v7 = vpack.c.bf16 %v1706_v6, %v1698_v3  ;;  %v1715_v8 = vld [vmem:[#allocation8 + $0x1788] sm:$0xff]  ;;  %v1529_v3 = vld [vmem:[#allocation8 + $0x11b8] sm:$0xff] }
 0x229   :  { %3406 = vmatprep.subr.bf16.mxu0 %v3405_v11  ;;  %v3429_v11 = vpack.c.bf16 %v1723_v9, %v1715_v8  ;;  %v1537_v6 = vld [vmem:[#allocation8 + $0x11f8] sm:$0xff]  ;;  %v1526_v9 = vld [vmem:[#allocation8 + $0x11a0] sm:$0xff] }
 0x22a   :  { %3476 = vmatpush1.bf16.msra.mxu1 %v3475_v16  ;;  %v3431_v16 = vpack.c.bf16 %v1722_v14, %v1714_v13  ;;  %v3573_v12 = vpack.c.bf16 %v1537_v6, %v1529_v3  ;;  %v1528_v13 = vld [vmem:[#allocation8 + $0x11b0] sm:$0xff]  ;;  %v1615_v3 = vld [vmem:[#allocation8 + $0x1468] sm:$0xff]  ;;  %v1609_v6 = vld [vmem:[#allocation8 + $0x1438] sm:$0xff] }
 0x22b   :  { %3478 = vmatprep.subr.bf16.mxu1 %v3477_v17  ;;  %v1716_v17 = vld [vmem:[#allocation8 + $0x1790] sm:$0xff] }
 0x22c   :  { %3408 = vmatpush1.bf16.msra.mxu0 %v3407_v19  ;;  %v3495_v18 = vpack.c.bf16 %v1724_v38, %v1716_v17  ;;  %v1479_v19 = vld [vmem:[#allocation8 + $0x1028] sm:$0xff]  ;;  %v1536_v14 = vld [vmem:[#allocation8 + $0x11f0] sm:$0xff]  ;;  %v1545_v17 = vld [vmem:[#allocation8 + $0x1238] sm:$0xff] }
 0x22d   :  { %3410 = vmatprep.subr.bf16.mxu0 %v3409_v22  ;;  %v3497_v22 = vpack.c.bf16 %v1487_v20, %v1479_v19  ;;  %v1553_v38 = vld [vmem:[#allocation8 + $0x1278] sm:$0xff]  ;;  %v3575_v19 = vpack.c.bf16 %v1536_v14, %v1528_v13  ;;  %v1542_v20 = vld [vmem:[#allocation8 + $0x1220] sm:$0xff]  ;;  %v1608_v14 = vld [vmem:[#allocation8 + $0x1430] sm:$0xff] }
 0x22e   :  { %3480 = vmatpush1.bf16.msra.mxu1 %v3479_v27  ;;  %v1392_v27 = vrot.slane %v1383_v25, %v4185_v46  ;;  %v3577_v23 = vpack.c.bf16 %v1553_v38, %v1545_v17  ;;  %v1552_v25 = vld [vmem:[#allocation8 + $0x1270] sm:$0xff]  ;;  %v1631_v17 = vld [vmem:[#allocation8 + $0x14e8] sm:$0xff]  ;;  %v1625_v38 = vld [vmem:[#allocation8 + $0x14b8] sm:$0xff] }
 0x22f   :  { %3482 = vmatprep.subr.bf16.mxu1 %v3481_v28 }
 0x230   :  { %3412 = vmatpush1.bf16.msra.mxu0 %v3411_v30 }
 0x231   :  { %3414 = vmatprep.subr.bf16.mxu0 %v3413_v33  ;;  %v1488_v33 = vld [vmem:[#allocation8 + $0x1070] sm:$0xff] }
 0x232   :  { %3484 = vmatpush1.bf16.msra.mxu1 %v3483_v37  ;;  %v1505_v37 = vld [vmem:[#allocation8 + $0x10f8] sm:$0xff]  ;;  %v3563_v40 = vpack.c.bf16 %v1488_v33, %v1480_v32  ;;  %v1566_v32 = vld [vmem:[#allocation8 + $0x12e0] sm:$0xff] }
 0x233   :  { %3486 = vmatprep.subr.bf16.mxu1 %v3485_v4  ;;  %v3565_v61 = vpack.c.bf16 %v1505_v37, %v1497_v59  ;;  %v1575_v59 = vld [vmem:[#allocation8 + $0x1328] sm:$0xff] }
 0x234   :  { %3416 = vmatpush1.bf16.msra.mxu0 %v3415_v41  ;;  %v1494_v41 = vld [vmem:[#allocation8 + $0x10a0] sm:$0xff]  ;;  %v1583_v37 = vld [vmem:[#allocation8 + $0x1368] sm:$0xff] }
 0x235   :  { %3418 = vmatprep.subr.bf16.mxu0 %v3417_v47  ;;  %v1496_v47 = vld [vmem:[#allocation8 + $0x10b0] sm:$0xff]  ;;  %v3503_v54 = vpack.c.bf16 %v1502_v42, %v1494_v41  ;;  %v3583_v41 = vpack.c.bf16 %v1568_v36, %v1560_v35  ;;  %v1574_v42 = vld [vmem:[#allocation8 + $0x1320] sm:$0xff] }
 0x236   :  { %3488 = vmatpush1.bf16.msra.mxu1 %v3487_v52  ;;  %v1519_v52 = vld [vmem:[#allocation8 + $0x1168] sm:$0xff]  ;;  %v1640_v36 = vld [vmem:[#allocation8 + $0x1530] sm:$0xff] }
 0x237   :  { %3490 = vmatprep.subr.bf16.mxu1 %v3489_v5  ;;  %v1513_v5 = vld [vmem:[#allocation8 + $0x1138] sm:$0xff]  ;;  %v3505_v58 = vpack.c.bf16 %v1519_v52, %v1511_v50  ;;  %v1591_v52 = vld [vmem:[#allocation8 + $0x13a8] sm:$0xff] }
 0x238   :  { %3420 = vmatpush1.bf16.msra.mxu0 %v3419_v55  ;;  %v3567_v55 = vpack.c.bf16 %v1504_v49, %v1496_v47  ;;  %v3569_v60 = vpack.c.bf16 %v1521_v53, %v1513_v5  ;;  %v1582_v47 = vld [vmem:[#allocation8 + $0x1360] sm:$0xff]  ;;  %v3521_v49 = vpack.c.bf16 %v1583_v37, %v1575_v59  ;;  %v1599_v5 = vld [vmem:[#allocation8 + $0x13e8] sm:$0xff]  ;;  %v1593_v53 = vld [vmem:[#allocation8 + $0x13b8] sm:$0xff] }
 0x239   :  { %3422 = vmatprep.subr.bf16.mxu0 %v3421_v56  ;;  %v1510_v56 = vld [vmem:[#allocation8 + $0x1120] sm:$0xff]  ;;  %v1648_v59 = vld [vmem:[#allocation8 + $0x1570] sm:$0xff]  ;;  %v1655_v37 = vld [vmem:[#allocation8 + $0x15a8] sm:$0xff] }
 0x23a   :  { %3492 = vmatpush1.bf16.msra.mxu1 %v3491_v63  ;;  %v1520_v63 = vld [vmem:[#allocation8 + $0x1170] sm:$0xff] }
 0x23b   :  { %3494 = vmatprep.subr.bf16.mxu1 %v3493_v15  ;;  %v3571_v8 = vpack.c.bf16 %v1520_v63, %v1512_v62  ;;  %v1543_v15 = vld [vmem:[#allocation8 + $0x1228] sm:$0xff]  ;;  %v1592_v63 = vld [vmem:[#allocation8 + $0x13b0] sm:$0xff] }
 0x23c   :  { %3424 = vmatpush1.bf16.msra.mxu0 %v3423_v1  ;;  %v1527_v1 = vld [vmem:[#allocation8 + $0x11a8] sm:$0xff] }
 0x23d   :  { %3426 = vmatprep.subr.bf16.mxu0 %v3425_v2  ;;  %v1535_v2 = vld [vmem:[#allocation8 + $0x11e8] sm:$0xff] }
 0x23e   :  { %3496 = vmatpush1.bf16.msra.mxu1 %v3495_v18  ;;  %v3511_v18 = vpack.c.bf16 %v1534_v10, %v1526_v9  ;;  %v1606_v10 = vld [vmem:[#allocation8 + $0x1420] sm:$0xff] }
 0x23f   :  { %3562 = vmatprep.subr.bf16.mxu1 %v3561_v24  ;;  %v1544_v24 = vld [vmem:[#allocation8 + $0x1230] sm:$0xff] }
 0x240   :  { %3428 = vmatpush1.bf16.msra.mxu0 %v3427_v7  ;;  %v3507_v7 = vpack.c.bf16 %v1518_v57, %v1510_v56  ;;  %v1590_v57 = vld [vmem:[#allocation8 + $0x13a0] sm:$0xff] }
 0x241   :  { %3430 = vmatprep.subr.bf16.mxu0 %v3429_v11  ;;  %v3509_v11 = vpack.c.bf16 %v1535_v2, %v1527_v1  ;;  %v1600_v1 = vld [vmem:[#allocation8 + $0x13f0] sm:$0xff]  ;;  %v1607_v2 = vld [vmem:[#allocation8 + $0x1428] sm:$0xff] }
 0x242   :  { %v3591_v9 = vpack.c.bf16 %v1600_v1, %v1592_v63  ;;  %v1672_v1 = vld [vmem:[#allocation8 + $0x1630] sm:$0xff] }
 0x244   :  { %3432 = vmatpush1.bf16.msra.mxu0 %v3431_v16  ;;  %v1551_v16 = vld [vmem:[#allocation8 + $0x1268] sm:$0xff] }
 0x245   :  { %3498 = vmatprep.subr.bf16.mxu0 %v3497_v22  ;;  %v3513_v22 = vpack.c.bf16 %v1551_v16, %v1543_v15  ;;  %v1616_v15 = vld [vmem:[#allocation8 + $0x1470] sm:$0xff]  ;;  %v1623_v16 = vld [vmem:[#allocation8 + $0x14a8] sm:$0xff] }
 0x2da   :  { %v1467_v28 = vpop.f32.mrb[6].mxu0 }
 0x2db   :  { %v1468_v29 = vadd.f32 %v1467_v28, %v1388_v26  ;;  %v1469_v30 = vpop.f32.mrb[7].mxu0  ;;  %v1559_v26 = vld [vmem:[#allocation8 + $0x12a8] sm:$0xff]  ;;  %v1561_v28 = vld [vmem:[#allocation8 + $0x12b8] sm:$0xff] }
 0x2dc   :  { %v1470_v34 = vadd.f32 %v1469_v30, %v1392_v27  ;;  %v1567_v27 = vld [vmem:[#allocation8 + $0x12e8] sm:$0xff]  ;;  %v3579_v30 = vpack.c.bf16 %v1552_v25, %v1544_v24  ;;  %v1624_v25 = vld [vmem:[#allocation8 + $0x14b0] sm:$0xff] }
 0x2dd   :  { %v4224_v45 = vmax.f32 %v1468_v29, 0.0  ;;  %v3515_v29 = vpack.c.bf16 %v1550_v21, %v1542_v20  ;;  %v3517_v33 = vpack.c.bf16 %v1567_v27, %v1559_v26  ;;  %v3595_v20 = vpack.c.bf16 %v1616_v15, %v1608_v14  ;;  %v1622_v21 = vld [vmem:[#allocation8 + $0x14a0] sm:$0xff]  ;;  %v1632_v26 = vld [vmem:[#allocation8 + $0x14f0] sm:$0xff]  ;;  %v1639_v27 = vld [vmem:[#allocation8 + $0x1528] sm:$0xff] }
 0x2de   :  { %v1473_v4 = vmax.f32 %v1470_v34, 0.0  ;;  %v3581_v34 = vpack.c.bf16 %v1569_v48, %v1561_v28  ;;  %v1647_v28 = vld [vmem:[#allocation8 + $0x1568] sm:$0xff]  ;;  %v1641_v48 = vld [vmem:[#allocation8 + $0x1538] sm:$0xff]  ;;  %v1688_v15 = vld [vmem:[#allocation8 + $0x16b0] sm:$0xff] }
 0x2e0   :  { %1794 = vmatprep.mubr.f32.mxu0 %v1473_v4  ;;  %1865 = vmatprep.mubr.f32.mxu1 %v1473_v4 }
 0x2e1   :  { %1795 = vmatmul.mubr.f32.vlgmr.msra.gmra.mrb[2].mxu0 %v4224_v45  ;;  %1866 = vmatmul.mubr.f32.vlgmr.msra.gmra.mrb[2].mxu1 %v4224_v45 }
 0x2e2   :  { %3500 = vmatpush1.bf16.msra.mxu0 %v3499_v39  ;;  %3564 = vmatpush1.bf16.msra.mxu1 %v3563_v40  ;;  %v1585_v39 = vld [vmem:[#allocation8 + $0x1378] sm:$0xff]  ;;  %v3519_v40 = vpack.c.bf16 %v1566_v32, %v1558_v31  ;;  %v3599_v31 = vpack.c.bf16 %v1632_v26, %v1624_v25  ;;  %v1638_v32 = vld [vmem:[#allocation8 + $0x1520] sm:$0xff]  ;;  %v1704_v26 = vld [vmem:[#allocation8 + $0x1730] sm:$0xff] }
 0x2e3   :  { %1936 = vmatprep.mubr.f32.mxu0 %v1473_v4  ;;  %2007 = vmatprep.mubr.f32.mxu1 %v1473_v4  ;;  %v1577_v4 = vld [vmem:[#allocation8 + $0x1338] sm:$0xff] }
 0x2e4   :  { %3502 = vmatprep.subr.bf16.mxu0 %v3501_v51  ;;  %3566 = vmatprep.subr.bf16.mxu1 %v3565_v61  ;;  %v3585_v50 = vpack.c.bf16 %v1585_v39, %v1577_v4  ;;  %v1576_v51 = vld [vmem:[#allocation8 + $0x1330] sm:$0xff]  ;;  %v1663_v4 = vld [vmem:[#allocation8 + $0x15e8] sm:$0xff]  ;;  %v1657_v39 = vld [vmem:[#allocation8 + $0x15b8] sm:$0xff] }
 0x2e5   :  { %v1584_v61 = vld [vmem:[#allocation8 + $0x1370] sm:$0xff] }
 0x2e6   :  { %3504 = vmatpush1.bf16.msra.mxu0 %v3503_v54  ;;  %3568 = vmatpush1.bf16.msra.mxu1 %v3567_v55  ;;  %v1601_v54 = vld [vmem:[#allocation8 + $0x13f8] sm:$0xff]  ;;  %v3523_v55 = vpack.c.bf16 %v1582_v47, %v1574_v42  ;;  %v3587_v56 = vpack.c.bf16 %v1584_v61, %v1576_v51  ;;  %v3603_v42 = vpack.c.bf16 %v1648_v59, %v1640_v36  ;;  %v1654_v47 = vld [vmem:[#allocation8 + $0x15a0] sm:$0xff]  ;;  %v1656_v61 = vld [vmem:[#allocation8 + $0x15b0] sm:$0xff] }
 0x2e7   :  { %3506 = vmatprep.subr.bf16.mxu0 %v3505_v58  ;;  %3570 = vmatprep.subr.bf16.mxu1 %v3569_v60  ;;  %v1598_v58 = vld [vmem:[#allocation8 + $0x13e0] sm:$0xff]  ;;  %v3525_v60 = vpack.c.bf16 %v1599_v5, %v1591_v52  ;;  %v3589_v62 = vpack.c.bf16 %v1601_v54, %v1593_v53  ;;  %v1664_v52 = vld [vmem:[#allocation8 + $0x15f0] sm:$0xff]  ;;  %v1671_v5 = vld [vmem:[#allocation8 + $0x1628] sm:$0xff] }
 0x2e8   :  { %v1679_v53 = vld [vmem:[#allocation8 + $0x1668] sm:$0xff]  ;;  %v1673_v54 = vld [vmem:[#allocation8 + $0x1638] sm:$0xff]  ;;  %v1720_v59 = vld [vmem:[#allocation8 + $0x17b0] sm:$0xff] }
 0x2ea   :  { %3508 = vmatpush1.bf16.msra.mxu0 %v3507_v7  ;;  %3572 = vmatpush1.bf16.msra.mxu1 %v3571_v8  ;;  %v1617_v7 = vld [vmem:[#allocation8 + $0x1478] sm:$0xff]  ;;  %v3527_v8 = vpack.c.bf16 %v1598_v58, %v1590_v57  ;;  %v3607_v57 = vpack.c.bf16 %v1664_v52, %v1656_v61  ;;  %v1670_v58 = vld [vmem:[#allocation8 + $0x1620] sm:$0xff] }
 0x2eb   :  { %3510 = vmatprep.subr.bf16.mxu0 %v3509_v11  ;;  %3574 = vmatprep.subr.bf16.mxu1 %v3573_v12  ;;  %v1614_v11 = vld [vmem:[#allocation8 + $0x1460] sm:$0xff]  ;;  %v3529_v12 = vpack.c.bf16 %v1615_v3, %v1607_v2  ;;  %v3593_v13 = vpack.c.bf16 %v1617_v7, %v1609_v6  ;;  %v1680_v2 = vld [vmem:[#allocation8 + $0x1670] sm:$0xff]  ;;  %v1687_v3 = vld [vmem:[#allocation8 + $0x16a8] sm:$0xff] }
 0x2ec   :  { %v1695_v6 = vld [vmem:[#allocation8 + $0x16e8] sm:$0xff]  ;;  %v1689_v7 = vld [vmem:[#allocation8 + $0x16b8] sm:$0xff]  ;;  %v2030_v61 = vld [vmem:[#allocation5 + $0xe8] sm:$0xff] }
 0x2ee   :  { %3512 = vmatpush1.bf16.msra.mxu0 %v3511_v18  ;;  %3576 = vmatpush1.bf16.msra.mxu1 %v3575_v19  ;;  %v1633_v18 = vld [vmem:[#allocation8 + $0x14f8] sm:$0xff]  ;;  %v3531_v19 = vpack.c.bf16 %v1614_v11, %v1606_v10  ;;  %v3611_v10 = vpack.c.bf16 %v1680_v2, %v1672_v1  ;;  %v1686_v11 = vld [vmem:[#allocation8 + $0x16a0] sm:$0xff] }
 0x2ef   :  { %3514 = vmatprep.subr.bf16.mxu0 %v3513_v22  ;;  %3578 = vmatprep.subr.bf16.mxu1 %v3577_v23  ;;  %v1630_v22 = vld [vmem:[#allocation8 + $0x14e0] sm:$0xff]  ;;  %v3533_v23 = vpack.c.bf16 %v1631_v17, %v1623_v16  ;;  %v3597_v24 = vpack.c.bf16 %v1633_v18, %v1625_v38  ;;  %v1696_v16 = vld [vmem:[#allocation8 + $0x16f0] sm:$0xff]  ;;  %v1703_v17 = vld [vmem:[#allocation8 + $0x1728] sm:$0xff] }
 0x2f0   :  { %v1711_v38 = vld [vmem:[#allocation8 + $0x1768] sm:$0xff]  ;;  %v1705_v18 = vld [vmem:[#allocation8 + $0x1738] sm:$0xff] }
 0x2f1   :  { %v2128_v1 = vld [vmem:[#allocation8 + $0x1818] sm:$0xff] }
 0x2f2   :  { %3516 = vmatpush1.bf16.msra.mxu0 %v3515_v29  ;;  %3580 = vmatpush1.bf16.msra.mxu1 %v3579_v30  ;;  %v1649_v29 = vld [vmem:[#allocation8 + $0x1578] sm:$0xff]  ;;  %v3535_v30 = vpack.c.bf16 %v1630_v22, %v1622_v21  ;;  %v3615_v21 = vpack.c.bf16 %v1696_v16, %v1688_v15  ;;  %v1702_v22 = vld [vmem:[#allocation8 + $0x1720] sm:$0xff]  ;;  %v2127_v15 = vld [vmem:[#allocation8 + $0x1810] sm:$0xff] }
 0x2f3   :  { %3518 = vmatprep.subr.bf16.mxu0 %v3517_v33  ;;  %3582 = vmatprep.subr.bf16.mxu1 %v3581_v34  ;;  %v1646_v33 = vld [vmem:[#allocation8 + $0x1560] sm:$0xff]  ;;  %v3537_v34 = vpack.c.bf16 %v1647_v28, %v1639_v27  ;;  %v3601_v35 = vpack.c.bf16 %v1649_v29, %v1641_v48  ;;  %v1712_v27 = vld [vmem:[#allocation8 + $0x1770] sm:$0xff]  ;;  %v1719_v28 = vld [vmem:[#allocation8 + $0x17a8] sm:$0xff] }
 0x2f4   :  { %v1727_v48 = vld [vmem:[#allocation8 + $0x17e8] sm:$0xff]  ;;  %v1721_v29 = vld [vmem:[#allocation8 + $0x17b8] sm:$0xff]  ;;  %v2135_v16 = vld [vmem:[#allocation8 + $0x1850] sm:$0xff] }
 0x2f6   :  { %3520 = vmatpush1.bf16.msra.mxu0 %v3519_v40  ;;  %3584 = vmatpush1.bf16.msra.mxu1 %v3583_v41  ;;  %v1665_v40 = vld [vmem:[#allocation8 + $0x15f8] sm:$0xff]  ;;  %v3539_v41 = vpack.c.bf16 %v1646_v33, %v1638_v32  ;;  %v3619_v32 = vpack.c.bf16 %v1712_v27, %v1704_v26  ;;  %v1718_v33 = vld [vmem:[#allocation8 + $0x17a0] sm:$0xff]  ;;  %v2151_v26 = vld [vmem:[#allocation8 + $0x18d0] sm:$0xff] }
 0x2f7   :  { %3522 = vmatprep.subr.bf16.mxu0 %v3521_v49  ;;  %3586 = vmatprep.subr.bf16.mxu1 %v3585_v50  ;;  %v1662_v49 = vld [vmem:[#allocation8 + $0x15e0] sm:$0xff]  ;;  %v3541_v50 = vpack.c.bf16 %v1663_v4, %v1655_v37  ;;  %v3605_v51 = vpack.c.bf16 %v1665_v40, %v1657_v39  ;;  %v1728_v37 = vld [vmem:[#allocation8 + $0x17f0] sm:$0xff]  ;;  %v2126_v40 = vld [vmem:[#allocation8 + $0x1808] sm:$0xff] }
 0x2f8   :  { %v2026_v4 = vld [vmem:[#allocation5 + $0xc8] sm:$0xff]  ;;  %v2028_v39 = vld [vmem:[#allocation5 + $0xd8] sm:$0xff]  ;;  %v2160_v27 = vld [vmem:[#allocation8 + $0x1918] sm:$0xff] }
 0x2fa   :  { %3524 = vmatpush1.bf16.msra.mxu0 %v3523_v55  ;;  %3588 = vmatpush1.bf16.msra.mxu1 %v3587_v56  ;;  %v1681_v55 = vld [vmem:[#allocation8 + $0x1678] sm:$0xff]  ;;  %v3543_v56 = vpack.c.bf16 %v1662_v49, %v1654_v47  ;;  %v3623_v47 = vpack.c.bf16 %v1728_v37, %v1720_v59  ;;  %v3625_v49 = vpack.c.bf16 %v2028_v39, %v2026_v4  ;;  %v2167_v59 = vld [vmem:[#allocation8 + $0x1950] sm:$0xff] }
 0x2fb   :  { %3526 = vmatprep.subr.bf16.mxu0 %v3525_v60  ;;  %3590 = vmatprep.subr.bf16.mxu1 %v3589_v62  ;;  %v1678_v60 = vld [vmem:[#allocation8 + $0x1660] sm:$0xff]  ;;  %v3545_v62 = vpack.c.bf16 %v1679_v53, %v1671_v5  ;;  %v3609_v63 = vpack.c.bf16 %v1681_v55, %v1673_v54  ;;  %v2032_v5 = vld [vmem:[#allocation5 + $0xf8] sm:$0xff]  ;;  %v2142_v55 = vld [vmem:[#allocation8 + $0x1888] sm:$0xff] }
 0x2fc   :  { %v2125_v53 = vld [vmem:[#allocation8 + $0x1800] sm:$0xff]  ;;  %v2176_v37 = vld [vmem:[#allocation8 + $0x1998] sm:$0xff] }
 0x2fd   :  { %v2133_v54 = vld [vmem:[#allocation8 + $0x1840] sm:$0xff]  ;;  %v2184_v39 = vld [vmem:[#allocation8 + $0x19d8] sm:$0xff] }
 0x2fe   :  { %3528 = vmatpush1.bf16.msra.mxu0 %v3527_v8  ;;  %3592 = vmatpush1.bf16.msra.mxu1 %v3591_v9  ;;  %v1697_v8 = vld [vmem:[#allocation8 + $0x16f8] sm:$0xff]  ;;  %v3547_v9 = vpack.c.bf16 %v1678_v60, %v1670_v58  ;;  %v3629_v60 = vpack.c.bf16 %v2032_v5, %v2030_v61  ;;  %v3635_v2 = vpack.c.bf16 %v2133_v54, %v2125_v53  ;;  %v2175_v61 = vld [vmem:[#allocation8 + $0x1990] sm:$0xff] }
 0x2ff   :  { %3530 = vmatprep.subr.bf16.mxu0 %v3529_v12  ;;  %3594 = vmatprep.subr.bf16.mxu1 %v3593_v13  ;;  %v1694_v12 = vld [vmem:[#allocation8 + $0x16e0] sm:$0xff]  ;;  %v3549_v13 = vpack.c.bf16 %v1695_v6, %v1687_v3  ;;  %v3613_v14 = vpack.c.bf16 %v1697_v8, %v1689_v7  ;;  %v2029_v58 = vld [vmem:[#allocation5 + $0xe0] sm:$0xff] }
 0x300   :  { %v2136_v3 = vld [vmem:[#allocation8 + $0x1858] sm:$0xff]  ;;  %v2141_v7 = vld [vmem:[#allocation8 + $0x1880] sm:$0xff] }
 0x301   :  { %v2149_v8 = vld [vmem:[#allocation8 + $0x18c0] sm:$0xff]  ;;  %v2192_v5 = vld [vmem:[#allocation8 + $0x1a18] sm:$0xff] }
 0x302   :  { %3532 = vmatpush1.bf16.msra.mxu0 %v3531_v19  ;;  %3596 = vmatpush1.bf16.msra.mxu1 %v3595_v20  ;;  %v1713_v19 = vld [vmem:[#allocation8 + $0x1778] sm:$0xff]  ;;  %v3551_v20 = vpack.c.bf16 %v1694_v12, %v1686_v11  ;;  %v2022_v12 = vld [vmem:[#allocation2 + $0x3] sm:$0x1] }
 0x303   :  { %3534 = vmatprep.subr.bf16.mxu0 %v3533_v23  ;;  %3598 = vmatprep.subr.bf16.mxu1 %v3597_v24  ;;  %v1710_v23 = vld [vmem:[#allocation8 + $0x1760] sm:$0xff]  ;;  %v3553_v24 = vpack.c.bf16 %v1711_v38, %v1703_v17  ;;  %v3617_v25 = vpack.c.bf16 %v1713_v19, %v1705_v18  ;;  %v2144_v17 = vld [vmem:[#allocation8 + $0x1898] sm:$0xff]  ;;  %v3639_v38 = vpack.c.bf16 %v2149_v8, %v2141_v7 }
 0x304   :  { %v2152_v18 = vld [vmem:[#allocation8 + $0x18d8] sm:$0xff] }
 0x305   :  { %v2200_v54 = vld [vmem:[#allocation8 + $0x1a58] sm:$0xff] }
 0x306   :  { %3536 = vmatpush1.bf16.msra.mxu0 %v3535_v30  ;;  %3600 = vmatpush1.bf16.msra.mxu1 %v3599_v31  ;;  %v1729_v30 = vld [vmem:[#allocation8 + $0x17f8] sm:$0xff]  ;;  %v3555_v31 = vpack.c.bf16 %v1710_v23, %v1702_v22  ;;  %v2182_v22 = vld [vmem:[#allocation8 + $0x19c8] sm:$0xff] }
 0x307   :  { %3538 = vmatprep.subr.bf16.mxu0 %v3537_v34  ;;  %3602 = vmatprep.subr.bf16.mxu1 %v3601_v35  ;;  %v1726_v34 = vld [vmem:[#allocation8 + $0x17e0] sm:$0xff]  ;;  %v3557_v35 = vpack.c.bf16 %v1727_v48, %v1719_v28  ;;  %v3621_v36 = vpack.c.bf16 %v1729_v30, %v1721_v29  ;;  %v2168_v48 = vld [vmem:[#allocation8 + $0x1958] sm:$0xff] }
 0x308   :  { %v2173_v30 = vld [vmem:[#allocation8 + $0x1980] sm:$0xff]  ;;  %v2216_v7 = vld [vmem:[#allocation8 + $0x1ad8] sm:$0xff] }
 0x30a   :  { %3540 = vmatpush1.bf16.msra.mxu0 %v3539_v41  ;;  %3604 = vmatpush1.bf16.msra.mxu1 %v3603_v42  ;;  %v2134_v41 = vld [vmem:[#allocation8 + $0x1848] sm:$0xff]  ;;  %v3559_v42 = vpack.c.bf16 %v1726_v34, %v1718_v33 }
 0x30b   :  { %3542 = vmatprep.subr.bf16.mxu0 %v3541_v50  ;;  %3606 = vmatprep.subr.bf16.mxu1 %v3605_v51  ;;  %v2025_v50 = vld [vmem:[#allocation5 + $0xc0] sm:$0xff]  ;;  %v2027_v51 = vld [vmem:[#allocation5 + $0xd0] sm:$0xff]  ;;  %v3633_v52 = vpack.c.bf16 %v2134_v41, %v2126_v40  ;;  %v2189_v41 = vld [vmem:[#allocation8 + $0x1a00] sm:$0xff] }
 0x30c   :  { %v2198_v33 = vld [vmem:[#allocation8 + $0x1a48] sm:$0xff] }
 0x30e   :  { %3544 = vmatpush1.bf16.msra.mxu0 %v3543_v56  ;;  %3608 = vmatpush1.bf16.msra.mxu1 %v3607_v57  ;;  %v2150_v56 = vld [vmem:[#allocation8 + $0x18c8] sm:$0xff]  ;;  %v3627_v57 = vpack.c.bf16 %v2027_v51, %v2025_v50  ;;  %v3709_v51 = vpack.c.bf16 %v2184_v39, %v2176_v37 }
 0x30f   :  { %3546 = vmatprep.subr.bf16.mxu0 %v3545_v62  ;;  %3610 = vmatprep.subr.bf16.mxu1 %v3609_v63  ;;  %v2031_v62 = vld [vmem:[#allocation5 + $0xf0] sm:$0xff]  ;;  %v2023_v63 = vld [vmem:[#allocation2 + $0x7] sm:$0x1]  ;;  %v3637_v6 = vpack.c.bf16 %v2150_v56, %v2142_v55  ;;  %v2205_v56 = vld [vmem:[#allocation8 + $0x1a80] sm:$0xff] }
 0x310   :  { %v3631_v11 = vpack.c.bf16 %v2031_v62, %v2029_v58  ;;  %v2222_v58 = vld [vmem:[#allocation8 + $0x1b08] sm:$0xff] }
 0x312   :  { %3548 = vmatpush1.bf16.msra.mxu0 %v3547_v9  ;;  %3612 = vmatpush1.bf16.msra.mxu1 %v3611_v10  ;;  %v2158_v9 = vld [vmem:[#allocation8 + $0x1908] sm:$0xff] }
 0x313   :  { %3550 = vmatprep.subr.bf16.mxu0 %v3549_v13  ;;  %3614 = vmatprep.subr.bf16.mxu1 %v3613_v14  ;;  %v2166_v10 = vld [vmem:[#allocation8 + $0x1948] sm:$0xff]  ;;  %v2048_v13 = vrot.slane %v2023_v63, 7  ;;  %v3697_v14 = vpack.c.bf16 %v2136_v3, %v2128_v1  ;;  %v3713_v63 = vpack.c.bf16 %v2200_v54, %v2192_v5  ;;  %v2191_v1 = vld [vmem:[#allocation8 + $0x1a10] sm:$0xff]  ;;  %v2208_v3 = vld [vmem:[#allocation8 + $0x1a98] sm:$0xff] }
 0x314   :  { %v3641_v19 = vpack.c.bf16 %v2166_v10, %v2158_v9  ;;  %v2221_v9 = vld [vmem:[#allocation8 + $0x1b00] sm:$0xff] }
 0x315   :  { %v2049_v23 = vsel %vm110_vm0, %v2048_v13, %v2022_v12  ;;  %v2229_v10 = vld [vmem:[#allocation8 + $0x1b40] sm:$0xff]  ;;  %v2246_v12 = vld [vmem:[#allocation8 + $0x1bc8] sm:$0xff] }
 0x316   :  { %3552 = vmatpush1.bf16.msra.mxu0 %v3551_v20  ;;  %3616 = vmatpush1.bf16.msra.mxu1 %v3615_v21  ;;  %v2157_v20 = vld [vmem:[#allocation8 + $0x1900] sm:$0xff]  ;;  %v2174_v21 = vld [vmem:[#allocation8 + $0x1988] sm:$0xff] }
 0x317   :  { %3554 = vmatprep.subr.bf16.mxu0 %v3553_v24  ;;  %3618 = vmatprep.subr.bf16.mxu1 %v3617_v25  ;;  %v3701_v24 = vpack.c.bf16 %v2152_v18, %v2144_v17  ;;  %v2143_v25 = vld [vmem:[#allocation8 + $0x1890] sm:$0xff]  ;;  %v3645_v29 = vpack.c.bf16 %v2182_v22, %v2174_v21  ;;  %v2224_v17 = vld [vmem:[#allocation8 + $0x1b18] sm:$0xff]  ;;  %v2254_v21 = vld [vmem:[#allocation8 + $0x1c08] sm:$0xff] }
 0x318   :  { %v3703_v34 = vpack.c.bf16 %v2151_v26, %v2143_v25  ;;  %v2232_v18 = vld [vmem:[#allocation8 + $0x1b58] sm:$0xff]  ;;  %v2262_v22 = vld [vmem:[#allocation8 + $0x1c48] sm:$0xff]  ;;  %v2231_v25 = vld [vmem:[#allocation8 + $0x1b50] sm:$0xff] }
 0x319   :  { %v2240_v26 = vld [vmem:[#allocation8 + $0x1b98] sm:$0xff] }
 0x31a   :  { %3556 = vmatpush1.bf16.msra.mxu0 %v3555_v31  ;;  %3620 = vmatpush1.bf16.msra.mxu1 %v3619_v32  ;;  %v2181_v31 = vld [vmem:[#allocation8 + $0x19c0] sm:$0xff]  ;;  %v2190_v32 = vld [vmem:[#allocation8 + $0x1a08] sm:$0xff] }
 0x31b   :  { %3558 = vmatprep.subr.bf16.mxu0 %v3557_v35  ;;  %3622 = vmatprep.subr.bf16.mxu1 %v3621_v36  ;;  %v3705_v35 = vpack.c.bf16 %v2168_v48, %v2160_v27  ;;  %v2159_v36 = vld [vmem:[#allocation8 + $0x1910] sm:$0xff]  ;;  %v3647_v4 = vpack.c.bf16 %v2181_v31, %v2173_v30  ;;  %v3649_v40 = vpack.c.bf16 %v2198_v33, %v2190_v32  ;;  %v2261_v30 = vld [vmem:[#allocation8 + $0x1c40] sm:$0xff]  ;;  %v2270_v31 = vld [vmem:[#allocation8 + $0x1c88] sm:$0xff] }
 0x31c   :  { %v3707_v50 = vpack.c.bf16 %v2167_v59, %v2159_v36  ;;  %v3665_v48 = vpack.c.bf16 %v2262_v22, %v2254_v21  ;;  %v2278_v32 = vld [vmem:[#allocation8 + $0x1cc8] sm:$0xff]  ;;  %v2247_v36 = vld [vmem:[#allocation8 + $0x1bd0] sm:$0xff]  ;;  %v2256_v59 = vld [vmem:[#allocation8 + $0x1c18] sm:$0xff] }
 0x31d   :  { %v3669_v39 = vpack.c.bf16 %v2278_v32, %v2270_v31  ;;  %v2342_v21 = vld [vmem:[#allocation8 + $0x1ec8] sm:$0xff] }
 0x31e   :  { %3560 = vmatpush1.bf16.msra.mxu0 %v3559_v42  ;;  %3624 = vmatpush1.bf16.msra.mxu1 %v3623_v47  ;;  %v2197_v42 = vld [vmem:[#allocation8 + $0x1a40] sm:$0xff]  ;;  %v2206_v47 = vld [vmem:[#allocation8 + $0x1a88] sm:$0xff] }
 0x31f   :  { %3626 = vmatprep.subr.bf16.mxu1 %v3625_v49  ;;  %3634 = vmatprep.subr.bf16.mxu0 %v3633_v52  ;;  %v2214_v49 = vld [vmem:[#allocation8 + $0x1ac8] sm:$0xff]  ;;  %v2183_v52 = vld [vmem:[#allocation8 + $0x19d0] sm:$0xff]  ;;  %v3651_v53 = vpack.c.bf16 %v2197_v42, %v2189_v41  ;;  %v2277_v41 = vld [vmem:[#allocation8 + $0x1cc0] sm:$0xff] }
 0x320   :  { %v3653_v55 = vpack.c.bf16 %v2214_v49, %v2206_v47  ;;  %v3711_v62 = vpack.c.bf16 %v2183_v52, %v2175_v61  ;;  %v2286_v42 = vld [vmem:[#allocation8 + $0x1d08] sm:$0xff]  ;;  %v2263_v61 = vld [vmem:[#allocation8 + $0x1c50] sm:$0xff]  ;;  %v2272_v52 = vld [vmem:[#allocation8 + $0x1c98] sm:$0xff] }
 0x321   :  { %1937 = vmatmul.mubr.f32.vlgmr.msra.gmra.mrb[4].mxu0 %v4224_v45  ;;  %2008 = vmatmul.mubr.f32.vlgmr.msra.gmra.mrb[4].mxu1 %v4224_v45  ;;  %v2165_v45 = vld [vmem:[#allocation8 + $0x1940] sm:$0xff]  ;;  %v2294_v47 = vld [vmem:[#allocation8 + $0x1d48] sm:$0xff] }
 0x322   :  { %3628 = vmatpush1.bf16.msra.mxu1 %v3627_v57  ;;  %2116 = vmatprep.mubr.f32.mxu1 %v4080_v0  ;;  %v3699_v0 = vpack.c.bf16 %v2135_v16, %v2127_v15  ;;  %v3643_v28 = vpack.c.bf16 %v2165_v45, %v2157_v20  ;;  %v2213_v57 = vld [vmem:[#allocation8 + $0x1ac0] sm:$0xff]  ;;  %v2207_v15 = vld [vmem:[#allocation8 + $0x1a90] sm:$0xff]  ;;  %v3673_v54 = vpack.c.bf16 %v2294_v47, %v2286_v42  ;;  %v2358_v31 = vld [vmem:[#allocation8 + $0x1f48] sm:$0xff] }
 0x323   :  { %3630 = vmatprep.subr.bf16.mxu1 %v3629_v60  ;;  %3636 = vmatpush1.bf16.msra.mxu0 %v3635_v2  ;;  %v2230_v60 = vld [vmem:[#allocation8 + $0x1b48] sm:$0xff]  ;;  %v2199_v2 = vld [vmem:[#allocation8 + $0x1a50] sm:$0xff]  ;;  %v2237_v20 = vld [vmem:[#allocation8 + $0x1b80] sm:$0xff] }
 0x324   :  { %3638 = vmatprep.subr.bf16.mxu0 %v3637_v6  ;;  %v3655_v6 = vpack.c.bf16 %v2213_v57, %v2205_v56  ;;  %v3657_v8 = vpack.c.bf16 %v2230_v60, %v2222_v58  ;;  %v3715_v13 = vpack.c.bf16 %v2199_v2, %v2191_v1  ;;  %v2215_v16 = vld [vmem:[#allocation8 + $0x1ad0] sm:$0xff]  ;;  %v2245_v45 = vld [vmem:[#allocation8 + $0x1bc0] sm:$0xff]  ;;  %v2302_v57 = vld [vmem:[#allocation8 + $0x1d88] sm:$0xff] }
 0x325   :  { %v3663_v27 = vpack.c.bf16 %v2245_v45, %v2237_v20  ;;  %v2293_v56 = vld [vmem:[#allocation8 + $0x1d40] sm:$0xff]  ;;  %v2310_v58 = vld [vmem:[#allocation8 + $0x1dc8] sm:$0xff]  ;;  %v2279_v1 = vld [vmem:[#allocation8 + $0x1cd0] sm:$0xff] }
 0x326   :  { %3632 = vmatpush1.bf16.msra.mxu1 %v3631_v11  ;;  %v2238_v11 = vld [vmem:[#allocation8 + $0x1b88] sm:$0xff]  ;;  %v2288_v2 = vld [vmem:[#allocation8 + $0x1d18] sm:$0xff]  ;;  %v2325_v20 = vld [vmem:[#allocation8 + $0x1e40] sm:$0xff] }
 0x327   :  { %3698 = vmatprep.subr.bf16.mxu1 %v3697_v14  ;;  %3640 = vmatpush1.bf16.msra.mxu0 %v3639_v38  ;;  %v3717_v14 = vpack.c.bf16 %v2216_v7, %v2208_v3  ;;  %v3659_v38 = vpack.c.bf16 %v2229_v10, %v2221_v9  ;;  %v3677_v7 = vpack.c.bf16 %v2310_v58, %v2302_v57  ;;  %v2309_v9 = vld [vmem:[#allocation8 + $0x1dc0] sm:$0xff]  ;;  %v2318_v10 = vld [vmem:[#allocation8 + $0x1e08] sm:$0xff]  ;;  %v2335_v47 = vld [vmem:[#allocation8 + $0x1e90] sm:$0xff] }
 0x328   :  { %3642 = vmatprep.subr.bf16.mxu0 %v3641_v19  ;;  %v3661_v19 = vpack.c.bf16 %v2246_v12, %v2238_v11  ;;  %v2326_v11 = vld [vmem:[#allocation8 + $0x1e48] sm:$0xff]  ;;  %v2368_v58 = vld [vmem:[#allocation8 + $0x1f98] sm:$0xff] }
 0x329   :  { %2832 = vmatmul.mubr.msk.f32.vlgmr.msra.gmra.mrb[6].mxu1 %vm112_vm1, %v2049_v23  ;;  %v3719_v23 = vpack.c.bf16 %v2215_v16, %v2207_v15  ;;  %v2295_v15 = vld [vmem:[#allocation8 + $0x1d50] sm:$0xff]  ;;  %v2304_v16 = vld [vmem:[#allocation8 + $0x1d98] sm:$0xff]  ;;  %v2334_v45 = vld [vmem:[#allocation8 + $0x1e88] sm:$0xff] }
 0x32a   :  { %3700 = vmatpush1.bf16.msra.mxu1 %v3699_v0  ;;  %v3721_v0 = vpack.c.bf16 %v2232_v18, %v2224_v17  ;;  %v3681_v18 = vpack.c.bf16 %v2326_v11, %v2318_v10  ;;  %v2374_v57 = vld [vmem:[#allocation8 + $0x1fc8] sm:$0xff]  ;;  %v2132_v11 = vld [vmem:[#allocation8 + $0x1838] sm:$0xff] }
 0x32b   :  { %3702 = vmatprep.subr.bf16.mxu1 %v3701_v24  ;;  %3644 = vmatpush1.bf16.msra.mxu0 %v3643_v28  ;;  %v2223_v24 = vld [vmem:[#allocation8 + $0x1b10] sm:$0xff]  ;;  %v2248_v28 = vld [vmem:[#allocation8 + $0x1bd8] sm:$0xff]  ;;  %v2138_v10 = vld [vmem:[#allocation8 + $0x1868] sm:$0xff] }
 0x32c   :  { %3646 = vmatprep.subr.bf16.mxu0 %v3645_v29  ;;  %v2253_v29 = vld [vmem:[#allocation8 + $0x1c00] sm:$0xff]  ;;  %v3723_v33 = vpack.c.bf16 %v2231_v25, %v2223_v24  ;;  %v2311_v24 = vld [vmem:[#allocation8 + $0x1dd0] sm:$0xff]  ;;  %v2320_v25 = vld [vmem:[#allocation8 + $0x1e18] sm:$0xff] }
 0x32d   :  { %v3667_v37 = vpack.c.bf16 %v2261_v30, %v2253_v29  ;;  %v2341_v29 = vld [vmem:[#allocation8 + $0x1ec0] sm:$0xff]  ;;  %v2350_v30 = vld [vmem:[#allocation8 + $0x1f08] sm:$0xff] }
 0x32e   :  { %3704 = vmatpush1.bf16.msra.mxu1 %v3703_v34  ;;  %v3725_v34 = vpack.c.bf16 %v2248_v28, %v2240_v26  ;;  %v3685_v28 = vpack.c.bf16 %v2342_v21, %v2334_v45  ;;  %v2137_v45 = vld [vmem:[#allocation8 + $0x1860] sm:$0xff]  ;;  %v2131_v21 = vld [vmem:[#allocation8 + $0x1830] sm:$0xff] }
 0x32f   :  { %3706 = vmatprep.subr.bf16.mxu1 %v3705_v35  ;;  %3648 = vmatpush1.bf16.msra.mxu0 %v3647_v4  ;;  %v2239_v35 = vld [vmem:[#allocation8 + $0x1b90] sm:$0xff]  ;;  %v2264_v4 = vld [vmem:[#allocation8 + $0x1c58] sm:$0xff] }
 0x330   :  { %3650 = vmatprep.subr.bf16.mxu0 %v3649_v40  ;;  %v2269_v40 = vld [vmem:[#allocation8 + $0x1c80] sm:$0xff]  ;;  %v3727_v49 = vpack.c.bf16 %v2247_v36, %v2239_v35  ;;  %v2327_v35 = vld [vmem:[#allocation8 + $0x1e50] sm:$0xff]  ;;  %v2336_v36 = vld [vmem:[#allocation8 + $0x1e98] sm:$0xff] }
 0x331   :  { %v3671_v5 = vpack.c.bf16 %v2277_v41, %v2269_v40  ;;  %v2357_v40 = vld [vmem:[#allocation8 + $0x1f40] sm:$0xff] }
 0x332   :  { %3708 = vmatpush1.bf16.msra.mxu1 %v3707_v50  ;;  %v3729_v50 = vpack.c.bf16 %v2264_v4, %v2256_v59  ;;  %v3689_v4 = vpack.c.bf16 %v2358_v31, %v2350_v30  ;;  %v2153_v30 = vld [vmem:[#allocation8 + $0x18e0] sm:$0xff] }
 0x333   :  { %3710 = vmatprep.subr.bf16.mxu1 %v3709_v51  ;;  %3652 = vmatpush1.bf16.msra.mxu0 %v3651_v53  ;;  %v2255_v51 = vld [vmem:[#allocation8 + $0x1c10] sm:$0xff]  ;;  %v2280_v53 = vld [vmem:[#allocation8 + $0x1cd8] sm:$0xff] }
 0x334   :  { %3654 = vmatprep.subr.bf16.mxu0 %v3653_v55  ;;  %v2285_v55 = vld [vmem:[#allocation8 + $0x1d00] sm:$0xff]  ;;  %v3731_v60 = vpack.c.bf16 %v2263_v61, %v2255_v51  ;;  %v2352_v51 = vld [vmem:[#allocation8 + $0x1f18] sm:$0xff] }
 0x335   :  { %v3675_v3 = vpack.c.bf16 %v2293_v56, %v2285_v55  ;;  %v2360_v61 = vld [vmem:[#allocation8 + $0x1f58] sm:$0xff]  ;;  %v2366_v56 = vld [vmem:[#allocation8 + $0x1f88] sm:$0xff] }
 0x336   :  { %3712 = vmatpush1.bf16.msra.mxu1 %v3711_v62  ;;  %v3733_v62 = vpack.c.bf16 %v2280_v53, %v2272_v52  ;;  %v2351_v53 = vld [vmem:[#allocation8 + $0x1f10] sm:$0xff] }
 0x337   :  { %3714 = vmatprep.subr.bf16.mxu1 %v3713_v63  ;;  %3656 = vmatpush1.bf16.msra.mxu0 %v3655_v6  ;;  %v2271_v63 = vld [vmem:[#allocation8 + $0x1c90] sm:$0xff]  ;;  %v2296_v6 = vld [vmem:[#allocation8 + $0x1d58] sm:$0xff] }
 0x338   :  { %3658 = vmatprep.subr.bf16.mxu0 %v3657_v8  ;;  %v2301_v8 = vld [vmem:[#allocation8 + $0x1d80] sm:$0xff]  ;;  %v3735_v12 = vpack.c.bf16 %v2279_v1, %v2271_v63 }
 0x339   :  { %v3679_v17 = vpack.c.bf16 %v2309_v9, %v2301_v8  ;;  %v2365_v63 = vld [vmem:[#allocation8 + $0x1f80] sm:$0xff]  ;;  %v2130_v9 = vld [vmem:[#allocation8 + $0x1828] sm:$0xff] }
 0x33a   :  { %3716 = vmatpush1.bf16.msra.mxu1 %v3715_v13  ;;  %v3737_v13 = vpack.c.bf16 %v2296_v6, %v2288_v2  ;;  %v2373_v1 = vld [vmem:[#allocation8 + $0x1fc0] sm:$0xff]  ;;  %v2367_v6 = vld [vmem:[#allocation8 + $0x1f90] sm:$0xff] }
 0x33b   :  { %3718 = vmatprep.subr.bf16.mxu1 %v3717_v14  ;;  %3660 = vmatpush1.bf16.msra.mxu0 %v3659_v38  ;;  %v2287_v14 = vld [vmem:[#allocation8 + $0x1d10] sm:$0xff]  ;;  %v2312_v38 = vld [vmem:[#allocation8 + $0x1dd8] sm:$0xff] }
 0x33c   :  { %3662 = vmatprep.subr.bf16.mxu0 %v3661_v19  ;;  %v2317_v19 = vld [vmem:[#allocation8 + $0x1e00] sm:$0xff]  ;;  %v3739_v22 = vpack.c.bf16 %v2295_v15, %v2287_v14  ;;  %v2034_v15 = vld [vmem:[#allocation7 + $0x3] ss:$4 sm:$0x3] }
 0x33d   :  { %v3683_v26 = vpack.c.bf16 %v2325_v20, %v2317_v19 }
 0x33e   :  { %3720 = vmatpush1.bf16.msra.mxu1 %v3719_v23  ;;  %v3741_v23 = vpack.c.bf16 %v2312_v38, %v2304_v16  ;;  %v2039_v16 = vrot.slane %v2034_v15, %v4182_v44 }
 0x33f   :  { %3722 = vmatprep.subr.bf16.mxu1 %v3721_v0  ;;  %3664 = vmatpush1.bf16.msra.mxu0 %v3663_v27  ;;  %v2303_v0 = vld [vmem:[#allocation8 + $0x1d90] sm:$0xff]  ;;  %v2328_v27 = vld [vmem:[#allocation8 + $0x1e58] sm:$0xff] }
 0x340   :  { %3666 = vmatprep.subr.bf16.mxu0 %v3665_v48  ;;  %v2333_v48 = vld [vmem:[#allocation8 + $0x1e80] sm:$0xff]  ;;  %v3743_v32 = vpack.c.bf16 %v2311_v24, %v2303_v0  ;;  %v2146_v0 = vld [vmem:[#allocation8 + $0x18a8] sm:$0xff] }
 0x341   :  { %v3687_v59 = vpack.c.bf16 %v2341_v29, %v2333_v48  ;;  %v2154_v24 = vld [vmem:[#allocation8 + $0x18e8] sm:$0xff]  ;;  %v2145_v29 = vld [vmem:[#allocation8 + $0x18a0] sm:$0xff] }
 0x342   :  { %3724 = vmatpush1.bf16.msra.mxu1 %v3723_v33  ;;  %v3745_v33 = vpack.c.bf16 %v2328_v27, %v2320_v25  ;;  %v2148_v25 = vld [vmem:[#allocation8 + $0x18b8] sm:$0xff] }
 0x343   :  { %3726 = vmatprep.subr.bf16.mxu1 %v3725_v34  ;;  %3668 = vmatpush1.bf16.msra.mxu0 %v3667_v37  ;;  %v2319_v34 = vld [vmem:[#allocation8 + $0x1e10] sm:$0xff]  ;;  %v2344_v37 = vld [vmem:[#allocation8 + $0x1ed8] sm:$0xff] }
 0x344   :  { %3670 = vmatprep.subr.bf16.mxu0 %v3669_v39  ;;  %v2349_v39 = vld [vmem:[#allocation8 + $0x1f00] sm:$0xff]  ;;  %v3747_v41 = vpack.c.bf16 %v2327_v35, %v2319_v34  ;;  %v3749_v42 = vpack.c.bf16 %v2344_v37, %v2336_v36  ;;  %v2162_v34 = vld [vmem:[#allocation8 + $0x1928] sm:$0xff]  ;;  %v3765_v35 = vpack.c.bf16 %v2154_v24, %v2146_v0  ;;  %v2164_v37 = vld [vmem:[#allocation8 + $0x1938] sm:$0xff] }
 0x345   :  { %v2219_v0 = vld [vmem:[#allocation8 + $0x1af0] sm:$0xff]  ;;  %v2226_v24 = vld [vmem:[#allocation8 + $0x1b28] sm:$0xff] }
 0x346   :  { %3728 = vmatpush1.bf16.msra.mxu1 %v3727_v49  ;;  %v2343_v49 = vld [vmem:[#allocation8 + $0x1ed0] sm:$0xff] }
 0x347   :  { %3730 = vmatprep.subr.bf16.mxu1 %v3729_v50  ;;  %3672 = vmatpush1.bf16.msra.mxu0 %v3671_v5  ;;  %v3691_v50 = vpack.c.bf16 %v2357_v40, %v2349_v39  ;;  %v3751_v52 = vpack.c.bf16 %v2343_v49, %v2335_v47  ;;  %v3753_v5 = vpack.c.bf16 %v2360_v61, %v2352_v51  ;;  %v2171_v51 = vld [vmem:[#allocation8 + $0x1970] sm:$0xff]  ;;  %v2178_v61 = vld [vmem:[#allocation8 + $0x19a8] sm:$0xff] }
 0x348   :  { %3674 = vmatprep.subr.bf16.mxu0 %v3673_v54  ;;  %v2359_v54 = vld [vmem:[#allocation8 + $0x1f50] sm:$0xff]  ;;  %v3767_v39 = vpack.c.bf16 %v2153_v30, %v2145_v29  ;;  %v2225_v29 = vld [vmem:[#allocation8 + $0x1b20] sm:$0xff] }
 0x349   :  { %v3755_v55 = vpack.c.bf16 %v2359_v54, %v2351_v53  ;;  %v2188_v53 = vld [vmem:[#allocation8 + $0x19f8] sm:$0xff]  ;;  %v2233_v30 = vld [vmem:[#allocation8 + $0x1b60] sm:$0xff] }
 0x34a   :  { %3732 = vmatpush1.bf16.msra.mxu1 %v3731_v60  ;;  %v3693_v60 = vpack.c.bf16 %v2374_v57, %v2366_v56  ;;  %v2177_v56 = vld [vmem:[#allocation8 + $0x19a0] sm:$0xff] }
 0x34b   :  { %3734 = vmatprep.subr.bf16.mxu1 %v3733_v62  ;;  %3676 = vmatpush1.bf16.msra.mxu0 %v3675_v3  ;;  %v2376_v62 = vld [vmem:[#allocation8 + $0x1fd8] sm:$0xff]  ;;  %v3695_v3 = vpack.c.bf16 %v2373_v1, %v2365_v63  ;;  %v2185_v57 = vld [vmem:[#allocation8 + $0x19e0] sm:$0xff]  ;;  %v2187_v63 = vld [vmem:[#allocation8 + $0x19f0] sm:$0xff] }
 0x34c   :  { %3678 = vmatprep.subr.bf16.mxu0 %v3677_v7  ;;  %v3757_v2 = vpack.c.bf16 %v2376_v62, %v2368_v58  ;;  %v2375_v7 = vld [vmem:[#allocation8 + $0x1fd0] sm:$0xff]  ;;  %v2194_v1 = vld [vmem:[#allocation8 + $0x1a28] sm:$0xff] }
 0x34d   :  { %v3759_v8 = vpack.c.bf16 %v2375_v7, %v2367_v6  ;;  %v2179_v62 = vld [vmem:[#allocation8 + $0x19b0] sm:$0xff]  ;;  %v2204_v6 = vld [vmem:[#allocation8 + $0x1a78] sm:$0xff]  ;;  %v3775_v7 = vpack.c.bf16 %v2185_v57, %v2177_v56  ;;  %v2257_v56 = vld [vmem:[#allocation8 + $0x1c20] sm:$0xff] }
 0x34e   :  { %3736 = vmatpush1.bf16.msra.mxu1 %v3735_v12  ;;  %v3761_v12 = vpack.c.bf16 %v2138_v10, %v2130_v9  ;;  %v2193_v9 = vld [vmem:[#allocation8 + $0x1a20] sm:$0xff] }
 0x34f   :  { %3738 = vmatprep.subr.bf16.mxu1 %v3737_v13  ;;  %3680 = vmatpush1.bf16.msra.mxu0 %v3679_v17  ;;  %v2140_v13 = vld [vmem:[#allocation8 + $0x1878] sm:$0xff]  ;;  %v2043_v17 = vrot.slane %v2034_v15, %v4185_v46  ;;  %v2201_v10 = vld [vmem:[#allocation8 + $0x1a60] sm:$0xff]  ;;  %v2210_v15 = vld [vmem:[#allocation8 + $0x1aa8] sm:$0xff] }
 0x350   :  { %3682 = vmatprep.subr.bf16.mxu0 %v3681_v18  ;;  %v3825_v14 = vpack.c.bf16 %v2140_v13, %v2132_v11  ;;  %v2129_v18 = vld [vmem:[#allocation8 + $0x1820] sm:$0xff]  ;;  %v2195_v13 = vld [vmem:[#allocation8 + $0x1a30] sm:$0xff] }
 0x351   :  { %v2265_v57 = vld [vmem:[#allocation8 + $0x1c60] sm:$0xff] }
 0x352   :  { %3740 = vmatpush1.bf16.msra.mxu1 %v3739_v22  ;;  %v2139_v22 = vld [vmem:[#allocation8 + $0x1870] sm:$0xff] }
 0x353   :  { %3742 = vmatprep.subr.bf16.mxu1 %v3741_v23  ;;  %3684 = vmatpush1.bf16.msra.mxu0 %v3683_v26  ;;  %v2156_v26 = vld [vmem:[#allocation8 + $0x18f8] sm:$0xff]  ;;  %v3827_v48 = vpack.c.bf16 %v2139_v22, %v2131_v21 }
 0x354   :  { %3686 = vmatprep.subr.bf16.mxu0 %v3685_v28  ;;  %v3763_v28 = vpack.c.bf16 %v2137_v45, %v2129_v18  ;;  %v3829_v36 = vpack.c.bf16 %v2156_v26, %v2148_v25  ;;  %v3779_v18 = vpack.c.bf16 %v2201_v10, %v2193_v9  ;;  %v2217_v45 = vld [vmem:[#allocation8 + $0x1ae0] sm:$0xff]  ;;  %v2234_v25 = vld [vmem:[#allocation8 + $0x1b68] sm:$0xff]  ;;  %v2228_v26 = vld [vmem:[#allocation8 + $0x1b38] sm:$0xff] }
 0x355   :  { %v2273_v9 = vld [vmem:[#allocation8 + $0x1ca0] sm:$0xff] }
 0x356   :  { %3744 = vmatpush1.bf16.msra.mxu1 %v3743_v32  ;;  %v2147_v32 = vld [vmem:[#allocation8 + $0x18b0] sm:$0xff]  ;;  %v2281_v10 = vld [vmem:[#allocation8 + $0x1ce0] sm:$0xff] }
 0x357   :  { %3746 = vmatprep.subr.bf16.mxu1 %v3745_v33  ;;  %3688 = vmatpush1.bf16.msra.mxu0 %v3687_v59  ;;  %v2155_v33 = vld [vmem:[#allocation8 + $0x18f0] sm:$0xff]  ;;  %v2170_v59 = vld [vmem:[#allocation8 + $0x1968] sm:$0xff] }
 0x358   :  { %3690 = vmatprep.subr.bf16.mxu0 %v3689_v4  ;;  %v2172_v4 = vld [vmem:[#allocation8 + $0x1978] sm:$0xff]  ;;  %v3831_v40 = vpack.c.bf16 %v2155_v33, %v2147_v32  ;;  %v3769_v47 = vpack.c.bf16 %v2170_v59, %v2162_v34  ;;  %v3785_v32 = vpack.c.bf16 %v2234_v25, %v2226_v24  ;;  %v2227_v34 = vld [vmem:[#allocation8 + $0x1b30] sm:$0xff]  ;;  %v2250_v59 = vld [vmem:[#allocation8 + $0x1be8] sm:$0xff] }
 0x359   :  { %v3833_v49 = vpack.c.bf16 %v2172_v4, %v2164_v37  ;;  %v2244_v37 = vld [vmem:[#allocation8 + $0x1bb8] sm:$0xff]  ;;  %v2306_v24 = vld [vmem:[#allocation8 + $0x1da8] sm:$0xff] }
 0x35a   :  { %3748 = vmatpush1.bf16.msra.mxu1 %v3747_v41  ;;  %v2161_v41 = vld [vmem:[#allocation8 + $0x1920] sm:$0xff]  ;;  %v2252_v4 = vld [vmem:[#allocation8 + $0x1bf8] sm:$0xff]  ;;  %v2314_v25 = vld [vmem:[#allocation8 + $0x1de8] sm:$0xff] }
 0x35b   :  { %3750 = vmatprep.subr.bf16.mxu1 %v3749_v42  ;;  %3692 = vmatpush1.bf16.msra.mxu0 %v3691_v50  ;;  %v2169_v42 = vld [vmem:[#allocation8 + $0x1960] sm:$0xff]  ;;  %v2163_v50 = vld [vmem:[#allocation8 + $0x1930] sm:$0xff] }
 0x35c   :  { %3694 = vmatprep.subr.bf16.mxu0 %v3693_v60  ;;  %v3771_v54 = vpack.c.bf16 %v2169_v42, %v2161_v41  ;;  %v2241_v41 = vld [vmem:[#allocation8 + $0x1ba0] sm:$0xff] }
 0x35d   :  { %v2249_v42 = vld [vmem:[#allocation8 + $0x1be0] sm:$0xff] }
 0x35e   :  { %3752 = vmatpush1.bf16.msra.mxu1 %v3751_v52  ;;  %v2186_v52 = vld [vmem:[#allocation8 + $0x19e8] sm:$0xff] }
 0x35f   :  { %3754 = vmatprep.subr.bf16.mxu1 %v3753_v5  ;;  %3696 = vmatpush1.bf16.msra.mxu0 %v3695_v3  ;;  %v2180_v5 = vld [vmem:[#allocation8 + $0x19b8] sm:$0xff]  ;;  %v3773_v58 = vpack.c.bf16 %v2186_v52, %v2178_v61  ;;  %v2258_v61 = vld [vmem:[#allocation8 + $0x1c28] sm:$0xff] }
 0x360   :  { %3762 = vmatprep.subr.bf16.mxu0 %v3761_v12  ;;  %v3837_v60 = vpack.c.bf16 %v2188_v53, %v2180_v5  ;;  %v2196_v3 = vld [vmem:[#allocation8 + $0x1a38] sm:$0xff]  ;;  %v2266_v52 = vld [vmem:[#allocation8 + $0x1c68] sm:$0xff] }
 0x361   :  { %v3841_v12 = vpack.c.bf16 %v2204_v6, %v2196_v3  ;;  %v2260_v5 = vld [vmem:[#allocation8 + $0x1c38] sm:$0xff] }
 0x362   :  { %3756 = vmatpush1.bf16.msra.mxu1 %v3755_v55  ;;  %v3835_v55 = vpack.c.bf16 %v2171_v51, %v2163_v50  ;;  %v2243_v50 = vld [vmem:[#allocation8 + $0x1bb0] sm:$0xff]  ;;  %v2268_v53 = vld [vmem:[#allocation8 + $0x1c78] sm:$0xff] }
 0x363   :  { %3758 = vmatprep.subr.bf16.mxu1 %v3757_v2  ;;  %v2202_v2 = vld [vmem:[#allocation8 + $0x1a68] sm:$0xff]  ;;  %v2251_v51 = vld [vmem:[#allocation8 + $0x1bf0] sm:$0xff]  ;;  %v2276_v3 = vld [vmem:[#allocation8 + $0x1cb8] sm:$0xff] }
 0x364   :  { %v3777_v11 = vpack.c.bf16 %v2202_v2, %v2194_v1  ;;  %v2274_v1 = vld [vmem:[#allocation8 + $0x1ca8] sm:$0xff]  ;;  %v2284_v6 = vld [vmem:[#allocation8 + $0x1cf8] sm:$0xff] }
 0x365   :  { %v2282_v2 = vld [vmem:[#allocation8 + $0x1ce8] sm:$0xff] }
 0x366   :  { %3760 = vmatpush1.bf16.msra.mxu1 %v3759_v8  ;;  %v3839_v8 = vpack.c.bf16 %v2187_v63, %v2179_v62  ;;  %v2259_v62 = vld [vmem:[#allocation8 + $0x1c30] sm:$0xff] }
 0x367   :  { %3826 = vmatprep.subr.bf16.mxu1 %v3825_v14  ;;  %v2203_v14 = vld [vmem:[#allocation8 + $0x1a70] sm:$0xff] }
 0x368   :  { %v2267_v63 = vld [vmem:[#allocation8 + $0x1c70] sm:$0xff] }
 0x3fc   :  { %v2118_v38 = vpop.f32.mrb[6].mxu1 }
 0x3fd   :  { %v2119_v19 = vadd.f32 %v2118_v38, %v2039_v16  ;;  %v2120_v20 = vpop.f32.mrb[7].mxu1  ;;  %v2218_v16 = vld [vmem:[#allocation8 + $0x1ae8] sm:$0xff]  ;;  %v2220_v38 = vld [vmem:[#allocation8 + $0x1af8] sm:$0xff] }
 0x3fe   :  { %v2121_v23 = vadd.f32 %v2120_v20, %v2043_v17  ;;  %v2212_v17 = vld [vmem:[#allocation8 + $0x1ab8] sm:$0xff]  ;;  %v2209_v20 = vld [vmem:[#allocation8 + $0x1aa0] sm:$0xff]  ;;  %v3781_v21 = vpack.c.bf16 %v2218_v16, %v2210_v15  ;;  %v2290_v15 = vld [vmem:[#allocation8 + $0x1d28] sm:$0xff] }
 0x3ff   :  { %v4235_v31 = vmax.f32 %v2119_v19, 0.0  ;;  %v3843_v19 = vpack.c.bf16 %v2203_v14, %v2195_v13  ;;  %v3845_v22 = vpack.c.bf16 %v2220_v38, %v2212_v17  ;;  %v2275_v13 = vld [vmem:[#allocation8 + $0x1cb0] sm:$0xff]  ;;  %v2298_v16 = vld [vmem:[#allocation8 + $0x1d68] sm:$0xff]  ;;  %v2292_v17 = vld [vmem:[#allocation8 + $0x1d38] sm:$0xff] }
 0x400   :  { %v2124_v27 = vmax.f32 %v2121_v23, 0.0  ;;  %v2211_v23 = vld [vmem:[#allocation8 + $0x1ab0] sm:$0xff]  ;;  %v2300_v38 = vld [vmem:[#allocation8 + $0x1d78] sm:$0xff] }
 0x401   :  { %v2283_v14 = vld [vmem:[#allocation8 + $0x1cf0] sm:$0xff] }
 0x402   :  { %2445 = vmatprep.mubr.f32.mxu0 %v2124_v27  ;;  %2516 = vmatprep.mubr.f32.mxu1 %v2124_v27 }
 0x403   :  { %2446 = vmatmul.mubr.f32.vlgmr.msra.gmra.mrb[2].mxu0 %v4235_v31  ;;  %2517 = vmatmul.mubr.f32.vlgmr.msra.gmra.mrb[2].mxu1 %v4235_v31 }
 0x404   :  { %3764 = vmatpush1.bf16.msra.mxu0 %v3763_v28  ;;  %3828 = vmatpush1.bf16.msra.mxu1 %v3827_v48  ;;  %v3783_v28 = vpack.c.bf16 %v2217_v45, %v2209_v20  ;;  %v3847_v48 = vpack.c.bf16 %v2219_v0, %v2211_v23  ;;  %v2289_v20 = vld [vmem:[#allocation8 + $0x1d20] sm:$0xff]  ;;  %v2291_v23 = vld [vmem:[#allocation8 + $0x1d30] sm:$0xff] }
 0x405   :  { %2587 = vmatprep.mubr.f32.mxu0 %v2124_v27  ;;  %2658 = vmatprep.mubr.f32.mxu1 %v2124_v27  ;;  %v2236_v27 = vld [vmem:[#allocation8 + $0x1b78] sm:$0xff]  ;;  %v2297_v45 = vld [vmem:[#allocation8 + $0x1d60] sm:$0xff]  ;;  %v2299_v0 = vld [vmem:[#allocation8 + $0x1d70] sm:$0xff] }
 0x406   :  { %3766 = vmatprep.subr.bf16.mxu0 %v3765_v35  ;;  %3830 = vmatprep.subr.bf16.mxu1 %v3829_v36  ;;  %v3849_v33 = vpack.c.bf16 %v2236_v27, %v2228_v26  ;;  %v2235_v35 = vld [vmem:[#allocation8 + $0x1b70] sm:$0xff]  ;;  %v2242_v36 = vld [vmem:[#allocation8 + $0x1ba8] sm:$0xff]  ;;  %v2308_v26 = vld [vmem:[#allocation8 + $0x1db8] sm:$0xff] }
 0x407   :  { %v2316_v27 = vld [vmem:[#allocation8 + $0x1df8] sm:$0xff] }
 0x408   :  { %3768 = vmatpush1.bf16.msra.mxu0 %v3767_v39  ;;  %3832 = vmatpush1.bf16.msra.mxu1 %v3831_v40  ;;  %v3787_v39 = vpack.c.bf16 %v2233_v30, %v2225_v29  ;;  %v3851_v40 = vpack.c.bf16 %v2235_v35, %v2227_v34  ;;  %v2305_v29 = vld [vmem:[#allocation8 + $0x1da0] sm:$0xff]  ;;  %v2307_v34 = vld [vmem:[#allocation8 + $0x1db0] sm:$0xff] }
 0x409   :  { %3770 = vmatprep.subr.bf16.mxu0 %v3769_v47  ;;  %3834 = vmatprep.subr.bf16.mxu1 %v3833_v49  ;;  %v3789_v47 = vpack.c.bf16 %v2250_v59, %v2242_v36  ;;  %v3853_v49 = vpack.c.bf16 %v2252_v4, %v2244_v37  ;;  %v2313_v30 = vld [vmem:[#allocation8 + $0x1de0] sm:$0xff]  ;;  %v2315_v35 = vld [vmem:[#allocation8 + $0x1df0] sm:$0xff]  ;;  %v2322_v36 = vld [vmem:[#allocation8 + $0x1e28] sm:$0xff] }
 0x40a   :  { %v2330_v59 = vld [vmem:[#allocation8 + $0x1e68] sm:$0xff]  ;;  %v2324_v37 = vld [vmem:[#allocation8 + $0x1e38] sm:$0xff] }
 0x40b   :  { %v2332_v4 = vld [vmem:[#allocation8 + $0x1e78] sm:$0xff] }
 0x40c   :  { %3772 = vmatpush1.bf16.msra.mxu0 %v3771_v54  ;;  %3836 = vmatpush1.bf16.msra.mxu1 %v3835_v55  ;;  %v3791_v54 = vpack.c.bf16 %v2249_v42, %v2241_v41  ;;  %v3855_v55 = vpack.c.bf16 %v2251_v51, %v2243_v50  ;;  %v2321_v41 = vld [vmem:[#allocation8 + $0x1e20] sm:$0xff]  ;;  %v2323_v50 = vld [vmem:[#allocation8 + $0x1e30] sm:$0xff] }
 0x40d   :  { %3774 = vmatprep.subr.bf16.mxu0 %v3773_v58  ;;  %3838 = vmatprep.subr.bf16.mxu1 %v3837_v60  ;;  %v3793_v58 = vpack.c.bf16 %v2266_v52, %v2258_v61  ;;  %v3857_v60 = vpack.c.bf16 %v2268_v53, %v2260_v5  ;;  %v2329_v42 = vld [vmem:[#allocation8 + $0x1e60] sm:$0xff]  ;;  %v2331_v51 = vld [vmem:[#allocation8 + $0x1e70] sm:$0xff]  ;;  %v2338_v61 = vld [vmem:[#allocation8 + $0x1ea8] sm:$0xff] }
 0x40e   :  { %v2346_v52 = vld [vmem:[#allocation8 + $0x1ee8] sm:$0xff]  ;;  %v2340_v5 = vld [vmem:[#allocation8 + $0x1eb8] sm:$0xff] }
 0x40f   :  { %v2348_v53 = vld [vmem:[#allocation8 + $0x1ef8] sm:$0xff] }
 0x410   :  { %3776 = vmatpush1.bf16.msra.mxu0 %v3775_v7  ;;  %3840 = vmatpush1.bf16.msra.mxu1 %v3839_v8  ;;  %v3795_v7 = vpack.c.bf16 %v2265_v57, %v2257_v56  ;;  %v3859_v8 = vpack.c.bf16 %v2267_v63, %v2259_v62  ;;  %v2337_v56 = vld [vmem:[#allocation8 + $0x1ea0] sm:$0xff]  ;;  %v2339_v62 = vld [vmem:[#allocation8 + $0x1eb0] sm:$0xff] }
 0x411   :  { %3778 = vmatprep.subr.bf16.mxu0 %v3777_v11  ;;  %3842 = vmatprep.subr.bf16.mxu1 %v3841_v12  ;;  %v3797_v11 = vpack.c.bf16 %v2282_v2, %v2274_v1  ;;  %v3861_v12 = vpack.c.bf16 %v2284_v6, %v2276_v3  ;;  %v2345_v57 = vld [vmem:[#allocation8 + $0x1ee0] sm:$0xff]  ;;  %v2347_v63 = vld [vmem:[#allocation8 + $0x1ef0] sm:$0xff]  ;;  %v2354_v1 = vld [vmem:[#allocation8 + $0x1f28] sm:$0xff] }
 0x412   :  { %v2362_v2 = vld [vmem:[#allocation8 + $0x1f68] sm:$0xff]  ;;  %v2356_v3 = vld [vmem:[#allocation8 + $0x1f38] sm:$0xff] }
 0x413   :  { %v2364_v6 = vld [vmem:[#allocation8 + $0x1f78] sm:$0xff] }
 0x414   :  { %3780 = vmatpush1.bf16.msra.mxu0 %v3779_v18  ;;  %3844 = vmatpush1.bf16.msra.mxu1 %v3843_v19  ;;  %v3799_v18 = vpack.c.bf16 %v2281_v10, %v2273_v9  ;;  %v3863_v19 = vpack.c.bf16 %v2283_v14, %v2275_v13  ;;  %v2353_v9 = vld [vmem:[#allocation8 + $0x1f20] sm:$0xff]  ;;  %v2355_v13 = vld [vmem:[#allocation8 + $0x1f30] sm:$0xff] }
 0x415   :  { %3782 = vmatprep.subr.bf16.mxu0 %v3781_v21  ;;  %3846 = vmatprep.subr.bf16.mxu1 %v3845_v22  ;;  %v3801_v21 = vpack.c.bf16 %v2298_v16, %v2290_v15  ;;  %v3865_v22 = vpack.c.bf16 %v2300_v38, %v2292_v17  ;;  %v2361_v10 = vld [vmem:[#allocation8 + $0x1f60] sm:$0xff]  ;;  %v2363_v14 = vld [vmem:[#allocation8 + $0x1f70] sm:$0xff]  ;;  %v2370_v15 = vld [vmem:[#allocation8 + $0x1fa8] sm:$0xff] }
 0x416   :  { %v2378_v16 = vld [vmem:[#allocation8 + $0x1fe8] sm:$0xff]  ;;  %v2372_v17 = vld [vmem:[#allocation8 + $0x1fb8] sm:$0xff] }
 0x417   :  { %v2380_v38 = vld [vmem:[#allocation8 + $0x1ff8] sm:$0xff] }
 0x418   :  { %3784 = vmatpush1.bf16.msra.mxu0 %v3783_v28  ;;  %3848 = vmatpush1.bf16.msra.mxu1 %v3847_v48  ;;  %v3803_v28 = vpack.c.bf16 %v2297_v45, %v2289_v20  ;;  %v3867_v48 = vpack.c.bf16 %v2299_v0, %v2291_v23  ;;  %v2369_v20 = vld [vmem:[#allocation8 + $0x1fa0] sm:$0xff]  ;;  %v3821_v45 = vpack.c.bf16 %v2378_v16, %v2370_v15  ;;  %v2371_v23 = vld [vmem:[#allocation8 + $0x1fb0] sm:$0xff] }
 0x419   :  { %3786 = vmatprep.subr.bf16.mxu0 %v3785_v32  ;;  %3850 = vmatprep.subr.bf16.mxu1 %v3849_v33  ;;  %v3805_v32 = vpack.c.bf16 %v2314_v25, %v2306_v24  ;;  %v3869_v33 = vpack.c.bf16 %v2316_v27, %v2308_v26  ;;  %v2379_v0 = vld [vmem:[#allocation8 + $0x1ff0] sm:$0xff] }
 0x41a   :  { %v3887_v25 = vpack.c.bf16 %v2379_v0, %v2371_v23 }
 0x41c   :  { %3788 = vmatpush1.bf16.msra.mxu0 %v3787_v39  ;;  %3852 = vmatpush1.bf16.msra.mxu1 %v3851_v40  ;;  %v3807_v39 = vpack.c.bf16 %v2313_v30, %v2305_v29  ;;  %v3871_v40 = vpack.c.bf16 %v2315_v35, %v2307_v34  ;;  %v2673_v29 = vld [vmem:[#allocation10] sm:$0xff] }
 0x41d   :  { %3790 = vmatprep.subr.bf16.mxu0 %v3789_v47  ;;  %3854 = vmatprep.subr.bf16.mxu1 %v3853_v49  ;;  %v3809_v47 = vpack.c.bf16 %v2330_v59, %v2322_v36  ;;  %v3873_v49 = vpack.c.bf16 %v2332_v4, %v2324_v37  ;;  %v2678_v30 = vrot.slane %v2673_v29, %v4182_v44  ;;  %v2689_v59 = vsub.s32 3, %v4179_v43 }
 0x41f   :  { %v2690_v44 = vrot.slane %v2673_v29, %v2689_v59 }
 0x420   :  { %3792 = vmatpush1.bf16.msra.mxu0 %v3791_v54  ;;  %3856 = vmatpush1.bf16.msra.mxu1 %v3855_v55  ;;  %v3811_v54 = vpack.c.bf16 %v2329_v42, %v2321_v41  ;;  %v3875_v55 = vpack.c.bf16 %v2331_v51, %v2323_v50  ;;  %v2701_v41 = vsub.s32 6, %v4179_v43  ;;  %v2697_v42 = vsub.s32 5, %v4179_v43 }
 0x421   :  { %3794 = vmatprep.subr.bf16.mxu0 %v3793_v58  ;;  %3858 = vmatprep.subr.bf16.mxu1 %v3857_v60  ;;  %v3813_v58 = vpack.c.bf16 %v2346_v52, %v2338_v61  ;;  %v3877_v60 = vpack.c.bf16 %v2348_v53, %v2340_v5  ;;  %v2705_v50 = vsub.s32 7, %v4179_v43 }
 0x422   :  { %v2702_v52 = vrot.slane %v2673_v29, %v2701_v41  ;;  %v2698_v5 = vrot.slane %v2673_v29, %v2697_v42 }
 0x424   :  { %3796 = vmatpush1.bf16.msra.mxu0 %v3795_v7  ;;  %3860 = vmatpush1.bf16.msra.mxu1 %v3859_v8  ;;  %v3815_v7 = vpack.c.bf16 %v2345_v57, %v2337_v56  ;;  %v3879_v8 = vpack.c.bf16 %v2347_v63, %v2339_v62 }
 0x425   :  { %3798 = vmatprep.subr.bf16.mxu0 %v3797_v11  ;;  %3862 = vmatprep.subr.bf16.mxu1 %v3861_v12  ;;  %v3817_v11 = vpack.c.bf16 %v2362_v2, %v2354_v1  ;;  %v3881_v12 = vpack.c.bf16 %v2364_v6, %v2356_v3 }
 0x428   :  { %3800 = vmatpush1.bf16.msra.mxu0 %v3799_v18  ;;  %3864 = vmatpush1.bf16.msra.mxu1 %v3863_v19  ;;  %v3819_v18 = vpack.c.bf16 %v2361_v10, %v2353_v9  ;;  %v3883_v19 = vpack.c.bf16 %v2363_v14, %v2355_v13 }
 0x429   :  { %3802 = vmatprep.subr.bf16.mxu0 %v3801_v21  ;;  %3866 = vmatprep.subr.bf16.mxu1 %v3865_v22  ;;  %v3885_v21 = vpack.c.bf16 %v2380_v38, %v2372_v17  ;;  %v2377_v22 = vld [vmem:[#allocation8 + $0x1fe0] sm:$0xff] }
 0x42a   :  { %v3823_v24 = vpack.c.bf16 %v2377_v22, %v2369_v20 }
 0x42c   :  { %3804 = vmatpush1.bf16.msra.mxu0 %v3803_v28  ;;  %3868 = vmatpush1.bf16.msra.mxu1 %v3867_v48 }
 0x42d   :  { %3806 = vmatprep.subr.bf16.mxu0 %v3805_v32  ;;  %3870 = vmatprep.subr.bf16.mxu1 %v3869_v33  ;;  %v2682_v32 = vrot.slane %v2673_v29, %v4185_v46  ;;  %v2685_v33 = vsub.s32 2, %v4179_v43 }
 0x42f   :  { %v2686_v36 = vrot.slane %v2673_v29, %v2685_v33 }
 0x430   :  { %3808 = vmatpush1.bf16.msra.mxu0 %v3807_v39  ;;  %3872 = vmatpush1.bf16.msra.mxu1 %v3871_v40  ;;  %v2693_v40 = vsub.s32 4, %v4179_v43 }
 0x431   :  { %3810 = vmatprep.subr.bf16.mxu0 %v3809_v47  ;;  %3874 = vmatprep.subr.bf16.mxu1 %v3873_v49 }
 0x432   :  { %v2694_v61 = vrot.slane %v2673_v29, %v2693_v40 }
 0x434   :  { %3812 = vmatpush1.bf16.msra.mxu0 %v3811_v54  ;;  %3876 = vmatpush1.bf16.msra.mxu1 %v3875_v55  ;;  %v2706_v55 = vrot.slane %v2673_v29, %v2705_v50 }
 0x435   :  { %3814 = vmatprep.subr.bf16.mxu0 %v3813_v58  ;;  %3878 = vmatprep.subr.bf16.mxu1 %v3877_v60 }
 0x438   :  { %3816 = vmatpush1.bf16.msra.mxu0 %v3815_v7  ;;  %3880 = vmatpush1.bf16.msra.mxu1 %v3879_v8 }
 0x439   :  { %3818 = vmatprep.subr.bf16.mxu0 %v3817_v11  ;;  %3882 = vmatprep.subr.bf16.mxu1 %v3881_v12 }
 0x43c   :  { %3820 = vmatpush1.bf16.msra.mxu0 %v3819_v18  ;;  %3884 = vmatpush1.bf16.msra.mxu1 %v3883_v19 }
 0x43d   :  { %3822 = vmatprep.subr.bf16.mxu0 %v3821_v45  ;;  %3886 = vmatprep.subr.bf16.mxu1 %v3885_v21 }
 0x440   :  { %3824 = vmatpush1.bf16.msra.mxu0 %v3823_v24  ;;  %3888 = vmatpush1.bf16.msra.mxu1 %v3887_v25  ;;  %v4081_v24 = vmov 1983009808  }
 0x441   :  { %v2777_v25 = vunpack.c.l.s4 %v4081_v24 }
 0x443   :  { %2588 = vmatmul.mubr.f32.vlgmr.msra.gmra.mrb[4].mxu0 %v4235_v31  ;;  %2659 = vmatmul.mubr.f32.vlgmr.msra.gmra.mrb[4].mxu1 %v4235_v31 }
 0x4d6   :  { %v2447_v26 = vpop.f32.mrb[2].mxu0  ;;  %v2518_v27 = vpop.f32.mrb[2].mxu1 }
 0x4d7   :  { %v2449_v28 = vpop.f32.mrb[3].mxu0  ;;  %v2520_v48 = vpop.f32.mrb[3].mxu1  ;;  %v4244_v34 = vadd.f32 %v2678_v30, %v2447_v26  ;;  %v2717_v4 = vadd.f32 %v2686_v36, %v2518_v27  ;;  %v2778_v26 = vunpack.c.0.s8 %v2777_v25 }
 0x4d8   :  { %v4246_v35 = vadd.f32 %v2682_v32, %v2449_v28  ;;  %v2718_v49 = vadd.f32 %v2690_v44, %v2520_v48 }
 0x4d9   :  { %v2723_v31 = vmul.f32 %v4244_v34, %v4244_v34  ;;  %v2725_v47 = vmul.f32 %v2717_v4, %v2717_v4  ;;  %v2781_v28 = vsub.s32 %v2778_v26, %v4179_v43 }
 0x4da   :  { %v2724_v37 = vmul.f32 %v4246_v35, %v4246_v35  ;;  %v2726_v54 = vmul.f32 %v2718_v49, %v2718_v49 }
 0x4db   :  { %v2732_v46 = vsel %vm2731_vm2, %v2723_v31, 0.0  ;;  %v2735_v53 = vsel %vm2731_vm2, %v2725_v47, 0.0 }
 0x4dc   :  { %v2733_v39 = vsel %vm2731_vm2, %v2724_v37, 0.0  ;;  %v2737_v3 = vsel %vm2731_vm2, %v2726_v54, 0.0 }
 0x4dd   :  { %v2734_v51 = vadd.f32 %v2733_v39, %v2732_v46 }
 0x4df   :  { %v2736_v56 = vadd.f32 %v2735_v53, %v2734_v51 }
 0x4e1   :  { %v2738_v8 = vadd.f32 %v2737_v3, %v2736_v56 }
 0x516   :  { %v2589_v57 = vpop.f32.mrb[4].mxu0  ;;  %v2660_v58 = vpop.f32.mrb[4].mxu1 }
 0x517   :  { %v2719_v60 = vadd.f32 %v2694_v61, %v2589_v57  ;;  %v2721_v62 = vadd.f32 %v2702_v52, %v2660_v58  ;;  %v2591_v63 = vpop.f32.mrb[5].mxu0  ;;  %v2662_v1 = vpop.f32.mrb[5].mxu1 }
 0x518   :  { %v2720_v2 = vadd.f32 %v2698_v5, %v2591_v63  ;;  %v2722_v7 = vadd.f32 %v2706_v55, %v2662_v1 }
 0x519   :  { %v2727_v6 = vmul.f32 %v2719_v60, %v2719_v60  ;;  %v2729_v11 = vmul.f32 %v2721_v62, %v2721_v62 }
 0x51a   :  { %v2728_v9 = vmul.f32 %v2720_v2, %v2720_v2  ;;  %v2730_v14 = vmul.f32 %v2722_v7, %v2722_v7 }
 0x51b   :  { %v2739_v10 = vsel %vm2731_vm2, %v2727_v6, 0.0  ;;  %v2743_v16 = vsel %vm2731_vm2, %v2729_v11, 0.0 }
 0x51c   :  { %v2740_v12 = vadd.f32 %v2739_v10, %v2738_v8  ;;  %v2741_v13 = vsel %vm2731_vm2, %v2728_v9, 0.0  ;;  %v2745_v38 = vsel %vm2731_vm2, %v2730_v14, 0.0 }
 0x51e   :  { %v2742_v15 = vadd.f32 %v2741_v13, %v2740_v12 }
 0x520   :  { %v2744_v17 = vadd.f32 %v2743_v16, %v2742_v15 }
 0x522   :  { %v2746_v18 = vadd.f32 %v2745_v38, %v2744_v17 }
 0x524   :  { %2747 = vadd.xlane.f32.xlu0 %v2746_v18 }
 0x5b1   :  { %v2748_v19 = vpop.xlane.xlu0 %2747 }
 0x5b2   :  { %3926 = vrsqrt.f32 %v2748_v19  ;;  %vm2751_vm3 = vcmp.eq.f32.partialorder %v2748_v19, inf  ;;  %v2754_v21 = vand.u32 2147483648, %v2748_v19  ;;  %vm2753_vm4 = vcmp.eq.f32.partialorder %v2748_v19, 0.0 }
 0x5bc   :  { %v3927_v20 = vpop.eup %3926 }
 0x5bd   :  { %v2750_v45 = vmul.f32 %v3927_v20, %v2748_v19 }
 0x5bf   :  { %v2752_v22 = vsel %vm2751_vm3, %v2748_v19, %v2750_v45 }
 0x5c0   :  { %v2755_v23 = vsel %vm2753_vm4, %v2754_v21, %v2752_v22 }
 0x5c1   :  { %v2756_v0 = vmax.f32 %v2755_v23, 1e-12 }
 0x5c3   :  { %3928 = vrcp.f32 %v2756_v0 }
 0x5cd   :  { %v3929_v27 = vpop.eup %3928 }
 0x5ce   :  { %v2758_v48 = vmul.f32 %v3929_v27, %v4244_v34  ;;  %v2759_v29 = vmul.f32 %v3929_v27, %v4246_v35  ;;  %v2760_v30 = vmul.f32 %v3929_v27, %v2717_v4  ;;  %v2761_v32 = vmul.f32 %v3929_v27, %v2718_v49 }
 0x5cf   :  { %v2762_v33 = vmul.f32 %v3929_v27, %v2719_v60  ;;  %v2763_v36 = vmul.f32 %v3929_v27, %v2720_v2  ;;  %v2764_v59 = vmul.f32 %v3929_v27, %v2721_v62  ;;  %v2765_v31 = vmul.f32 %v3929_v27, %v2722_v7 }
 0x5d0   :  { %v2774_v37 = vcombine.low %v2758_v48, %v2759_v29  ;;  %v2775_v44 = vcombine.low %v2760_v30, %v2761_v32 }
 0x5d1   :  { %v2791_v46 = vcombine.low %v2762_v33, %v2763_v36  ;;  %v2792_v39 = vcombine.low %v2764_v59, %v2765_v31 }
 0x5d2   :  { %v2782_v40 = vrot.slane %v2774_v37, %v2781_v28  ;;  %v2789_v41 = vrot.slane %v2775_v44, %v2781_v28 }
 0x5d3   :  { %v2799_v42 = vrot.slane %v2791_v46, %v2781_v28  ;;  %v2806_v43 = vrot.slane %v2792_v39, %v2781_v28 }
 0x5d4   :  { %v2790_v47 = vcombine.low %v2782_v40, %v2789_v41 }
 0x5d5   :  { %v2807_v34 = vcombine.low %v2799_v42, %v2806_v43 }
 0x5d6   :  { %2810 = vst [vmem:[#allocation11] sm:$0xff] %v2790_v47 }
 0x5d7   :  { %2811 = vst [vmem:[#allocation11 + $0x8] sm:$0xff] %v2807_v34 }
 0x5d8   :  { %4051 = shalt.err (!%p4048_p2)
}
 0x5d9   :  { %s4052_s6 = scalar_lea.hbm %s4285_s5, 256 }
 0x5da   :  { %p4053_p3 = scmp.ne.s32.totalorder %s4285_s5, %s4052_s6  ;;  %p4056_p4 = scmp.lt.u32.totalorder %s4052_s6, %s4285_s5 }
 0x5dc   :  { %p4058_p5 = pnand %p4056_p4, %p4053_p3 }
 0x5de   :  { %4061 = shalt.err (!%p4058_p5)
}
 0x5df   :  { %2821 = dma.vmem_to_hbm [thread:$0]  %s2819_s28, 256, %s4285_s5, [#allocation4]  }
 0x5e0   :  { %4068 = dma.done.wait [#allocation4], 256  }
 0x5e1   :  { %4069 = vsyncadd [#allocation4], 4294967040 }
 0x5e2   :  { %2825 = vsyncpa [#allocation3], 1 }
 0x5e3   :  { %2826 = vsyncpa [#allocation6], 1 }
 0x5e4   :  { %2827 = vsyncpa [#allocation9], 1 }
 0x5e5   :  { %2828 = vsyncpa [#allocation4], 1 }

</bundles_post_ra>
